<compile_context>
chip_gen: v7x
topology: tpu7x:2x2x1
jax: 0.10.0
libtpu: 0.0.40
codegen_flags: <defaults>
</compile_context>

<pallas_src>
import functools

import jax
import jax.numpy as jnp
from jax import lax
from jax.experimental import pallas as pl
from jax.experimental.pallas import tpu as pltpu


# ----------------------------- fused Pallas kernel ---------------------------


def _decoder_kernel(x3_ref, x2_ref, x1_ref, m1_ref, m2_ref, mska_ref, mskb_ref,
                    w1au_ref, w1as_ref, b1a_ref, w1b_ref, b1b_ref,
                    w2au_ref, w2as_ref, b2a_ref, w2b_ref, b2b_ref,
                    w3a_ref, b3a_ref, w3b_ref, b3b_ref,
                    o_ref, *, wpa, wpb):
    """One batch element of the whole SmallDecoder forward pass.

    Layout: channel-major "padded-flat" tiles -- C on sublanes, the flattened
    (H+2)*(W+2) spatial axis (with a zero 1-pixel border) on lanes -- so every
    3x3-conv tap is a single static lane shift plus one small MXU matmul.

    x3_ref : (1, C3, h3*w3)   deepest 4x4 map, flat (no pad; matmul input only)
    x2_ref : (1, C2, Pa)      skip for up1, padded-flat 8x8, zero border
    x1_ref : (1, C1, Pb)      skip for up2, padded-flat 16x16, zero border
    m1_ref : (h3*w3, Pa)      bilinear 2x operator 4x4 -> padded 8x8
    m2_ref : (Pa, Pb)         bilinear 2x operator padded 8x8 -> padded 16x16
    msk*   : (1, P)           interior mask (1 inside, 0 on the border)
    w*_ref : (9, Cout, Cin)   BN-folded per-tap conv weights (tap = dy*3+dx)
    b*_ref : (Cout, 1)        BN-folded conv bias
    o_ref  : (1, out_ch, Pb)  padded-flat output (wrapper drops the border)
    """
    deltas_a = tuple((dy - 1) * wpa + (dx - 1)
                     for dy in range(3) for dx in range(3))
    deltas_b = tuple((dy - 1) * wpb + (dx - 1)
                     for dy in range(3) for dx in range(3))

    def shift_lanes(x, delta):
        # out[:, q] = x[:, q + delta].  Circular wrap only lands on border
        # output positions, which are zeroed by the interior mask (or dropped
        # by the wrapper for the final conv), so the wrap content is don't-care.
        p = x.shape[-1]
        d = delta % p
        if d == 0:
            return x
        return jnp.concatenate([x[:, d:], x[:, :d]], axis=-1)

    def conv3x3(xs, w_refs, b_ref, deltas, act, mask):
        # xs: list of (Cin_g, P) operands (the split "concat" groups);
        # w_refs: matching list of (9, Cout, Cin_g) BN-folded tap weights.
        acc = None
        for t in range(9):
            for x, w_ref in zip(xs, w_refs):
                term = jnp.dot(w_ref[t], shift_lanes(x, deltas[t]),
                               preferred_element_type=jnp.float32)
                acc = term if acc is None else acc + term
        y = acc + b_ref[...]                       # (Cout, P) + (Cout, 1)
        if act == "leaky_relu":                    # slope 0.01 (F.leaky_relu)
            y = jnp.where(y >= 0, y, 0.01 * y)
        elif act == "relu":
            y = jnp.maximum(y, 0.0)
        elif act == "tanh":
            y = jnp.tanh(y)
        if mask is not None:                       # re-zero the 1-pixel border
            y = y * mask
        return y

    x3 = x3_ref[0]                                 # (C3, h3*w3)
    x2 = x2_ref[0]                                 # (C2, Pa)
    x1 = x1_ref[0]                                 # (C1, Pb)
    mska = mska_ref[...]                           # (1, Pa)
    mskb = mskb_ref[...]                           # (1, Pb)

    # --- UpBlockSkip 1 (4x4 -> 8x8): upsample x[3], cat x[2] (split weights),
    #     conv1, conv2 + BN + leaky_relu.  torch order: cat((upsampled, skip)).
    up = jnp.dot(x3, m1_ref[...], preferred_element_type=jnp.float32)   # (C3, Pa)
    h = conv3x3([up, x2], [w1au_ref, w1as_ref], b1a_ref, deltas_a, "linear", mska)
    z = conv3x3([h], [w1b_ref], b1b_ref, deltas_a, "leaky_relu", mska)

    # --- UpBlockSkip 2 (8x8 -> 16x16).
    up = jnp.dot(z, m2_ref[...], preferred_element_type=jnp.float32)    # (f2, Pb)
    h = conv3x3([up, x1], [w2au_ref, w2as_ref], b2a_ref, deltas_b, "linear", mskb)
    z = conv3x3([h], [w2b_ref], b2b_ref, deltas_b, "leaky_relu", mskb)

    # --- final CNNBlock + tanh: relu(BN1(conv1(z))) -> conv2 -> tanh.
    h = conv3x3([z], [w3a_ref], b3a_ref, deltas_b, "relu", mskb)
    y = conv3x3([h], [w3b_ref], b3b_ref, deltas_b, "tanh", None)
    o_ref[0] = y                                   # (out_ch, Pb) lane-dense store


# ------------------------------ wrapper / params ------------------------------


def _upsample1d_matrix(n):
    """(2n, n) 1-D bilinear 2x matrix, align_corners=False, edge-clamped."""
    m = jnp.zeros((2 * n, n), jnp.float32)
    j = jnp.arange(n)
    m = m.at[2 * j, j].add(0.75)
    m = m.at[2 * j, jnp.maximum(j - 1, 0)].add(0.25)
    m = m.at[2 * j + 1, j].add(0.75)
    m = m.at[2 * j + 1, jnp.minimum(j + 1, n - 1)].add(0.25)
    return m


def _interior_indices(h, w):
    """Flat indices of the interior of an (h+2, w+2) zero-padded image."""
    i, j = jnp.meshgrid(jnp.arange(h), jnp.arange(w), indexing="ij")
    return ((i + 1) * (w + 2) + (j + 1)).reshape(-1)


def upsample2x_operator(h, w, padded_input):
    """Right-multiply operator for channel-major bilinear 2x upsample.

    Maps an (h, w) map (flattened on lanes) to the padded-flat
    ((2h+2)*(2w+2)) layout of the (2h, 2w) result, with a zero border.
    If padded_input, rows are indexed in the padded-flat ((h+2)*(w+2))
    layout of the input (border rows zero)."""
    u = jnp.kron(_upsample1d_matrix(h), _upsample1d_matrix(w))      # (4hw, hw)
    m = jnp.zeros((h * w, (2 * h + 2) * (2 * w + 2)), jnp.float32)
    m = m.at[:, _interior_indices(2 * h, 2 * w)].set(u.T)
    if not padded_input:
        return m
    mp = jnp.zeros(((h + 2) * (w + 2), m.shape[1]), jnp.float32)
    return mp.at[_interior_indices(h, w), :].set(m)


def interior_mask(h, w):
    """(1, (h+2)*(w+2)) mask: 1 on the interior, 0 on the 1-pixel border."""
    m = jnp.zeros((1, (h + 2) * (w + 2)), jnp.float32)
    return m.at[0, _interior_indices(h, w)].set(1.0)


def init_params(key, full_features, out_ch):
    f1, f2, f3 = full_features[1], full_features[2], full_features[3]
    keys = iter(jax.random.split(key, 32))

    def conv_p(cin, cout):
        w = jax.random.normal(next(keys), (3, 3, cin, cout),
                              jnp.float32) / jnp.sqrt(9.0 * cin)
        b = 0.05 * jax.random.normal(next(keys), (cout,), jnp.float32)
        return w, b

    def bn_p(c):
        gamma = 1.0 + 0.1 * jax.random.normal(next(keys), (c,), jnp.float32)
        beta = 0.1 * jax.random.normal(next(keys), (c,), jnp.float32)
        eps = 1e-5
        # eval-mode BN with running_mean=0, running_var=1 (PyTorch init)
        return gamma / jnp.sqrt(1.0 + eps), beta

    p = {}
    p["up1_c1"] = conv_p(f3 + f2, f2)
    p["up1_c2"] = conv_p(f2, f2)
    p["up1_bn"] = bn_p(f2)
    p["up2_c1"] = conv_p(f2 + f1, f1)
    p["up2_c2"] = conv_p(f1, f1)
    p["up2_bn"] = bn_p(f1)
    p["fin_c1"] = conv_p(f1, out_ch)
    p["fin_bn1"] = bn_p(out_ch)
    p["fin_c2"] = conv_p(out_ch, out_ch)
    return p


def prepare_kernel_params(params, full_features):
    """Fold eval-mode BN into the convs, re-arrange each conv as nine per-tap
    (Cout, Cin) operands (channel-major orientation), and split the first conv
    of each UpBlockSkip by input-channel group (upsampled | skip) so the kernel
    never concatenates activations."""
    # TODO(synk): for a trained checkpoint fold the real running_mean/var here.
    def fold(conv, bn=None, split=None):
        w, b = conv                                   # (3,3,cin,cout), (cout,)
        cin, cout = w.shape[2], w.shape[3]
        if bn is None:
            s = jnp.ones((cout,), jnp.float32)
            t = jnp.zeros((cout,), jnp.float32)
        else:
            s, t = bn
        wt = jnp.transpose(w * s, (0, 1, 3, 2)).reshape(9, cout, cin)
        bf = (b * s + t).reshape(cout, 1)
        if split is None:
            return [wt, bf]
        return [wt[:, :, :split], wt[:, :, split:], bf]

    f2, f3 = full_features[2], full_features[3]
    args = []
    args += fold(params["up1_c1"], split=f3)                 # w1a_up, w1a_skip, b1a
    args += fold(params["up1_c2"], bn=params["up1_bn"])      # w1b, b1b
    args += fold(params["up2_c1"], split=f2)                 # w2a_up, w2a_skip, b2a
    args += fold(params["up2_c2"], bn=params["up2_bn"])      # w2b, b2b
    args += fold(params["fin_c1"], bn=params["fin_bn1"])     # w3a, b3a
    args += fold(params["fin_c2"])                           # w3b, b3b
    return args


@jax.jit
def decoder_pallas_forward(xs, kargs, m1p, m2p, mask_a, mask_b):
    """xs: list of 4 NCHW feature maps (x[0] unused). Returns NCHW output."""
    x1, x2, x3 = xs[1], xs[2], xs[3]
    n, c1, hb, wb = x1.shape
    _, c2, ha, wa = x2.shape
    _, c3, h3, w3 = x3.shape
    pa = (ha + 2) * (wa + 2)
    pb = (hb + 2) * (wb + 2)
    out_ch = kargs[-1].shape[0]

    # NCHW -> channel-major flat tiles.  Skips get the conv zero border here
    # (two tiny pads); no transposes anywhere in the wrapper.
    x3f = x3.reshape(n, c3, h3 * w3)
    x2p = jnp.pad(x2, ((0, 0), (0, 0), (1, 1), (1, 1))).reshape(n, c2, pa)
    x1p = jnp.pad(x1, ((0, 0), (0, 0), (1, 1), (1, 1))).reshape(n, c1, pb)

    kernel = functools.partial(_decoder_kernel, wpa=wa + 2, wpb=wb + 2)

    def batch_spec(shape):
        nd = len(shape)
        return pl.BlockSpec((1,) + tuple(shape[1:]),
                            lambda i, _nd=nd: (i,) + (0,) * (_nd - 1))

    def const_spec(a):
        zero = (0,) * a.ndim
        return pl.BlockSpec(a.shape, lambda i, _z=zero: _z)

    in_specs = ([batch_spec(x3f.shape), batch_spec(x2p.shape), batch_spec(x1p.shape)]
                + [const_spec(a) for a in (m1p, m2p, mask_a, mask_b)]
                + [const_spec(a) for a in kargs])

    out_pf = pl.pallas_call(
        kernel,
        out_shape=jax.ShapeDtypeStruct((n, out_ch, pb), jnp.float32),
        grid=(n,),
        in_specs=in_specs,
        out_specs=pl.BlockSpec((1, out_ch, pb), lambda i: (i, 0, 0)),
        compiler_params=pltpu.CompilerParams(
            dimension_semantics=("parallel",)),
    )(x3f, x2p, x1p, m1p, m2p, mask_a, mask_b, *kargs)

    # padded-flat -> NCHW: drop the 1-pixel border (already channel-major).
    out = out_pf.reshape(n, out_ch, hb + 2, wb + 2)[:, :, 1:hb + 1, 1:wb + 1]
    return out


# --------------------------- pure-JAX reference ------------------------------


def _upsample2x_axis_ref(x, axis):
    # bilinear 2x, half-pixel centers, edge-clamped (align_corners=False)
    n = x.shape[axis]
    first = lax.slice_in_dim(x, 0, 1, axis=axis)
    last = lax.slice_in_dim(x, n - 1, n, axis=axis)
    prev = jnp.concatenate([first, lax.slice_in_dim(x, 0, n - 1, axis=axis)],
                           axis=axis)
    nxt = jnp.concatenate([lax.slice_in_dim(x, 1, n, axis=axis), last],
                          axis=axis)
    even = 0.25 * prev + 0.75 * x
    odd = 0.75 * x + 0.25 * nxt
    out = jnp.stack([even, odd], axis=axis + 1)
    new_shape = list(x.shape)
    new_shape[axis] = 2 * n
    return out.reshape(new_shape)


def _conv3x3_ref(x, w, b):
    y = lax.conv_general_dilated(
        x, w, window_strides=(1, 1), padding="SAME",
        dimension_numbers=("NHWC", "HWIO", "NHWC"))
    return y + b


def decoder_reference(xs_nchw, params):
    xs = [jnp.transpose(v, (0, 2, 3, 1)) for v in xs_nchw]  # NCHW -> NHWC

    def upblock(x_in, x_skip, c1, c2, bn):
        u = _upsample2x_axis_ref(_upsample2x_axis_ref(x_in, 1), 2)
        # torch.cat((x, x_up), 1) with x = Upsample(x_in), x_up = skip
        cat = jnp.concatenate([u, x_skip], axis=-1)
        h = _conv3x3_ref(cat, *c1)
        y = _conv3x3_ref(h, *c2)
        s, t = bn
        y = y * s + t
        return jnp.where(y >= 0, y, 0.01 * y)        # F.leaky_relu

    z = upblock(xs[3], xs[2], params["up1_c1"], params["up1_c2"],
                params["up1_bn"])
    z = upblock(z, xs[1], params["up2_c1"], params["up2_c2"],
                params["up2_bn"])
    s, t = params["fin_bn1"]
    h = jnp.maximum(_conv3x3_ref(z, *params["fin_c1"]) * s + t, 0.0)
    y = jnp.tanh(_conv3x3_ref(h, *params["fin_c2"]))
    return jnp.transpose(y, (0, 3, 1, 2))            # NHWC -> NCHW


# ----------------------------------- main -------------------------------------

if __name__ == "__main__":
    key = jax.random.PRNGKey(0)
    full_features = [8, 8, 16, 32]
    out_ch = 4
    N = 2

    k_in, k_par = jax.random.split(key)
    kis = jax.random.split(k_in, 4)
    # Encoder pyramid (NCHW, like the PyTorch module input list):
    #   x[1]: 16x16, x[2]: 8x8, x[3]: 4x4. x[0] is unused by SmallDecoder.
    xs = [
        jax.random.normal(kis[0], (N, full_features[0], 32, 32), jnp.float32),
        jax.random.normal(kis[1], (N, full_features[1], 16, 16), jnp.float32),
        jax.random.normal(kis[2], (N, full_features[2], 8, 8), jnp.float32),
        jax.random.normal(kis[3], (N, full_features[3], 4, 4), jnp.float32),
    ]
    params = init_params(k_par, full_features, out_ch)
    kargs = prepare_kernel_params(params, full_features)
    m1p = upsample2x_operator(4, 4, padded_input=False)   # (16, 100):  4x4 -> padded 8x8
    m2p = upsample2x_operator(8, 8, padded_input=True)    # (100, 324): padded 8x8 -> padded 16x16
    mask_a = interior_mask(8, 8)                           # (1, 100)
    mask_b = interior_mask(16, 16)                         # (1, 324)

    out = jax.block_until_ready(
        decoder_pallas_forward(xs, kargs, m1p, m2p, mask_a, mask_b))
    ref = jax.block_until_ready(decoder_reference(xs, params))

    assert out.shape == (N, out_ch, 16, 16), out.shape
    err = float(jnp.max(jnp.abs(out - ref)))
    assert jnp.allclose(out, ref, atol=2e-4, rtol=2e-4), err
    print("KERNEL_OK")
</pallas_src>

<mosaic_0001>
module attributes {stable_mosaic.version = 11 : i64} {
  func.func @_decoder_kernel(%arg0: i32, %arg1: memref<1x32x16xf32, #tpu.memory_space<vmem>>, %arg2: memref<1x16x100xf32, #tpu.memory_space<vmem>>, %arg3: memref<1x8x324xf32, #tpu.memory_space<vmem>>, %arg4: memref<16x100xf32, #tpu.memory_space<vmem>>, %arg5: memref<100x324xf32, #tpu.memory_space<vmem>>, %arg6: memref<1x100xf32, #tpu.memory_space<vmem>>, %arg7: memref<1x324xf32, #tpu.memory_space<vmem>>, %arg8: memref<9x16x32xf32, #tpu.memory_space<vmem>>, %arg9: memref<9x16x16xf32, #tpu.memory_space<vmem>>, %arg10: memref<16x1xf32, #tpu.memory_space<vmem>>, %arg11: memref<9x16x16xf32, #tpu.memory_space<vmem>>, %arg12: memref<16x1xf32, #tpu.memory_space<vmem>>, %arg13: memref<9x8x16xf32, #tpu.memory_space<vmem>>, %arg14: memref<9x8x8xf32, #tpu.memory_space<vmem>>, %arg15: memref<8x1xf32, #tpu.memory_space<vmem>>, %arg16: memref<9x8x8xf32, #tpu.memory_space<vmem>>, %arg17: memref<8x1xf32, #tpu.memory_space<vmem>>, %arg18: memref<9x4x8xf32, #tpu.memory_space<vmem>>, %arg19: memref<4x1xf32, #tpu.memory_space<vmem>>, %arg20: memref<9x4x4xf32, #tpu.memory_space<vmem>>, %arg21: memref<4x1xf32, #tpu.memory_space<vmem>>, %arg22: memref<1x4x324xf32, #tpu.memory_space<vmem>>) attributes {dimension_semantics = [#tpu.dimension_semantics<parallel>], iteration_bounds = array<i64: 2>, scalar_prefetch = 0 : i64, scratch_operands = 0 : i64, tpu.core_type = #tpu.core_type<tc>, window_params = [{transform_indices = @transform_0, window_bounds = array<i64: 1, 32, 16>}, {transform_indices = @transform_1, window_bounds = array<i64: 1, 16, 100>}, {transform_indices = @transform_2, window_bounds = array<i64: 1, 8, 324>}, {pipeline_mode = #tpu.pipeline_mode<synchronous>, transform_indices = @transform_3, window_bounds = array<i64: 16, 100>}, {pipeline_mode = #tpu.pipeline_mode<synchronous>, transform_indices = @transform_4, window_bounds = array<i64: 100, 324>}, {pipeline_mode = #tpu.pipeline_mode<synchronous>, transform_indices = @transform_5, window_bounds = array<i64: 1, 100>}, {pipeline_mode = #tpu.pipeline_mode<synchronous>, transform_indices = @transform_6, window_bounds = array<i64: 1, 324>}, {pipeline_mode = #tpu.pipeline_mode<synchronous>, transform_indices = @transform_7, window_bounds = array<i64: 9, 16, 32>}, {pipeline_mode = #tpu.pipeline_mode<synchronous>, transform_indices = @transform_8, window_bounds = array<i64: 9, 16, 16>}, {pipeline_mode = #tpu.pipeline_mode<synchronous>, transform_indices = @transform_9, window_bounds = array<i64: 16, 1>}, {pipeline_mode = #tpu.pipeline_mode<synchronous>, transform_indices = @transform_10, window_bounds = array<i64: 9, 16, 16>}, {pipeline_mode = #tpu.pipeline_mode<synchronous>, transform_indices = @transform_11, window_bounds = array<i64: 16, 1>}, {pipeline_mode = #tpu.pipeline_mode<synchronous>, transform_indices = @transform_12, window_bounds = array<i64: 9, 8, 16>}, {pipeline_mode = #tpu.pipeline_mode<synchronous>, transform_indices = @transform_13, window_bounds = array<i64: 9, 8, 8>}, {pipeline_mode = #tpu.pipeline_mode<synchronous>, transform_indices = @transform_14, window_bounds = array<i64: 8, 1>}, {pipeline_mode = #tpu.pipeline_mode<synchronous>, transform_indices = @transform_15, window_bounds = array<i64: 9, 8, 8>}, {pipeline_mode = #tpu.pipeline_mode<synchronous>, transform_indices = @transform_16, window_bounds = array<i64: 8, 1>}, {pipeline_mode = #tpu.pipeline_mode<synchronous>, transform_indices = @transform_17, window_bounds = array<i64: 9, 4, 8>}, {pipeline_mode = #tpu.pipeline_mode<synchronous>, transform_indices = @transform_18, window_bounds = array<i64: 4, 1>}, {pipeline_mode = #tpu.pipeline_mode<synchronous>, transform_indices = @transform_19, window_bounds = array<i64: 9, 4, 4>}, {pipeline_mode = #tpu.pipeline_mode<synchronous>, transform_indices = @transform_20, window_bounds = array<i64: 4, 1>}, {transform_indices = @transform_21, window_bounds = array<i64: 1, 4, 324>}]} {
    %c0 = arith.constant 0 : index
    %c0_0 = arith.constant 0 : index
    %c0_1 = arith.constant 0 : index
    %0 = vector.load %arg1[%c0, %c0_0, %c0_1] : memref<1x32x16xf32, #tpu.memory_space<vmem>>, vector<1x32x16xf32>
    %1 = vector.shape_cast %0 : vector<1x32x16xf32> to vector<32x16xf32>
    %c0_2 = arith.constant 0 : index
    %c0_3 = arith.constant 0 : index
    %c0_4 = arith.constant 0 : index
    %2 = vector.load %arg2[%c0_2, %c0_3, %c0_4] : memref<1x16x100xf32, #tpu.memory_space<vmem>>, vector<1x16x100xf32>
    %3 = vector.shape_cast %2 : vector<1x16x100xf32> to vector<16x100xf32>
    %c0_5 = arith.constant 0 : index
    %c0_6 = arith.constant 0 : index
    %c0_7 = arith.constant 0 : index
    %4 = vector.load %arg3[%c0_5, %c0_6, %c0_7] : memref<1x8x324xf32, #tpu.memory_space<vmem>>, vector<1x8x324xf32>
    %5 = vector.shape_cast %4 : vector<1x8x324xf32> to vector<8x324xf32>
    %c0_8 = arith.constant 0 : index
    %c0_9 = arith.constant 0 : index
    %6 = vector.load %arg6[%c0_8, %c0_9] : memref<1x100xf32, #tpu.memory_space<vmem>>, vector<1x100xf32>
    %c0_10 = arith.constant 0 : index
    %c0_11 = arith.constant 0 : index
    %7 = vector.load %arg7[%c0_10, %c0_11] : memref<1x324xf32, #tpu.memory_space<vmem>>, vector<1x324xf32>
    %c0_12 = arith.constant 0 : index
    %c0_13 = arith.constant 0 : index
    %8 = vector.load %arg4[%c0_12, %c0_13] : memref<16x100xf32, #tpu.memory_space<vmem>>, vector<16x100xf32>
    %cst = arith.constant dense<0.000000e+00> : vector<32x100xf32>
    %9 = tpu.matmul %1, %8, %cst {dimension_numbers = #tpu.dot_dimension_numbers<[1], [0], [0], [1], [0, 0, 1, 1], [], []>} : vector<32x16xf32>, vector<16x100xf32>, vector<32x100xf32> -> vector<32x100xf32>
    %c0_14 = arith.constant 0 : index
    %c0_15 = arith.constant 0 : index
    %c0_16 = arith.constant 0 : index
    %10 = vector.load %arg8[%c0_14, %c0_15, %c0_16] : memref<9x16x32xf32, #tpu.memory_space<vmem>>, vector<1x16x32xf32>
    %11 = vector.shape_cast %10 : vector<1x16x32xf32> to vector<16x32xf32>
    %12 = vector.extract_strided_slice %9 {offsets = [0, 89], sizes = [32, 11], strides = [1, 1]} : vector<32x100xf32> to vector<32x11xf32>
    %13 = vector.extract_strided_slice %9 {offsets = [0, 0], sizes = [32, 89], strides = [1, 1]} : vector<32x100xf32> to vector<32x89xf32>
    %14 = tpu.concatenate %12, %13 in 1 : vector<32x11xf32>, vector<32x89xf32> -> vector<32x100xf32>
    %cst_17 = arith.constant dense<0.000000e+00> : vector<16x100xf32>
    %15 = tpu.matmul %11, %14, %cst_17 {dimension_numbers = #tpu.dot_dimension_numbers<[1], [0], [0], [1], [0, 0, 1, 1], [], []>} : vector<16x32xf32>, vector<32x100xf32>, vector<16x100xf32> -> vector<16x100xf32>
    %c0_18 = arith.constant 0 : index
    %c0_19 = arith.constant 0 : index
    %c0_20 = arith.constant 0 : index
    %16 = vector.load %arg9[%c0_18, %c0_19, %c0_20] : memref<9x16x16xf32, #tpu.memory_space<vmem>>, vector<1x16x16xf32>
    %17 = vector.shape_cast %16 : vector<1x16x16xf32> to vector<16x16xf32>
    %18 = vector.extract_strided_slice %3 {offsets = [0, 89], sizes = [16, 11], strides = [1, 1]} : vector<16x100xf32> to vector<16x11xf32>
    %19 = vector.extract_strided_slice %3 {offsets = [0, 0], sizes = [16, 89], strides = [1, 1]} : vector<16x100xf32> to vector<16x89xf32>
    %20 = tpu.concatenate %18, %19 in 1 : vector<16x11xf32>, vector<16x89xf32> -> vector<16x100xf32>
    %cst_21 = arith.constant dense<0.000000e+00> : vector<16x100xf32>
    %21 = tpu.matmul %17, %20, %cst_21 {dimension_numbers = #tpu.dot_dimension_numbers<[1], [0], [0], [1], [0, 0, 1, 1], [], []>} : vector<16x16xf32>, vector<16x100xf32>, vector<16x100xf32> -> vector<16x100xf32>
    %22 = arith.addf %15, %21 : vector<16x100xf32>
    %c1 = arith.constant 1 : index
    %c0_22 = arith.constant 0 : index
    %c0_23 = arith.constant 0 : index
    %23 = vector.load %arg8[%c1, %c0_22, %c0_23] : memref<9x16x32xf32, #tpu.memory_space<vmem>>, vector<1x16x32xf32>
    %24 = vector.shape_cast %23 : vector<1x16x32xf32> to vector<16x32xf32>
    %25 = vector.extract_strided_slice %9 {offsets = [0, 90], sizes = [32, 10], strides = [1, 1]} : vector<32x100xf32> to vector<32x10xf32>
    %26 = vector.extract_strided_slice %9 {offsets = [0, 0], sizes = [32, 90], strides = [1, 1]} : vector<32x100xf32> to vector<32x90xf32>
    %27 = tpu.concatenate %25, %26 in 1 : vector<32x10xf32>, vector<32x90xf32> -> vector<32x100xf32>
    %cst_24 = arith.constant dense<0.000000e+00> : vector<16x100xf32>
    %28 = tpu.matmul %24, %27, %cst_24 {dimension_numbers = #tpu.dot_dimension_numbers<[1], [0], [0], [1], [0, 0, 1, 1], [], []>} : vector<16x32xf32>, vector<32x100xf32>, vector<16x100xf32> -> vector<16x100xf32>
    %29 = arith.addf %22, %28 : vector<16x100xf32>
    %c1_25 = arith.constant 1 : index
    %c0_26 = arith.constant 0 : index
    %c0_27 = arith.constant 0 : index
    %30 = vector.load %arg9[%c1_25, %c0_26, %c0_27] : memref<9x16x16xf32, #tpu.memory_space<vmem>>, vector<1x16x16xf32>
    %31 = vector.shape_cast %30 : vector<1x16x16xf32> to vector<16x16xf32>
    %32 = vector.extract_strided_slice %3 {offsets = [0, 90], sizes = [16, 10], strides = [1, 1]} : vector<16x100xf32> to vector<16x10xf32>
    %33 = vector.extract_strided_slice %3 {offsets = [0, 0], sizes = [16, 90], strides = [1, 1]} : vector<16x100xf32> to vector<16x90xf32>
    %34 = tpu.concatenate %32, %33 in 1 : vector<16x10xf32>, vector<16x90xf32> -> vector<16x100xf32>
    %cst_28 = arith.constant dense<0.000000e+00> : vector<16x100xf32>
    %35 = tpu.matmul %31, %34, %cst_28 {dimension_numbers = #tpu.dot_dimension_numbers<[1], [0], [0], [1], [0, 0, 1, 1], [], []>} : vector<16x16xf32>, vector<16x100xf32>, vector<16x100xf32> -> vector<16x100xf32>
    %36 = arith.addf %29, %35 : vector<16x100xf32>
    %c2 = arith.constant 2 : index
    %c0_29 = arith.constant 0 : index
    %c0_30 = arith.constant 0 : index
    %37 = vector.load %arg8[%c2, %c0_29, %c0_30] : memref<9x16x32xf32, #tpu.memory_space<vmem>>, vector<1x16x32xf32>
    %38 = vector.shape_cast %37 : vector<1x16x32xf32> to vector<16x32xf32>
    %39 = vector.extract_strided_slice %9 {offsets = [0, 91], sizes = [32, 9], strides = [1, 1]} : vector<32x100xf32> to vector<32x9xf32>
    %40 = vector.extract_strided_slice %9 {offsets = [0, 0], sizes = [32, 91], strides = [1, 1]} : vector<32x100xf32> to vector<32x91xf32>
    %41 = tpu.concatenate %39, %40 in 1 : vector<32x9xf32>, vector<32x91xf32> -> vector<32x100xf32>
    %cst_31 = arith.constant dense<0.000000e+00> : vector<16x100xf32>
    %42 = tpu.matmul %38, %41, %cst_31 {dimension_numbers = #tpu.dot_dimension_numbers<[1], [0], [0], [1], [0, 0, 1, 1], [], []>} : vector<16x32xf32>, vector<32x100xf32>, vector<16x100xf32> -> vector<16x100xf32>
    %43 = arith.addf %36, %42 : vector<16x100xf32>
    %c2_32 = arith.constant 2 : index
    %c0_33 = arith.constant 0 : index
    %c0_34 = arith.constant 0 : index
    %44 = vector.load %arg9[%c2_32, %c0_33, %c0_34] : memref<9x16x16xf32, #tpu.memory_space<vmem>>, vector<1x16x16xf32>
    %45 = vector.shape_cast %44 : vector<1x16x16xf32> to vector<16x16xf32>
    %46 = vector.extract_strided_slice %3 {offsets = [0, 91], sizes = [16, 9], strides = [1, 1]} : vector<16x100xf32> to vector<16x9xf32>
    %47 = vector.extract_strided_slice %3 {offsets = [0, 0], sizes = [16, 91], strides = [1, 1]} : vector<16x100xf32> to vector<16x91xf32>
    %48 = tpu.concatenate %46, %47 in 1 : vector<16x9xf32>, vector<16x91xf32> -> vector<16x100xf32>
    %cst_35 = arith.constant dense<0.000000e+00> : vector<16x100xf32>
    %49 = tpu.matmul %45, %48, %cst_35 {dimension_numbers = #tpu.dot_dimension_numbers<[1], [0], [0], [1], [0, 0, 1, 1], [], []>} : vector<16x16xf32>, vector<16x100xf32>, vector<16x100xf32> -> vector<16x100xf32>
    %50 = arith.addf %43, %49 : vector<16x100xf32>
    %c3 = arith.constant 3 : index
    %c0_36 = arith.constant 0 : index
    %c0_37 = arith.constant 0 : index
    %51 = vector.load %arg8[%c3, %c0_36, %c0_37] : memref<9x16x32xf32, #tpu.memory_space<vmem>>, vector<1x16x32xf32>
    %52 = vector.shape_cast %51 : vector<1x16x32xf32> to vector<16x32xf32>
    %53 = vector.extract_strided_slice %9 {offsets = [0, 99], sizes = [32, 1], strides = [1, 1]} : vector<32x100xf32> to vector<32x1xf32>
    %54 = vector.extract_strided_slice %9 {offsets = [0, 0], sizes = [32, 99], strides = [1, 1]} : vector<32x100xf32> to vector<32x99xf32>
    %55 = tpu.concatenate %53, %54 in 1 : vector<32x1xf32>, vector<32x99xf32> -> vector<32x100xf32>
    %cst_38 = arith.constant dense<0.000000e+00> : vector<16x100xf32>
    %56 = tpu.matmul %52, %55, %cst_38 {dimension_numbers = #tpu.dot_dimension_numbers<[1], [0], [0], [1], [0, 0, 1, 1], [], []>} : vector<16x32xf32>, vector<32x100xf32>, vector<16x100xf32> -> vector<16x100xf32>
    %57 = arith.addf %50, %56 : vector<16x100xf32>
    %c3_39 = arith.constant 3 : index
    %c0_40 = arith.constant 0 : index
    %c0_41 = arith.constant 0 : index
    %58 = vector.load %arg9[%c3_39, %c0_40, %c0_41] : memref<9x16x16xf32, #tpu.memory_space<vmem>>, vector<1x16x16xf32>
    %59 = vector.shape_cast %58 : vector<1x16x16xf32> to vector<16x16xf32>
    %60 = vector.extract_strided_slice %3 {offsets = [0, 99], sizes = [16, 1], strides = [1, 1]} : vector<16x100xf32> to vector<16x1xf32>
    %61 = vector.extract_strided_slice %3 {offsets = [0, 0], sizes = [16, 99], strides = [1, 1]} : vector<16x100xf32> to vector<16x99xf32>
    %62 = tpu.concatenate %60, %61 in 1 : vector<16x1xf32>, vector<16x99xf32> -> vector<16x100xf32>
    %cst_42 = arith.constant dense<0.000000e+00> : vector<16x100xf32>
    %63 = tpu.matmul %59, %62, %cst_42 {dimension_numbers = #tpu.dot_dimension_numbers<[1], [0], [0], [1], [0, 0, 1, 1], [], []>} : vector<16x16xf32>, vector<16x100xf32>, vector<16x100xf32> -> vector<16x100xf32>
    %64 = arith.addf %57, %63 : vector<16x100xf32>
    %c4 = arith.constant 4 : index
    %c0_43 = arith.constant 0 : index
    %c0_44 = arith.constant 0 : index
    %65 = vector.load %arg8[%c4, %c0_43, %c0_44] : memref<9x16x32xf32, #tpu.memory_space<vmem>>, vector<1x16x32xf32>
    %66 = vector.shape_cast %65 : vector<1x16x32xf32> to vector<16x32xf32>
    %cst_45 = arith.constant dense<0.000000e+00> : vector<16x100xf32>
    %67 = tpu.matmul %66, %9, %cst_45 {dimension_numbers = #tpu.dot_dimension_numbers<[1], [0], [0], [1], [0, 0, 1, 1], [], []>} : vector<16x32xf32>, vector<32x100xf32>, vector<16x100xf32> -> vector<16x100xf32>
    %68 = arith.addf %64, %67 : vector<16x100xf32>
    %c4_46 = arith.constant 4 : index
    %c0_47 = arith.constant 0 : index
    %c0_48 = arith.constant 0 : index
    %69 = vector.load %arg9[%c4_46, %c0_47, %c0_48] : memref<9x16x16xf32, #tpu.memory_space<vmem>>, vector<1x16x16xf32>
    %70 = vector.shape_cast %69 : vector<1x16x16xf32> to vector<16x16xf32>
    %cst_49 = arith.constant dense<0.000000e+00> : vector<16x100xf32>
    %71 = tpu.matmul %70, %3, %cst_49 {dimension_numbers = #tpu.dot_dimension_numbers<[1], [0], [0], [1], [0, 0, 1, 1], [], []>} : vector<16x16xf32>, vector<16x100xf32>, vector<16x100xf32> -> vector<16x100xf32>
    %72 = arith.addf %68, %71 : vector<16x100xf32>
    %c5 = arith.constant 5 : index
    %c0_50 = arith.constant 0 : index
    %c0_51 = arith.constant 0 : index
    %73 = vector.load %arg8[%c5, %c0_50, %c0_51] : memref<9x16x32xf32, #tpu.memory_space<vmem>>, vector<1x16x32xf32>
    %74 = vector.shape_cast %73 : vector<1x16x32xf32> to vector<16x32xf32>
    %75 = vector.extract_strided_slice %9 {offsets = [0, 1], sizes = [32, 99], strides = [1, 1]} : vector<32x100xf32> to vector<32x99xf32>
    %76 = vector.extract_strided_slice %9 {offsets = [0, 0], sizes = [32, 1], strides = [1, 1]} : vector<32x100xf32> to vector<32x1xf32>
    %77 = tpu.concatenate %75, %76 in 1 : vector<32x99xf32>, vector<32x1xf32> -> vector<32x100xf32>
    %cst_52 = arith.constant dense<0.000000e+00> : vector<16x100xf32>
    %78 = tpu.matmul %74, %77, %cst_52 {dimension_numbers = #tpu.dot_dimension_numbers<[1], [0], [0], [1], [0, 0, 1, 1], [], []>} : vector<16x32xf32>, vector<32x100xf32>, vector<16x100xf32> -> vector<16x100xf32>
    %79 = arith.addf %72, %78 : vector<16x100xf32>
    %c5_53 = arith.constant 5 : index
    %c0_54 = arith.constant 0 : index
    %c0_55 = arith.constant 0 : index
    %80 = vector.load %arg9[%c5_53, %c0_54, %c0_55] : memref<9x16x16xf32, #tpu.memory_space<vmem>>, vector<1x16x16xf32>
    %81 = vector.shape_cast %80 : vector<1x16x16xf32> to vector<16x16xf32>
    %82 = vector.extract_strided_slice %3 {offsets = [0, 1], sizes = [16, 99], strides = [1, 1]} : vector<16x100xf32> to vector<16x99xf32>
    %83 = vector.extract_strided_slice %3 {offsets = [0, 0], sizes = [16, 1], strides = [1, 1]} : vector<16x100xf32> to vector<16x1xf32>
    %84 = tpu.concatenate %82, %83 in 1 : vector<16x99xf32>, vector<16x1xf32> -> vector<16x100xf32>
    %cst_56 = arith.constant dense<0.000000e+00> : vector<16x100xf32>
    %85 = tpu.matmul %81, %84, %cst_56 {dimension_numbers = #tpu.dot_dimension_numbers<[1], [0], [0], [1], [0, 0, 1, 1], [], []>} : vector<16x16xf32>, vector<16x100xf32>, vector<16x100xf32> -> vector<16x100xf32>
    %86 = arith.addf %79, %85 : vector<16x100xf32>
    %c6 = arith.constant 6 : index
    %c0_57 = arith.constant 0 : index
    %c0_58 = arith.constant 0 : index
    %87 = vector.load %arg8[%c6, %c0_57, %c0_58] : memref<9x16x32xf32, #tpu.memory_space<vmem>>, vector<1x16x32xf32>
    %88 = vector.shape_cast %87 : vector<1x16x32xf32> to vector<16x32xf32>
    %89 = vector.extract_strided_slice %9 {offsets = [0, 9], sizes = [32, 91], strides = [1, 1]} : vector<32x100xf32> to vector<32x91xf32>
    %90 = vector.extract_strided_slice %9 {offsets = [0, 0], sizes = [32, 9], strides = [1, 1]} : vector<32x100xf32> to vector<32x9xf32>
    %91 = tpu.concatenate %89, %90 in 1 : vector<32x91xf32>, vector<32x9xf32> -> vector<32x100xf32>
    %cst_59 = arith.constant dense<0.000000e+00> : vector<16x100xf32>
    %92 = tpu.matmul %88, %91, %cst_59 {dimension_numbers = #tpu.dot_dimension_numbers<[1], [0], [0], [1], [0, 0, 1, 1], [], []>} : vector<16x32xf32>, vector<32x100xf32>, vector<16x100xf32> -> vector<16x100xf32>
    %93 = arith.addf %86, %92 : vector<16x100xf32>
    %c6_60 = arith.constant 6 : index
    %c0_61 = arith.constant 0 : index
    %c0_62 = arith.constant 0 : index
    %94 = vector.load %arg9[%c6_60, %c0_61, %c0_62] : memref<9x16x16xf32, #tpu.memory_space<vmem>>, vector<1x16x16xf32>
    %95 = vector.shape_cast %94 : vector<1x16x16xf32> to vector<16x16xf32>
    %96 = vector.extract_strided_slice %3 {offsets = [0, 9], sizes = [16, 91], strides = [1, 1]} : vector<16x100xf32> to vector<16x91xf32>
    %97 = vector.extract_strided_slice %3 {offsets = [0, 0], sizes = [16, 9], strides = [1, 1]} : vector<16x100xf32> to vector<16x9xf32>
    %98 = tpu.concatenate %96, %97 in 1 : vector<16x91xf32>, vector<16x9xf32> -> vector<16x100xf32>
    %cst_63 = arith.constant dense<0.000000e+00> : vector<16x100xf32>
    %99 = tpu.matmul %95, %98, %cst_63 {dimension_numbers = #tpu.dot_dimension_numbers<[1], [0], [0], [1], [0, 0, 1, 1], [], []>} : vector<16x16xf32>, vector<16x100xf32>, vector<16x100xf32> -> vector<16x100xf32>
    %100 = arith.addf %93, %99 : vector<16x100xf32>
    %c7 = arith.constant 7 : index
    %c0_64 = arith.constant 0 : index
    %c0_65 = arith.constant 0 : index
    %101 = vector.load %arg8[%c7, %c0_64, %c0_65] : memref<9x16x32xf32, #tpu.memory_space<vmem>>, vector<1x16x32xf32>
    %102 = vector.shape_cast %101 : vector<1x16x32xf32> to vector<16x32xf32>
    %103 = vector.extract_strided_slice %9 {offsets = [0, 10], sizes = [32, 90], strides = [1, 1]} : vector<32x100xf32> to vector<32x90xf32>
    %104 = vector.extract_strided_slice %9 {offsets = [0, 0], sizes = [32, 10], strides = [1, 1]} : vector<32x100xf32> to vector<32x10xf32>
    %105 = tpu.concatenate %103, %104 in 1 : vector<32x90xf32>, vector<32x10xf32> -> vector<32x100xf32>
    %cst_66 = arith.constant dense<0.000000e+00> : vector<16x100xf32>
    %106 = tpu.matmul %102, %105, %cst_66 {dimension_numbers = #tpu.dot_dimension_numbers<[1], [0], [0], [1], [0, 0, 1, 1], [], []>} : vector<16x32xf32>, vector<32x100xf32>, vector<16x100xf32> -> vector<16x100xf32>
    %107 = arith.addf %100, %106 : vector<16x100xf32>
    %c7_67 = arith.constant 7 : index
    %c0_68 = arith.constant 0 : index
    %c0_69 = arith.constant 0 : index
    %108 = vector.load %arg9[%c7_67, %c0_68, %c0_69] : memref<9x16x16xf32, #tpu.memory_space<vmem>>, vector<1x16x16xf32>
    %109 = vector.shape_cast %108 : vector<1x16x16xf32> to vector<16x16xf32>
    %110 = vector.extract_strided_slice %3 {offsets = [0, 10], sizes = [16, 90], strides = [1, 1]} : vector<16x100xf32> to vector<16x90xf32>
    %111 = vector.extract_strided_slice %3 {offsets = [0, 0], sizes = [16, 10], strides = [1, 1]} : vector<16x100xf32> to vector<16x10xf32>
    %112 = tpu.concatenate %110, %111 in 1 : vector<16x90xf32>, vector<16x10xf32> -> vector<16x100xf32>
    %cst_70 = arith.constant dense<0.000000e+00> : vector<16x100xf32>
    %113 = tpu.matmul %109, %112, %cst_70 {dimension_numbers = #tpu.dot_dimension_numbers<[1], [0], [0], [1], [0, 0, 1, 1], [], []>} : vector<16x16xf32>, vector<16x100xf32>, vector<16x100xf32> -> vector<16x100xf32>
    %114 = arith.addf %107, %113 : vector<16x100xf32>
    %c8 = arith.constant 8 : index
    %c0_71 = arith.constant 0 : index
    %c0_72 = arith.constant 0 : index
    %115 = vector.load %arg8[%c8, %c0_71, %c0_72] : memref<9x16x32xf32, #tpu.memory_space<vmem>>, vector<1x16x32xf32>
    %116 = vector.shape_cast %115 : vector<1x16x32xf32> to vector<16x32xf32>
    %117 = vector.extract_strided_slice %9 {offsets = [0, 11], sizes = [32, 89], strides = [1, 1]} : vector<32x100xf32> to vector<32x89xf32>
    %118 = vector.extract_strided_slice %9 {offsets = [0, 0], sizes = [32, 11], strides = [1, 1]} : vector<32x100xf32> to vector<32x11xf32>
    %119 = tpu.concatenate %117, %118 in 1 : vector<32x89xf32>, vector<32x11xf32> -> vector<32x100xf32>
    %cst_73 = arith.constant dense<0.000000e+00> : vector<16x100xf32>
    %120 = tpu.matmul %116, %119, %cst_73 {dimension_numbers = #tpu.dot_dimension_numbers<[1], [0], [0], [1], [0, 0, 1, 1], [], []>} : vector<16x32xf32>, vector<32x100xf32>, vector<16x100xf32> -> vector<16x100xf32>
    %121 = arith.addf %114, %120 : vector<16x100xf32>
    %c8_74 = arith.constant 8 : index
    %c0_75 = arith.constant 0 : index
    %c0_76 = arith.constant 0 : index
    %122 = vector.load %arg9[%c8_74, %c0_75, %c0_76] : memref<9x16x16xf32, #tpu.memory_space<vmem>>, vector<1x16x16xf32>
    %123 = vector.shape_cast %122 : vector<1x16x16xf32> to vector<16x16xf32>
    %124 = vector.extract_strided_slice %3 {offsets = [0, 11], sizes = [16, 89], strides = [1, 1]} : vector<16x100xf32> to vector<16x89xf32>
    %125 = vector.extract_strided_slice %3 {offsets = [0, 0], sizes = [16, 11], strides = [1, 1]} : vector<16x100xf32> to vector<16x11xf32>
    %126 = tpu.concatenate %124, %125 in 1 : vector<16x89xf32>, vector<16x11xf32> -> vector<16x100xf32>
    %cst_77 = arith.constant dense<0.000000e+00> : vector<16x100xf32>
    %127 = tpu.matmul %123, %126, %cst_77 {dimension_numbers = #tpu.dot_dimension_numbers<[1], [0], [0], [1], [0, 0, 1, 1], [], []>} : vector<16x16xf32>, vector<16x100xf32>, vector<16x100xf32> -> vector<16x100xf32>
    %128 = arith.addf %121, %127 : vector<16x100xf32>
    %c0_78 = arith.constant 0 : index
    %c0_79 = arith.constant 0 : index
    %129 = vector.load %arg10[%c0_78, %c0_79] : memref<16x1xf32, #tpu.memory_space<vmem>>, vector<16x1xf32>
    %130 = vector.broadcast %129 : vector<16x1xf32> to vector<16x100xf32>
    %131 = arith.addf %128, %130 : vector<16x100xf32>
    %132 = vector.broadcast %6 : vector<1x100xf32> to vector<16x100xf32>
    %133 = arith.mulf %131, %132 : vector<16x100xf32>
    %c0_80 = arith.constant 0 : index
    %c0_81 = arith.constant 0 : index
    %c0_82 = arith.constant 0 : index
    %134 = vector.load %arg11[%c0_80, %c0_81, %c0_82] : memref<9x16x16xf32, #tpu.memory_space<vmem>>, vector<1x16x16xf32>
    %135 = vector.shape_cast %134 : vector<1x16x16xf32> to vector<16x16xf32>
    %136 = vector.extract_strided_slice %133 {offsets = [0, 89], sizes = [16, 11], strides = [1, 1]} : vector<16x100xf32> to vector<16x11xf32>
    %137 = vector.extract_strided_slice %133 {offsets = [0, 0], sizes = [16, 89], strides = [1, 1]} : vector<16x100xf32> to vector<16x89xf32>
    %138 = tpu.concatenate %136, %137 in 1 : vector<16x11xf32>, vector<16x89xf32> -> vector<16x100xf32>
    %cst_83 = arith.constant dense<0.000000e+00> : vector<16x100xf32>
    %139 = tpu.matmul %135, %138, %cst_83 {dimension_numbers = #tpu.dot_dimension_numbers<[1], [0], [0], [1], [0, 0, 1, 1], [], []>} : vector<16x16xf32>, vector<16x100xf32>, vector<16x100xf32> -> vector<16x100xf32>
    %c1_84 = arith.constant 1 : index
    %c0_85 = arith.constant 0 : index
    %c0_86 = arith.constant 0 : index
    %140 = vector.load %arg11[%c1_84, %c0_85, %c0_86] : memref<9x16x16xf32, #tpu.memory_space<vmem>>, vector<1x16x16xf32>
    %141 = vector.shape_cast %140 : vector<1x16x16xf32> to vector<16x16xf32>
    %142 = vector.extract_strided_slice %133 {offsets = [0, 90], sizes = [16, 10], strides = [1, 1]} : vector<16x100xf32> to vector<16x10xf32>
    %143 = vector.extract_strided_slice %133 {offsets = [0, 0], sizes = [16, 90], strides = [1, 1]} : vector<16x100xf32> to vector<16x90xf32>
    %144 = tpu.concatenate %142, %143 in 1 : vector<16x10xf32>, vector<16x90xf32> -> vector<16x100xf32>
    %cst_87 = arith.constant dense<0.000000e+00> : vector<16x100xf32>
    %145 = tpu.matmul %141, %144, %cst_87 {dimension_numbers = #tpu.dot_dimension_numbers<[1], [0], [0], [1], [0, 0, 1, 1], [], []>} : vector<16x16xf32>, vector<16x100xf32>, vector<16x100xf32> -> vector<16x100xf32>
    %146 = arith.addf %139, %145 : vector<16x100xf32>
    %c2_88 = arith.constant 2 : index
    %c0_89 = arith.constant 0 : index
    %c0_90 = arith.constant 0 : index
    %147 = vector.load %arg11[%c2_88, %c0_89, %c0_90] : memref<9x16x16xf32, #tpu.memory_space<vmem>>, vector<1x16x16xf32>
    %148 = vector.shape_cast %147 : vector<1x16x16xf32> to vector<16x16xf32>
    %149 = vector.extract_strided_slice %133 {offsets = [0, 91], sizes = [16, 9], strides = [1, 1]} : vector<16x100xf32> to vector<16x9xf32>
    %150 = vector.extract_strided_slice %133 {offsets = [0, 0], sizes = [16, 91], strides = [1, 1]} : vector<16x100xf32> to vector<16x91xf32>
    %151 = tpu.concatenate %149, %150 in 1 : vector<16x9xf32>, vector<16x91xf32> -> vector<16x100xf32>
    %cst_91 = arith.constant dense<0.000000e+00> : vector<16x100xf32>
    %152 = tpu.matmul %148, %151, %cst_91 {dimension_numbers = #tpu.dot_dimension_numbers<[1], [0], [0], [1], [0, 0, 1, 1], [], []>} : vector<16x16xf32>, vector<16x100xf32>, vector<16x100xf32> -> vector<16x100xf32>
    %153 = arith.addf %146, %152 : vector<16x100xf32>
    %c3_92 = arith.constant 3 : index
    %c0_93 = arith.constant 0 : index
    %c0_94 = arith.constant 0 : index
    %154 = vector.load %arg11[%c3_92, %c0_93, %c0_94] : memref<9x16x16xf32, #tpu.memory_space<vmem>>, vector<1x16x16xf32>
    %155 = vector.shape_cast %154 : vector<1x16x16xf32> to vector<16x16xf32>
    %156 = vector.extract_strided_slice %133 {offsets = [0, 99], sizes = [16, 1], strides = [1, 1]} : vector<16x100xf32> to vector<16x1xf32>
    %157 = vector.extract_strided_slice %133 {offsets = [0, 0], sizes = [16, 99], strides = [1, 1]} : vector<16x100xf32> to vector<16x99xf32>
    %158 = tpu.concatenate %156, %157 in 1 : vector<16x1xf32>, vector<16x99xf32> -> vector<16x100xf32>
    %cst_95 = arith.constant dense<0.000000e+00> : vector<16x100xf32>
    %159 = tpu.matmul %155, %158, %cst_95 {dimension_numbers = #tpu.dot_dimension_numbers<[1], [0], [0], [1], [0, 0, 1, 1], [], []>} : vector<16x16xf32>, vector<16x100xf32>, vector<16x100xf32> -> vector<16x100xf32>
    %160 = arith.addf %153, %159 : vector<16x100xf32>
    %c4_96 = arith.constant 4 : index
    %c0_97 = arith.constant 0 : index
    %c0_98 = arith.constant 0 : index
    %161 = vector.load %arg11[%c4_96, %c0_97, %c0_98] : memref<9x16x16xf32, #tpu.memory_space<vmem>>, vector<1x16x16xf32>
    %162 = vector.shape_cast %161 : vector<1x16x16xf32> to vector<16x16xf32>
    %cst_99 = arith.constant dense<0.000000e+00> : vector<16x100xf32>
    %163 = tpu.matmul %162, %133, %cst_99 {dimension_numbers = #tpu.dot_dimension_numbers<[1], [0], [0], [1], [0, 0, 1, 1], [], []>} : vector<16x16xf32>, vector<16x100xf32>, vector<16x100xf32> -> vector<16x100xf32>
    %164 = arith.addf %160, %163 : vector<16x100xf32>
    %c5_100 = arith.constant 5 : index
    %c0_101 = arith.constant 0 : index
    %c0_102 = arith.constant 0 : index
    %165 = vector.load %arg11[%c5_100, %c0_101, %c0_102] : memref<9x16x16xf32, #tpu.memory_space<vmem>>, vector<1x16x16xf32>
    %166 = vector.shape_cast %165 : vector<1x16x16xf32> to vector<16x16xf32>
    %167 = vector.extract_strided_slice %133 {offsets = [0, 1], sizes = [16, 99], strides = [1, 1]} : vector<16x100xf32> to vector<16x99xf32>
    %168 = vector.extract_strided_slice %133 {offsets = [0, 0], sizes = [16, 1], strides = [1, 1]} : vector<16x100xf32> to vector<16x1xf32>
    %169 = tpu.concatenate %167, %168 in 1 : vector<16x99xf32>, vector<16x1xf32> -> vector<16x100xf32>
    %cst_103 = arith.constant dense<0.000000e+00> : vector<16x100xf32>
    %170 = tpu.matmul %166, %169, %cst_103 {dimension_numbers = #tpu.dot_dimension_numbers<[1], [0], [0], [1], [0, 0, 1, 1], [], []>} : vector<16x16xf32>, vector<16x100xf32>, vector<16x100xf32> -> vector<16x100xf32>
    %171 = arith.addf %164, %170 : vector<16x100xf32>
    %c6_104 = arith.constant 6 : index
    %c0_105 = arith.constant 0 : index
    %c0_106 = arith.constant 0 : index
    %172 = vector.load %arg11[%c6_104, %c0_105, %c0_106] : memref<9x16x16xf32, #tpu.memory_space<vmem>>, vector<1x16x16xf32>
    %173 = vector.shape_cast %172 : vector<1x16x16xf32> to vector<16x16xf32>
    %174 = vector.extract_strided_slice %133 {offsets = [0, 9], sizes = [16, 91], strides = [1, 1]} : vector<16x100xf32> to vector<16x91xf32>
    %175 = vector.extract_strided_slice %133 {offsets = [0, 0], sizes = [16, 9], strides = [1, 1]} : vector<16x100xf32> to vector<16x9xf32>
    %176 = tpu.concatenate %174, %175 in 1 : vector<16x91xf32>, vector<16x9xf32> -> vector<16x100xf32>
    %cst_107 = arith.constant dense<0.000000e+00> : vector<16x100xf32>
    %177 = tpu.matmul %173, %176, %cst_107 {dimension_numbers = #tpu.dot_dimension_numbers<[1], [0], [0], [1], [0, 0, 1, 1], [], []>} : vector<16x16xf32>, vector<16x100xf32>, vector<16x100xf32> -> vector<16x100xf32>
    %178 = arith.addf %171, %177 : vector<16x100xf32>
    %c7_108 = arith.constant 7 : index
    %c0_109 = arith.constant 0 : index
    %c0_110 = arith.constant 0 : index
    %179 = vector.load %arg11[%c7_108, %c0_109, %c0_110] : memref<9x16x16xf32, #tpu.memory_space<vmem>>, vector<1x16x16xf32>
    %180 = vector.shape_cast %179 : vector<1x16x16xf32> to vector<16x16xf32>
    %181 = vector.extract_strided_slice %133 {offsets = [0, 10], sizes = [16, 90], strides = [1, 1]} : vector<16x100xf32> to vector<16x90xf32>
    %182 = vector.extract_strided_slice %133 {offsets = [0, 0], sizes = [16, 10], strides = [1, 1]} : vector<16x100xf32> to vector<16x10xf32>
    %183 = tpu.concatenate %181, %182 in 1 : vector<16x90xf32>, vector<16x10xf32> -> vector<16x100xf32>
    %cst_111 = arith.constant dense<0.000000e+00> : vector<16x100xf32>
    %184 = tpu.matmul %180, %183, %cst_111 {dimension_numbers = #tpu.dot_dimension_numbers<[1], [0], [0], [1], [0, 0, 1, 1], [], []>} : vector<16x16xf32>, vector<16x100xf32>, vector<16x100xf32> -> vector<16x100xf32>
    %185 = arith.addf %178, %184 : vector<16x100xf32>
    %c8_112 = arith.constant 8 : index
    %c0_113 = arith.constant 0 : index
    %c0_114 = arith.constant 0 : index
    %186 = vector.load %arg11[%c8_112, %c0_113, %c0_114] : memref<9x16x16xf32, #tpu.memory_space<vmem>>, vector<1x16x16xf32>
    %187 = vector.shape_cast %186 : vector<1x16x16xf32> to vector<16x16xf32>
    %188 = vector.extract_strided_slice %133 {offsets = [0, 11], sizes = [16, 89], strides = [1, 1]} : vector<16x100xf32> to vector<16x89xf32>
    %189 = vector.extract_strided_slice %133 {offsets = [0, 0], sizes = [16, 11], strides = [1, 1]} : vector<16x100xf32> to vector<16x11xf32>
    %190 = tpu.concatenate %188, %189 in 1 : vector<16x89xf32>, vector<16x11xf32> -> vector<16x100xf32>
    %cst_115 = arith.constant dense<0.000000e+00> : vector<16x100xf32>
    %191 = tpu.matmul %187, %190, %cst_115 {dimension_numbers = #tpu.dot_dimension_numbers<[1], [0], [0], [1], [0, 0, 1, 1], [], []>} : vector<16x16xf32>, vector<16x100xf32>, vector<16x100xf32> -> vector<16x100xf32>
    %192 = arith.addf %185, %191 : vector<16x100xf32>
    %c0_116 = arith.constant 0 : index
    %c0_117 = arith.constant 0 : index
    %193 = vector.load %arg12[%c0_116, %c0_117] : memref<16x1xf32, #tpu.memory_space<vmem>>, vector<16x1xf32>
    %194 = vector.broadcast %193 : vector<16x1xf32> to vector<16x100xf32>
    %195 = arith.addf %192, %194 : vector<16x100xf32>
    %cst_118 = arith.constant 0.000000e+00 : f32
    %196 = vector.broadcast %cst_118 : f32 to vector<16x100xf32>
    %197 = arith.cmpf oge, %195, %196 : vector<16x100xf32>
    %cst_119 = arith.constant 0.00999999977 : f32
    %198 = vector.broadcast %cst_119 : f32 to vector<16x100xf32>
    %199 = arith.mulf %198, %195 : vector<16x100xf32>
    %200 = arith.select %197, %195, %199 : vector<16x100xi1>, vector<16x100xf32>
    %201 = vector.broadcast %6 : vector<1x100xf32> to vector<16x100xf32>
    %202 = arith.mulf %200, %201 : vector<16x100xf32>
    %c0_120 = arith.constant 0 : index
    %c0_121 = arith.constant 0 : index
    %203 = vector.load %arg5[%c0_120, %c0_121] : memref<100x324xf32, #tpu.memory_space<vmem>>, vector<100x324xf32>
    %cst_122 = arith.constant dense<0.000000e+00> : vector<16x324xf32>
    %204 = tpu.matmul %202, %203, %cst_122 {dimension_numbers = #tpu.dot_dimension_numbers<[1], [0], [0], [1], [0, 0, 1, 1], [], []>} : vector<16x100xf32>, vector<100x324xf32>, vector<16x324xf32> -> vector<16x324xf32>
    %c0_123 = arith.constant 0 : index
    %c0_124 = arith.constant 0 : index
    %c0_125 = arith.constant 0 : index
    %205 = vector.load %arg13[%c0_123, %c0_124, %c0_125] : memref<9x8x16xf32, #tpu.memory_space<vmem>>, vector<1x8x16xf32>
    %206 = vector.shape_cast %205 : vector<1x8x16xf32> to vector<8x16xf32>
    %207 = vector.extract_strided_slice %204 {offsets = [0, 305], sizes = [16, 19], strides = [1, 1]} : vector<16x324xf32> to vector<16x19xf32>
    %208 = vector.extract_strided_slice %204 {offsets = [0, 0], sizes = [16, 305], strides = [1, 1]} : vector<16x324xf32> to vector<16x305xf32>
    %209 = tpu.concatenate %207, %208 in 1 : vector<16x19xf32>, vector<16x305xf32> -> vector<16x324xf32>
    %cst_126 = arith.constant dense<0.000000e+00> : vector<8x324xf32>
    %210 = tpu.matmul %206, %209, %cst_126 {dimension_numbers = #tpu.dot_dimension_numbers<[1], [0], [0], [1], [0, 0, 1, 1], [], []>} : vector<8x16xf32>, vector<16x324xf32>, vector<8x324xf32> -> vector<8x324xf32>
    %c0_127 = arith.constant 0 : index
    %c0_128 = arith.constant 0 : index
    %c0_129 = arith.constant 0 : index
    %211 = vector.load %arg14[%c0_127, %c0_128, %c0_129] : memref<9x8x8xf32, #tpu.memory_space<vmem>>, vector<1x8x8xf32>
    %212 = vector.shape_cast %211 : vector<1x8x8xf32> to vector<8x8xf32>
    %213 = vector.extract_strided_slice %5 {offsets = [0, 305], sizes = [8, 19], strides = [1, 1]} : vector<8x324xf32> to vector<8x19xf32>
    %214 = vector.extract_strided_slice %5 {offsets = [0, 0], sizes = [8, 305], strides = [1, 1]} : vector<8x324xf32> to vector<8x305xf32>
    %215 = tpu.concatenate %213, %214 in 1 : vector<8x19xf32>, vector<8x305xf32> -> vector<8x324xf32>
    %cst_130 = arith.constant dense<0.000000e+00> : vector<8x324xf32>
    %216 = tpu.matmul %212, %215, %cst_130 {dimension_numbers = #tpu.dot_dimension_numbers<[1], [0], [0], [1], [0, 0, 1, 1], [], []>} : vector<8x8xf32>, vector<8x324xf32>, vector<8x324xf32> -> vector<8x324xf32>
    %217 = arith.addf %210, %216 : vector<8x324xf32>
    %c1_131 = arith.constant 1 : index
    %c0_132 = arith.constant 0 : index
    %c0_133 = arith.constant 0 : index
    %218 = vector.load %arg13[%c1_131, %c0_132, %c0_133] : memref<9x8x16xf32, #tpu.memory_space<vmem>>, vector<1x8x16xf32>
    %219 = vector.shape_cast %218 : vector<1x8x16xf32> to vector<8x16xf32>
    %220 = vector.extract_strided_slice %204 {offsets = [0, 306], sizes = [16, 18], strides = [1, 1]} : vector<16x324xf32> to vector<16x18xf32>
    %221 = vector.extract_strided_slice %204 {offsets = [0, 0], sizes = [16, 306], strides = [1, 1]} : vector<16x324xf32> to vector<16x306xf32>
    %222 = tpu.concatenate %220, %221 in 1 : vector<16x18xf32>, vector<16x306xf32> -> vector<16x324xf32>
    %cst_134 = arith.constant dense<0.000000e+00> : vector<8x324xf32>
    %223 = tpu.matmul %219, %222, %cst_134 {dimension_numbers = #tpu.dot_dimension_numbers<[1], [0], [0], [1], [0, 0, 1, 1], [], []>} : vector<8x16xf32>, vector<16x324xf32>, vector<8x324xf32> -> vector<8x324xf32>
    %224 = arith.addf %217, %223 : vector<8x324xf32>
    %c1_135 = arith.constant 1 : index
    %c0_136 = arith.constant 0 : index
    %c0_137 = arith.constant 0 : index
    %225 = vector.load %arg14[%c1_135, %c0_136, %c0_137] : memref<9x8x8xf32, #tpu.memory_space<vmem>>, vector<1x8x8xf32>
    %226 = vector.shape_cast %225 : vector<1x8x8xf32> to vector<8x8xf32>
    %227 = vector.extract_strided_slice %5 {offsets = [0, 306], sizes = [8, 18], strides = [1, 1]} : vector<8x324xf32> to vector<8x18xf32>
    %228 = vector.extract_strided_slice %5 {offsets = [0, 0], sizes = [8, 306], strides = [1, 1]} : vector<8x324xf32> to vector<8x306xf32>
    %229 = tpu.concatenate %227, %228 in 1 : vector<8x18xf32>, vector<8x306xf32> -> vector<8x324xf32>
    %cst_138 = arith.constant dense<0.000000e+00> : vector<8x324xf32>
    %230 = tpu.matmul %226, %229, %cst_138 {dimension_numbers = #tpu.dot_dimension_numbers<[1], [0], [0], [1], [0, 0, 1, 1], [], []>} : vector<8x8xf32>, vector<8x324xf32>, vector<8x324xf32> -> vector<8x324xf32>
    %231 = arith.addf %224, %230 : vector<8x324xf32>
    %c2_139 = arith.constant 2 : index
    %c0_140 = arith.constant 0 : index
    %c0_141 = arith.constant 0 : index
    %232 = vector.load %arg13[%c2_139, %c0_140, %c0_141] : memref<9x8x16xf32, #tpu.memory_space<vmem>>, vector<1x8x16xf32>
    %233 = vector.shape_cast %232 : vector<1x8x16xf32> to vector<8x16xf32>
    %234 = vector.extract_strided_slice %204 {offsets = [0, 307], sizes = [16, 17], strides = [1, 1]} : vector<16x324xf32> to vector<16x17xf32>
    %235 = vector.extract_strided_slice %204 {offsets = [0, 0], sizes = [16, 307], strides = [1, 1]} : vector<16x324xf32> to vector<16x307xf32>
    %236 = tpu.concatenate %234, %235 in 1 : vector<16x17xf32>, vector<16x307xf32> -> vector<16x324xf32>
    %cst_142 = arith.constant dense<0.000000e+00> : vector<8x324xf32>
    %237 = tpu.matmul %233, %236, %cst_142 {dimension_numbers = #tpu.dot_dimension_numbers<[1], [0], [0], [1], [0, 0, 1, 1], [], []>} : vector<8x16xf32>, vector<16x324xf32>, vector<8x324xf32> -> vector<8x324xf32>
    %238 = arith.addf %231, %237 : vector<8x324xf32>
    %c2_143 = arith.constant 2 : index
    %c0_144 = arith.constant 0 : index
    %c0_145 = arith.constant 0 : index
    %239 = vector.load %arg14[%c2_143, %c0_144, %c0_145] : memref<9x8x8xf32, #tpu.memory_space<vmem>>, vector<1x8x8xf32>
    %240 = vector.shape_cast %239 : vector<1x8x8xf32> to vector<8x8xf32>
    %241 = vector.extract_strided_slice %5 {offsets = [0, 307], sizes = [8, 17], strides = [1, 1]} : vector<8x324xf32> to vector<8x17xf32>
    %242 = vector.extract_strided_slice %5 {offsets = [0, 0], sizes = [8, 307], strides = [1, 1]} : vector<8x324xf32> to vector<8x307xf32>
    %243 = tpu.concatenate %241, %242 in 1 : vector<8x17xf32>, vector<8x307xf32> -> vector<8x324xf32>
    %cst_146 = arith.constant dense<0.000000e+00> : vector<8x324xf32>
    %244 = tpu.matmul %240, %243, %cst_146 {dimension_numbers = #tpu.dot_dimension_numbers<[1], [0], [0], [1], [0, 0, 1, 1], [], []>} : vector<8x8xf32>, vector<8x324xf32>, vector<8x324xf32> -> vector<8x324xf32>
    %245 = arith.addf %238, %244 : vector<8x324xf32>
    %c3_147 = arith.constant 3 : index
    %c0_148 = arith.constant 0 : index
    %c0_149 = arith.constant 0 : index
    %246 = vector.load %arg13[%c3_147, %c0_148, %c0_149] : memref<9x8x16xf32, #tpu.memory_space<vmem>>, vector<1x8x16xf32>
    %247 = vector.shape_cast %246 : vector<1x8x16xf32> to vector<8x16xf32>
    %248 = vector.extract_strided_slice %204 {offsets = [0, 323], sizes = [16, 1], strides = [1, 1]} : vector<16x324xf32> to vector<16x1xf32>
    %249 = vector.extract_strided_slice %204 {offsets = [0, 0], sizes = [16, 323], strides = [1, 1]} : vector<16x324xf32> to vector<16x323xf32>
    %250 = tpu.concatenate %248, %249 in 1 : vector<16x1xf32>, vector<16x323xf32> -> vector<16x324xf32>
    %cst_150 = arith.constant dense<0.000000e+00> : vector<8x324xf32>
    %251 = tpu.matmul %247, %250, %cst_150 {dimension_numbers = #tpu.dot_dimension_numbers<[1], [0], [0], [1], [0, 0, 1, 1], [], []>} : vector<8x16xf32>, vector<16x324xf32>, vector<8x324xf32> -> vector<8x324xf32>
    %252 = arith.addf %245, %251 : vector<8x324xf32>
    %c3_151 = arith.constant 3 : index
    %c0_152 = arith.constant 0 : index
    %c0_153 = arith.constant 0 : index
    %253 = vector.load %arg14[%c3_151, %c0_152, %c0_153] : memref<9x8x8xf32, #tpu.memory_space<vmem>>, vector<1x8x8xf32>
    %254 = vector.shape_cast %253 : vector<1x8x8xf32> to vector<8x8xf32>
    %255 = vector.extract_strided_slice %5 {offsets = [0, 323], sizes = [8, 1], strides = [1, 1]} : vector<8x324xf32> to vector<8x1xf32>
    %256 = vector.extract_strided_slice %5 {offsets = [0, 0], sizes = [8, 323], strides = [1, 1]} : vector<8x324xf32> to vector<8x323xf32>
    %257 = tpu.concatenate %255, %256 in 1 : vector<8x1xf32>, vector<8x323xf32> -> vector<8x324xf32>
    %cst_154 = arith.constant dense<0.000000e+00> : vector<8x324xf32>
    %258 = tpu.matmul %254, %257, %cst_154 {dimension_numbers = #tpu.dot_dimension_numbers<[1], [0], [0], [1], [0, 0, 1, 1], [], []>} : vector<8x8xf32>, vector<8x324xf32>, vector<8x324xf32> -> vector<8x324xf32>
    %259 = arith.addf %252, %258 : vector<8x324xf32>
    %c4_155 = arith.constant 4 : index
    %c0_156 = arith.constant 0 : index
    %c0_157 = arith.constant 0 : index
    %260 = vector.load %arg13[%c4_155, %c0_156, %c0_157] : memref<9x8x16xf32, #tpu.memory_space<vmem>>, vector<1x8x16xf32>
    %261 = vector.shape_cast %260 : vector<1x8x16xf32> to vector<8x16xf32>
    %cst_158 = arith.constant dense<0.000000e+00> : vector<8x324xf32>
    %262 = tpu.matmul %261, %204, %cst_158 {dimension_numbers = #tpu.dot_dimension_numbers<[1], [0], [0], [1], [0, 0, 1, 1], [], []>} : vector<8x16xf32>, vector<16x324xf32>, vector<8x324xf32> -> vector<8x324xf32>
    %263 = arith.addf %259, %262 : vector<8x324xf32>
    %c4_159 = arith.constant 4 : index
    %c0_160 = arith.constant 0 : index
    %c0_161 = arith.constant 0 : index
    %264 = vector.load %arg14[%c4_159, %c0_160, %c0_161] : memref<9x8x8xf32, #tpu.memory_space<vmem>>, vector<1x8x8xf32>
    %265 = vector.shape_cast %264 : vector<1x8x8xf32> to vector<8x8xf32>
    %cst_162 = arith.constant dense<0.000000e+00> : vector<8x324xf32>
    %266 = tpu.matmul %265, %5, %cst_162 {dimension_numbers = #tpu.dot_dimension_numbers<[1], [0], [0], [1], [0, 0, 1, 1], [], []>} : vector<8x8xf32>, vector<8x324xf32>, vector<8x324xf32> -> vector<8x324xf32>
    %267 = arith.addf %263, %266 : vector<8x324xf32>
    %c5_163 = arith.constant 5 : index
    %c0_164 = arith.constant 0 : index
    %c0_165 = arith.constant 0 : index
    %268 = vector.load %arg13[%c5_163, %c0_164, %c0_165] : memref<9x8x16xf32, #tpu.memory_space<vmem>>, vector<1x8x16xf32>
    %269 = vector.shape_cast %268 : vector<1x8x16xf32> to vector<8x16xf32>
    %270 = vector.extract_strided_slice %204 {offsets = [0, 1], sizes = [16, 323], strides = [1, 1]} : vector<16x324xf32> to vector<16x323xf32>
    %271 = vector.extract_strided_slice %204 {offsets = [0, 0], sizes = [16, 1], strides = [1, 1]} : vector<16x324xf32> to vector<16x1xf32>
    %272 = tpu.concatenate %270, %271 in 1 : vector<16x323xf32>, vector<16x1xf32> -> vector<16x324xf32>
    %cst_166 = arith.constant dense<0.000000e+00> : vector<8x324xf32>
    %273 = tpu.matmul %269, %272, %cst_166 {dimension_numbers = #tpu.dot_dimension_numbers<[1], [0], [0], [1], [0, 0, 1, 1], [], []>} : vector<8x16xf32>, vector<16x324xf32>, vector<8x324xf32> -> vector<8x324xf32>
    %274 = arith.addf %267, %273 : vector<8x324xf32>
    %c5_167 = arith.constant 5 : index
    %c0_168 = arith.constant 0 : index
    %c0_169 = arith.constant 0 : index
    %275 = vector.load %arg14[%c5_167, %c0_168, %c0_169] : memref<9x8x8xf32, #tpu.memory_space<vmem>>, vector<1x8x8xf32>
    %276 = vector.shape_cast %275 : vector<1x8x8xf32> to vector<8x8xf32>
    %277 = vector.extract_strided_slice %5 {offsets = [0, 1], sizes = [8, 323], strides = [1, 1]} : vector<8x324xf32> to vector<8x323xf32>
    %278 = vector.extract_strided_slice %5 {offsets = [0, 0], sizes = [8, 1], strides = [1, 1]} : vector<8x324xf32> to vector<8x1xf32>
    %279 = tpu.concatenate %277, %278 in 1 : vector<8x323xf32>, vector<8x1xf32> -> vector<8x324xf32>
    %cst_170 = arith.constant dense<0.000000e+00> : vector<8x324xf32>
    %280 = tpu.matmul %276, %279, %cst_170 {dimension_numbers = #tpu.dot_dimension_numbers<[1], [0], [0], [1], [0, 0, 1, 1], [], []>} : vector<8x8xf32>, vector<8x324xf32>, vector<8x324xf32> -> vector<8x324xf32>
    %281 = arith.addf %274, %280 : vector<8x324xf32>
    %c6_171 = arith.constant 6 : index
    %c0_172 = arith.constant 0 : index
    %c0_173 = arith.constant 0 : index
    %282 = vector.load %arg13[%c6_171, %c0_172, %c0_173] : memref<9x8x16xf32, #tpu.memory_space<vmem>>, vector<1x8x16xf32>
    %283 = vector.shape_cast %282 : vector<1x8x16xf32> to vector<8x16xf32>
    %284 = vector.extract_strided_slice %204 {offsets = [0, 17], sizes = [16, 307], strides = [1, 1]} : vector<16x324xf32> to vector<16x307xf32>
    %285 = vector.extract_strided_slice %204 {offsets = [0, 0], sizes = [16, 17], strides = [1, 1]} : vector<16x324xf32> to vector<16x17xf32>
    %286 = tpu.concatenate %284, %285 in 1 : vector<16x307xf32>, vector<16x17xf32> -> vector<16x324xf32>
    %cst_174 = arith.constant dense<0.000000e+00> : vector<8x324xf32>
    %287 = tpu.matmul %283, %286, %cst_174 {dimension_numbers = #tpu.dot_dimension_numbers<[1], [0], [0], [1], [0, 0, 1, 1], [], []>} : vector<8x16xf32>, vector<16x324xf32>, vector<8x324xf32> -> vector<8x324xf32>
    %288 = arith.addf %281, %287 : vector<8x324xf32>
    %c6_175 = arith.constant 6 : index
    %c0_176 = arith.constant 0 : index
    %c0_177 = arith.constant 0 : index
    %289 = vector.load %arg14[%c6_175, %c0_176, %c0_177] : memref<9x8x8xf32, #tpu.memory_space<vmem>>, vector<1x8x8xf32>
    %290 = vector.shape_cast %289 : vector<1x8x8xf32> to vector<8x8xf32>
    %291 = vector.extract_strided_slice %5 {offsets = [0, 17], sizes = [8, 307], strides = [1, 1]} : vector<8x324xf32> to vector<8x307xf32>
    %292 = vector.extract_strided_slice %5 {offsets = [0, 0], sizes = [8, 17], strides = [1, 1]} : vector<8x324xf32> to vector<8x17xf32>
    %293 = tpu.concatenate %291, %292 in 1 : vector<8x307xf32>, vector<8x17xf32> -> vector<8x324xf32>
    %cst_178 = arith.constant dense<0.000000e+00> : vector<8x324xf32>
    %294 = tpu.matmul %290, %293, %cst_178 {dimension_numbers = #tpu.dot_dimension_numbers<[1], [0], [0], [1], [0, 0, 1, 1], [], []>} : vector<8x8xf32>, vector<8x324xf32>, vector<8x324xf32> -> vector<8x324xf32>
    %295 = arith.addf %288, %294 : vector<8x324xf32>
    %c7_179 = arith.constant 7 : index
    %c0_180 = arith.constant 0 : index
    %c0_181 = arith.constant 0 : index
    %296 = vector.load %arg13[%c7_179, %c0_180, %c0_181] : memref<9x8x16xf32, #tpu.memory_space<vmem>>, vector<1x8x16xf32>
    %297 = vector.shape_cast %296 : vector<1x8x16xf32> to vector<8x16xf32>
    %298 = vector.extract_strided_slice %204 {offsets = [0, 18], sizes = [16, 306], strides = [1, 1]} : vector<16x324xf32> to vector<16x306xf32>
    %299 = vector.extract_strided_slice %204 {offsets = [0, 0], sizes = [16, 18], strides = [1, 1]} : vector<16x324xf32> to vector<16x18xf32>
    %300 = tpu.concatenate %298, %299 in 1 : vector<16x306xf32>, vector<16x18xf32> -> vector<16x324xf32>
    %cst_182 = arith.constant dense<0.000000e+00> : vector<8x324xf32>
    %301 = tpu.matmul %297, %300, %cst_182 {dimension_numbers = #tpu.dot_dimension_numbers<[1], [0], [0], [1], [0, 0, 1, 1], [], []>} : vector<8x16xf32>, vector<16x324xf32>, vector<8x324xf32> -> vector<8x324xf32>
    %302 = arith.addf %295, %301 : vector<8x324xf32>
    %c7_183 = arith.constant 7 : index
    %c0_184 = arith.constant 0 : index
    %c0_185 = arith.constant 0 : index
    %303 = vector.load %arg14[%c7_183, %c0_184, %c0_185] : memref<9x8x8xf32, #tpu.memory_space<vmem>>, vector<1x8x8xf32>
    %304 = vector.shape_cast %303 : vector<1x8x8xf32> to vector<8x8xf32>
    %305 = vector.extract_strided_slice %5 {offsets = [0, 18], sizes = [8, 306], strides = [1, 1]} : vector<8x324xf32> to vector<8x306xf32>
    %306 = vector.extract_strided_slice %5 {offsets = [0, 0], sizes = [8, 18], strides = [1, 1]} : vector<8x324xf32> to vector<8x18xf32>
    %307 = tpu.concatenate %305, %306 in 1 : vector<8x306xf32>, vector<8x18xf32> -> vector<8x324xf32>
    %cst_186 = arith.constant dense<0.000000e+00> : vector<8x324xf32>
    %308 = tpu.matmul %304, %307, %cst_186 {dimension_numbers = #tpu.dot_dimension_numbers<[1], [0], [0], [1], [0, 0, 1, 1], [], []>} : vector<8x8xf32>, vector<8x324xf32>, vector<8x324xf32> -> vector<8x324xf32>
    %309 = arith.addf %302, %308 : vector<8x324xf32>
    %c8_187 = arith.constant 8 : index
    %c0_188 = arith.constant 0 : index
    %c0_189 = arith.constant 0 : index
    %310 = vector.load %arg13[%c8_187, %c0_188, %c0_189] : memref<9x8x16xf32, #tpu.memory_space<vmem>>, vector<1x8x16xf32>
    %311 = vector.shape_cast %310 : vector<1x8x16xf32> to vector<8x16xf32>
    %312 = vector.extract_strided_slice %204 {offsets = [0, 19], sizes = [16, 305], strides = [1, 1]} : vector<16x324xf32> to vector<16x305xf32>
    %313 = vector.extract_strided_slice %204 {offsets = [0, 0], sizes = [16, 19], strides = [1, 1]} : vector<16x324xf32> to vector<16x19xf32>
    %314 = tpu.concatenate %312, %313 in 1 : vector<16x305xf32>, vector<16x19xf32> -> vector<16x324xf32>
    %cst_190 = arith.constant dense<0.000000e+00> : vector<8x324xf32>
    %315 = tpu.matmul %311, %314, %cst_190 {dimension_numbers = #tpu.dot_dimension_numbers<[1], [0], [0], [1], [0, 0, 1, 1], [], []>} : vector<8x16xf32>, vector<16x324xf32>, vector<8x324xf32> -> vector<8x324xf32>
    %316 = arith.addf %309, %315 : vector<8x324xf32>
    %c8_191 = arith.constant 8 : index
    %c0_192 = arith.constant 0 : index
    %c0_193 = arith.constant 0 : index
    %317 = vector.load %arg14[%c8_191, %c0_192, %c0_193] : memref<9x8x8xf32, #tpu.memory_space<vmem>>, vector<1x8x8xf32>
    %318 = vector.shape_cast %317 : vector<1x8x8xf32> to vector<8x8xf32>
    %319 = vector.extract_strided_slice %5 {offsets = [0, 19], sizes = [8, 305], strides = [1, 1]} : vector<8x324xf32> to vector<8x305xf32>
    %320 = vector.extract_strided_slice %5 {offsets = [0, 0], sizes = [8, 19], strides = [1, 1]} : vector<8x324xf32> to vector<8x19xf32>
    %321 = tpu.concatenate %319, %320 in 1 : vector<8x305xf32>, vector<8x19xf32> -> vector<8x324xf32>
    %cst_194 = arith.constant dense<0.000000e+00> : vector<8x324xf32>
    %322 = tpu.matmul %318, %321, %cst_194 {dimension_numbers = #tpu.dot_dimension_numbers<[1], [0], [0], [1], [0, 0, 1, 1], [], []>} : vector<8x8xf32>, vector<8x324xf32>, vector<8x324xf32> -> vector<8x324xf32>
    %323 = arith.addf %316, %322 : vector<8x324xf32>
    %c0_195 = arith.constant 0 : index
    %c0_196 = arith.constant 0 : index
    %324 = vector.load %arg15[%c0_195, %c0_196] : memref<8x1xf32, #tpu.memory_space<vmem>>, vector<8x1xf32>
    %325 = vector.broadcast %324 : vector<8x1xf32> to vector<8x324xf32>
    %326 = arith.addf %323, %325 : vector<8x324xf32>
    %327 = vector.broadcast %7 : vector<1x324xf32> to vector<8x324xf32>
    %328 = arith.mulf %326, %327 : vector<8x324xf32>
    %c0_197 = arith.constant 0 : index
    %c0_198 = arith.constant 0 : index
    %c0_199 = arith.constant 0 : index
    %329 = vector.load %arg16[%c0_197, %c0_198, %c0_199] : memref<9x8x8xf32, #tpu.memory_space<vmem>>, vector<1x8x8xf32>
    %330 = vector.shape_cast %329 : vector<1x8x8xf32> to vector<8x8xf32>
    %331 = vector.extract_strided_slice %328 {offsets = [0, 305], sizes = [8, 19], strides = [1, 1]} : vector<8x324xf32> to vector<8x19xf32>
    %332 = vector.extract_strided_slice %328 {offsets = [0, 0], sizes = [8, 305], strides = [1, 1]} : vector<8x324xf32> to vector<8x305xf32>
    %333 = tpu.concatenate %331, %332 in 1 : vector<8x19xf32>, vector<8x305xf32> -> vector<8x324xf32>
    %cst_200 = arith.constant dense<0.000000e+00> : vector<8x324xf32>
    %334 = tpu.matmul %330, %333, %cst_200 {dimension_numbers = #tpu.dot_dimension_numbers<[1], [0], [0], [1], [0, 0, 1, 1], [], []>} : vector<8x8xf32>, vector<8x324xf32>, vector<8x324xf32> -> vector<8x324xf32>
    %c1_201 = arith.constant 1 : index
    %c0_202 = arith.constant 0 : index
    %c0_203 = arith.constant 0 : index
    %335 = vector.load %arg16[%c1_201, %c0_202, %c0_203] : memref<9x8x8xf32, #tpu.memory_space<vmem>>, vector<1x8x8xf32>
    %336 = vector.shape_cast %335 : vector<1x8x8xf32> to vector<8x8xf32>
    %337 = vector.extract_strided_slice %328 {offsets = [0, 306], sizes = [8, 18], strides = [1, 1]} : vector<8x324xf32> to vector<8x18xf32>
    %338 = vector.extract_strided_slice %328 {offsets = [0, 0], sizes = [8, 306], strides = [1, 1]} : vector<8x324xf32> to vector<8x306xf32>
    %339 = tpu.concatenate %337, %338 in 1 : vector<8x18xf32>, vector<8x306xf32> -> vector<8x324xf32>
    %cst_204 = arith.constant dense<0.000000e+00> : vector<8x324xf32>
    %340 = tpu.matmul %336, %339, %cst_204 {dimension_numbers = #tpu.dot_dimension_numbers<[1], [0], [0], [1], [0, 0, 1, 1], [], []>} : vector<8x8xf32>, vector<8x324xf32>, vector<8x324xf32> -> vector<8x324xf32>
    %341 = arith.addf %334, %340 : vector<8x324xf32>
    %c2_205 = arith.constant 2 : index
    %c0_206 = arith.constant 0 : index
    %c0_207 = arith.constant 0 : index
    %342 = vector.load %arg16[%c2_205, %c0_206, %c0_207] : memref<9x8x8xf32, #tpu.memory_space<vmem>>, vector<1x8x8xf32>
    %343 = vector.shape_cast %342 : vector<1x8x8xf32> to vector<8x8xf32>
    %344 = vector.extract_strided_slice %328 {offsets = [0, 307], sizes = [8, 17], strides = [1, 1]} : vector<8x324xf32> to vector<8x17xf32>
    %345 = vector.extract_strided_slice %328 {offsets = [0, 0], sizes = [8, 307], strides = [1, 1]} : vector<8x324xf32> to vector<8x307xf32>
    %346 = tpu.concatenate %344, %345 in 1 : vector<8x17xf32>, vector<8x307xf32> -> vector<8x324xf32>
    %cst_208 = arith.constant dense<0.000000e+00> : vector<8x324xf32>
    %347 = tpu.matmul %343, %346, %cst_208 {dimension_numbers = #tpu.dot_dimension_numbers<[1], [0], [0], [1], [0, 0, 1, 1], [], []>} : vector<8x8xf32>, vector<8x324xf32>, vector<8x324xf32> -> vector<8x324xf32>
    %348 = arith.addf %341, %347 : vector<8x324xf32>
    %c3_209 = arith.constant 3 : index
    %c0_210 = arith.constant 0 : index
    %c0_211 = arith.constant 0 : index
    %349 = vector.load %arg16[%c3_209, %c0_210, %c0_211] : memref<9x8x8xf32, #tpu.memory_space<vmem>>, vector<1x8x8xf32>
    %350 = vector.shape_cast %349 : vector<1x8x8xf32> to vector<8x8xf32>
    %351 = vector.extract_strided_slice %328 {offsets = [0, 323], sizes = [8, 1], strides = [1, 1]} : vector<8x324xf32> to vector<8x1xf32>
    %352 = vector.extract_strided_slice %328 {offsets = [0, 0], sizes = [8, 323], strides = [1, 1]} : vector<8x324xf32> to vector<8x323xf32>
    %353 = tpu.concatenate %351, %352 in 1 : vector<8x1xf32>, vector<8x323xf32> -> vector<8x324xf32>
    %cst_212 = arith.constant dense<0.000000e+00> : vector<8x324xf32>
    %354 = tpu.matmul %350, %353, %cst_212 {dimension_numbers = #tpu.dot_dimension_numbers<[1], [0], [0], [1], [0, 0, 1, 1], [], []>} : vector<8x8xf32>, vector<8x324xf32>, vector<8x324xf32> -> vector<8x324xf32>
    %355 = arith.addf %348, %354 : vector<8x324xf32>
    %c4_213 = arith.constant 4 : index
    %c0_214 = arith.constant 0 : index
    %c0_215 = arith.constant 0 : index
    %356 = vector.load %arg16[%c4_213, %c0_214, %c0_215] : memref<9x8x8xf32, #tpu.memory_space<vmem>>, vector<1x8x8xf32>
    %357 = vector.shape_cast %356 : vector<1x8x8xf32> to vector<8x8xf32>
    %cst_216 = arith.constant dense<0.000000e+00> : vector<8x324xf32>
    %358 = tpu.matmul %357, %328, %cst_216 {dimension_numbers = #tpu.dot_dimension_numbers<[1], [0], [0], [1], [0, 0, 1, 1], [], []>} : vector<8x8xf32>, vector<8x324xf32>, vector<8x324xf32> -> vector<8x324xf32>
    %359 = arith.addf %355, %358 : vector<8x324xf32>
    %c5_217 = arith.constant 5 : index
    %c0_218 = arith.constant 0 : index
    %c0_219 = arith.constant 0 : index
    %360 = vector.load %arg16[%c5_217, %c0_218, %c0_219] : memref<9x8x8xf32, #tpu.memory_space<vmem>>, vector<1x8x8xf32>
    %361 = vector.shape_cast %360 : vector<1x8x8xf32> to vector<8x8xf32>
    %362 = vector.extract_strided_slice %328 {offsets = [0, 1], sizes = [8, 323], strides = [1, 1]} : vector<8x324xf32> to vector<8x323xf32>
    %363 = vector.extract_strided_slice %328 {offsets = [0, 0], sizes = [8, 1], strides = [1, 1]} : vector<8x324xf32> to vector<8x1xf32>
    %364 = tpu.concatenate %362, %363 in 1 : vector<8x323xf32>, vector<8x1xf32> -> vector<8x324xf32>
    %cst_220 = arith.constant dense<0.000000e+00> : vector<8x324xf32>
    %365 = tpu.matmul %361, %364, %cst_220 {dimension_numbers = #tpu.dot_dimension_numbers<[1], [0], [0], [1], [0, 0, 1, 1], [], []>} : vector<8x8xf32>, vector<8x324xf32>, vector<8x324xf32> -> vector<8x324xf32>
    %366 = arith.addf %359, %365 : vector<8x324xf32>
    %c6_221 = arith.constant 6 : index
    %c0_222 = arith.constant 0 : index
    %c0_223 = arith.constant 0 : index
    %367 = vector.load %arg16[%c6_221, %c0_222, %c0_223] : memref<9x8x8xf32, #tpu.memory_space<vmem>>, vector<1x8x8xf32>
    %368 = vector.shape_cast %367 : vector<1x8x8xf32> to vector<8x8xf32>
    %369 = vector.extract_strided_slice %328 {offsets = [0, 17], sizes = [8, 307], strides = [1, 1]} : vector<8x324xf32> to vector<8x307xf32>
    %370 = vector.extract_strided_slice %328 {offsets = [0, 0], sizes = [8, 17], strides = [1, 1]} : vector<8x324xf32> to vector<8x17xf32>
    %371 = tpu.concatenate %369, %370 in 1 : vector<8x307xf32>, vector<8x17xf32> -> vector<8x324xf32>
    %cst_224 = arith.constant dense<0.000000e+00> : vector<8x324xf32>
    %372 = tpu.matmul %368, %371, %cst_224 {dimension_numbers = #tpu.dot_dimension_numbers<[1], [0], [0], [1], [0, 0, 1, 1], [], []>} : vector<8x8xf32>, vector<8x324xf32>, vector<8x324xf32> -> vector<8x324xf32>
    %373 = arith.addf %366, %372 : vector<8x324xf32>
    %c7_225 = arith.constant 7 : index
    %c0_226 = arith.constant 0 : index
    %c0_227 = arith.constant 0 : index
    %374 = vector.load %arg16[%c7_225, %c0_226, %c0_227] : memref<9x8x8xf32, #tpu.memory_space<vmem>>, vector<1x8x8xf32>
    %375 = vector.shape_cast %374 : vector<1x8x8xf32> to vector<8x8xf32>
    %376 = vector.extract_strided_slice %328 {offsets = [0, 18], sizes = [8, 306], strides = [1, 1]} : vector<8x324xf32> to vector<8x306xf32>
    %377 = vector.extract_strided_slice %328 {offsets = [0, 0], sizes = [8, 18], strides = [1, 1]} : vector<8x324xf32> to vector<8x18xf32>
    %378 = tpu.concatenate %376, %377 in 1 : vector<8x306xf32>, vector<8x18xf32> -> vector<8x324xf32>
    %cst_228 = arith.constant dense<0.000000e+00> : vector<8x324xf32>
    %379 = tpu.matmul %375, %378, %cst_228 {dimension_numbers = #tpu.dot_dimension_numbers<[1], [0], [0], [1], [0, 0, 1, 1], [], []>} : vector<8x8xf32>, vector<8x324xf32>, vector<8x324xf32> -> vector<8x324xf32>
    %380 = arith.addf %373, %379 : vector<8x324xf32>
    %c8_229 = arith.constant 8 : index
    %c0_230 = arith.constant 0 : index
    %c0_231 = arith.constant 0 : index
    %381 = vector.load %arg16[%c8_229, %c0_230, %c0_231] : memref<9x8x8xf32, #tpu.memory_space<vmem>>, vector<1x8x8xf32>
    %382 = vector.shape_cast %381 : vector<1x8x8xf32> to vector<8x8xf32>
    %383 = vector.extract_strided_slice %328 {offsets = [0, 19], sizes = [8, 305], strides = [1, 1]} : vector<8x324xf32> to vector<8x305xf32>
    %384 = vector.extract_strided_slice %328 {offsets = [0, 0], sizes = [8, 19], strides = [1, 1]} : vector<8x324xf32> to vector<8x19xf32>
    %385 = tpu.concatenate %383, %384 in 1 : vector<8x305xf32>, vector<8x19xf32> -> vector<8x324xf32>
    %cst_232 = arith.constant dense<0.000000e+00> : vector<8x324xf32>
    %386 = tpu.matmul %382, %385, %cst_232 {dimension_numbers = #tpu.dot_dimension_numbers<[1], [0], [0], [1], [0, 0, 1, 1], [], []>} : vector<8x8xf32>, vector<8x324xf32>, vector<8x324xf32> -> vector<8x324xf32>
    %387 = arith.addf %380, %386 : vector<8x324xf32>
    %c0_233 = arith.constant 0 : index
    %c0_234 = arith.constant 0 : index
    %388 = vector.load %arg17[%c0_233, %c0_234] : memref<8x1xf32, #tpu.memory_space<vmem>>, vector<8x1xf32>
    %389 = vector.broadcast %388 : vector<8x1xf32> to vector<8x324xf32>
    %390 = arith.addf %387, %389 : vector<8x324xf32>
    %cst_235 = arith.constant 0.000000e+00 : f32
    %391 = vector.broadcast %cst_235 : f32 to vector<8x324xf32>
    %392 = arith.cmpf oge, %390, %391 : vector<8x324xf32>
    %cst_236 = arith.constant 0.00999999977 : f32
    %393 = vector.broadcast %cst_236 : f32 to vector<8x324xf32>
    %394 = arith.mulf %393, %390 : vector<8x324xf32>
    %395 = arith.select %392, %390, %394 : vector<8x324xi1>, vector<8x324xf32>
    %396 = vector.broadcast %7 : vector<1x324xf32> to vector<8x324xf32>
    %397 = arith.mulf %395, %396 : vector<8x324xf32>
    %c0_237 = arith.constant 0 : index
    %c0_238 = arith.constant 0 : index
    %c0_239 = arith.constant 0 : index
    %398 = vector.load %arg18[%c0_237, %c0_238, %c0_239] : memref<9x4x8xf32, #tpu.memory_space<vmem>>, vector<1x4x8xf32>
    %399 = vector.shape_cast %398 : vector<1x4x8xf32> to vector<4x8xf32>
    %400 = vector.extract_strided_slice %397 {offsets = [0, 305], sizes = [8, 19], strides = [1, 1]} : vector<8x324xf32> to vector<8x19xf32>
    %401 = vector.extract_strided_slice %397 {offsets = [0, 0], sizes = [8, 305], strides = [1, 1]} : vector<8x324xf32> to vector<8x305xf32>
    %402 = tpu.concatenate %400, %401 in 1 : vector<8x19xf32>, vector<8x305xf32> -> vector<8x324xf32>
    %cst_240 = arith.constant dense<0.000000e+00> : vector<4x324xf32>
    %403 = tpu.matmul %399, %402, %cst_240 {dimension_numbers = #tpu.dot_dimension_numbers<[1], [0], [0], [1], [0, 0, 1, 1], [], []>} : vector<4x8xf32>, vector<8x324xf32>, vector<4x324xf32> -> vector<4x324xf32>
    %c1_241 = arith.constant 1 : index
    %c0_242 = arith.constant 0 : index
    %c0_243 = arith.constant 0 : index
    %404 = vector.load %arg18[%c1_241, %c0_242, %c0_243] : memref<9x4x8xf32, #tpu.memory_space<vmem>>, vector<1x4x8xf32>
    %405 = vector.shape_cast %404 : vector<1x4x8xf32> to vector<4x8xf32>
    %406 = vector.extract_strided_slice %397 {offsets = [0, 306], sizes = [8, 18], strides = [1, 1]} : vector<8x324xf32> to vector<8x18xf32>
    %407 = vector.extract_strided_slice %397 {offsets = [0, 0], sizes = [8, 306], strides = [1, 1]} : vector<8x324xf32> to vector<8x306xf32>
    %408 = tpu.concatenate %406, %407 in 1 : vector<8x18xf32>, vector<8x306xf32> -> vector<8x324xf32>
    %cst_244 = arith.constant dense<0.000000e+00> : vector<4x324xf32>
    %409 = tpu.matmul %405, %408, %cst_244 {dimension_numbers = #tpu.dot_dimension_numbers<[1], [0], [0], [1], [0, 0, 1, 1], [], []>} : vector<4x8xf32>, vector<8x324xf32>, vector<4x324xf32> -> vector<4x324xf32>
    %410 = arith.addf %403, %409 : vector<4x324xf32>
    %c2_245 = arith.constant 2 : index
    %c0_246 = arith.constant 0 : index
    %c0_247 = arith.constant 0 : index
    %411 = vector.load %arg18[%c2_245, %c0_246, %c0_247] : memref<9x4x8xf32, #tpu.memory_space<vmem>>, vector<1x4x8xf32>
    %412 = vector.shape_cast %411 : vector<1x4x8xf32> to vector<4x8xf32>
    %413 = vector.extract_strided_slice %397 {offsets = [0, 307], sizes = [8, 17], strides = [1, 1]} : vector<8x324xf32> to vector<8x17xf32>
    %414 = vector.extract_strided_slice %397 {offsets = [0, 0], sizes = [8, 307], strides = [1, 1]} : vector<8x324xf32> to vector<8x307xf32>
    %415 = tpu.concatenate %413, %414 in 1 : vector<8x17xf32>, vector<8x307xf32> -> vector<8x324xf32>
    %cst_248 = arith.constant dense<0.000000e+00> : vector<4x324xf32>
    %416 = tpu.matmul %412, %415, %cst_248 {dimension_numbers = #tpu.dot_dimension_numbers<[1], [0], [0], [1], [0, 0, 1, 1], [], []>} : vector<4x8xf32>, vector<8x324xf32>, vector<4x324xf32> -> vector<4x324xf32>
    %417 = arith.addf %410, %416 : vector<4x324xf32>
    %c3_249 = arith.constant 3 : index
    %c0_250 = arith.constant 0 : index
    %c0_251 = arith.constant 0 : index
    %418 = vector.load %arg18[%c3_249, %c0_250, %c0_251] : memref<9x4x8xf32, #tpu.memory_space<vmem>>, vector<1x4x8xf32>
    %419 = vector.shape_cast %418 : vector<1x4x8xf32> to vector<4x8xf32>
    %420 = vector.extract_strided_slice %397 {offsets = [0, 323], sizes = [8, 1], strides = [1, 1]} : vector<8x324xf32> to vector<8x1xf32>
    %421 = vector.extract_strided_slice %397 {offsets = [0, 0], sizes = [8, 323], strides = [1, 1]} : vector<8x324xf32> to vector<8x323xf32>
    %422 = tpu.concatenate %420, %421 in 1 : vector<8x1xf32>, vector<8x323xf32> -> vector<8x324xf32>
    %cst_252 = arith.constant dense<0.000000e+00> : vector<4x324xf32>
    %423 = tpu.matmul %419, %422, %cst_252 {dimension_numbers = #tpu.dot_dimension_numbers<[1], [0], [0], [1], [0, 0, 1, 1], [], []>} : vector<4x8xf32>, vector<8x324xf32>, vector<4x324xf32> -> vector<4x324xf32>
    %424 = arith.addf %417, %423 : vector<4x324xf32>
    %c4_253 = arith.constant 4 : index
    %c0_254 = arith.constant 0 : index
    %c0_255 = arith.constant 0 : index
    %425 = vector.load %arg18[%c4_253, %c0_254, %c0_255] : memref<9x4x8xf32, #tpu.memory_space<vmem>>, vector<1x4x8xf32>
    %426 = vector.shape_cast %425 : vector<1x4x8xf32> to vector<4x8xf32>
    %cst_256 = arith.constant dense<0.000000e+00> : vector<4x324xf32>
    %427 = tpu.matmul %426, %397, %cst_256 {dimension_numbers = #tpu.dot_dimension_numbers<[1], [0], [0], [1], [0, 0, 1, 1], [], []>} : vector<4x8xf32>, vector<8x324xf32>, vector<4x324xf32> -> vector<4x324xf32>
    %428 = arith.addf %424, %427 : vector<4x324xf32>
    %c5_257 = arith.constant 5 : index
    %c0_258 = arith.constant 0 : index
    %c0_259 = arith.constant 0 : index
    %429 = vector.load %arg18[%c5_257, %c0_258, %c0_259] : memref<9x4x8xf32, #tpu.memory_space<vmem>>, vector<1x4x8xf32>
    %430 = vector.shape_cast %429 : vector<1x4x8xf32> to vector<4x8xf32>
    %431 = vector.extract_strided_slice %397 {offsets = [0, 1], sizes = [8, 323], strides = [1, 1]} : vector<8x324xf32> to vector<8x323xf32>
    %432 = vector.extract_strided_slice %397 {offsets = [0, 0], sizes = [8, 1], strides = [1, 1]} : vector<8x324xf32> to vector<8x1xf32>
    %433 = tpu.concatenate %431, %432 in 1 : vector<8x323xf32>, vector<8x1xf32> -> vector<8x324xf32>
    %cst_260 = arith.constant dense<0.000000e+00> : vector<4x324xf32>
    %434 = tpu.matmul %430, %433, %cst_260 {dimension_numbers = #tpu.dot_dimension_numbers<[1], [0], [0], [1], [0, 0, 1, 1], [], []>} : vector<4x8xf32>, vector<8x324xf32>, vector<4x324xf32> -> vector<4x324xf32>
    %435 = arith.addf %428, %434 : vector<4x324xf32>
    %c6_261 = arith.constant 6 : index
    %c0_262 = arith.constant 0 : index
    %c0_263 = arith.constant 0 : index
    %436 = vector.load %arg18[%c6_261, %c0_262, %c0_263] : memref<9x4x8xf32, #tpu.memory_space<vmem>>, vector<1x4x8xf32>
    %437 = vector.shape_cast %436 : vector<1x4x8xf32> to vector<4x8xf32>
    %438 = vector.extract_strided_slice %397 {offsets = [0, 17], sizes = [8, 307], strides = [1, 1]} : vector<8x324xf32> to vector<8x307xf32>
    %439 = vector.extract_strided_slice %397 {offsets = [0, 0], sizes = [8, 17], strides = [1, 1]} : vector<8x324xf32> to vector<8x17xf32>
    %440 = tpu.concatenate %438, %439 in 1 : vector<8x307xf32>, vector<8x17xf32> -> vector<8x324xf32>
    %cst_264 = arith.constant dense<0.000000e+00> : vector<4x324xf32>
    %441 = tpu.matmul %437, %440, %cst_264 {dimension_numbers = #tpu.dot_dimension_numbers<[1], [0], [0], [1], [0, 0, 1, 1], [], []>} : vector<4x8xf32>, vector<8x324xf32>, vector<4x324xf32> -> vector<4x324xf32>
    %442 = arith.addf %435, %441 : vector<4x324xf32>
    %c7_265 = arith.constant 7 : index
    %c0_266 = arith.constant 0 : index
    %c0_267 = arith.constant 0 : index
    %443 = vector.load %arg18[%c7_265, %c0_266, %c0_267] : memref<9x4x8xf32, #tpu.memory_space<vmem>>, vector<1x4x8xf32>
    %444 = vector.shape_cast %443 : vector<1x4x8xf32> to vector<4x8xf32>
    %445 = vector.extract_strided_slice %397 {offsets = [0, 18], sizes = [8, 306], strides = [1, 1]} : vector<8x324xf32> to vector<8x306xf32>
    %446 = vector.extract_strided_slice %397 {offsets = [0, 0], sizes = [8, 18], strides = [1, 1]} : vector<8x324xf32> to vector<8x18xf32>
    %447 = tpu.concatenate %445, %446 in 1 : vector<8x306xf32>, vector<8x18xf32> -> vector<8x324xf32>
    %cst_268 = arith.constant dense<0.000000e+00> : vector<4x324xf32>
    %448 = tpu.matmul %444, %447, %cst_268 {dimension_numbers = #tpu.dot_dimension_numbers<[1], [0], [0], [1], [0, 0, 1, 1], [], []>} : vector<4x8xf32>, vector<8x324xf32>, vector<4x324xf32> -> vector<4x324xf32>
    %449 = arith.addf %442, %448 : vector<4x324xf32>
    %c8_269 = arith.constant 8 : index
    %c0_270 = arith.constant 0 : index
    %c0_271 = arith.constant 0 : index
    %450 = vector.load %arg18[%c8_269, %c0_270, %c0_271] : memref<9x4x8xf32, #tpu.memory_space<vmem>>, vector<1x4x8xf32>
    %451 = vector.shape_cast %450 : vector<1x4x8xf32> to vector<4x8xf32>
    %452 = vector.extract_strided_slice %397 {offsets = [0, 19], sizes = [8, 305], strides = [1, 1]} : vector<8x324xf32> to vector<8x305xf32>
    %453 = vector.extract_strided_slice %397 {offsets = [0, 0], sizes = [8, 19], strides = [1, 1]} : vector<8x324xf32> to vector<8x19xf32>
    %454 = tpu.concatenate %452, %453 in 1 : vector<8x305xf32>, vector<8x19xf32> -> vector<8x324xf32>
    %cst_272 = arith.constant dense<0.000000e+00> : vector<4x324xf32>
    %455 = tpu.matmul %451, %454, %cst_272 {dimension_numbers = #tpu.dot_dimension_numbers<[1], [0], [0], [1], [0, 0, 1, 1], [], []>} : vector<4x8xf32>, vector<8x324xf32>, vector<4x324xf32> -> vector<4x324xf32>
    %456 = arith.addf %449, %455 : vector<4x324xf32>
    %c0_273 = arith.constant 0 : index
    %c0_274 = arith.constant 0 : index
    %457 = vector.load %arg19[%c0_273, %c0_274] : memref<4x1xf32, #tpu.memory_space<vmem>>, vector<4x1xf32>
    %458 = vector.broadcast %457 : vector<4x1xf32> to vector<4x324xf32>
    %459 = arith.addf %456, %458 : vector<4x324xf32>
    %cst_275 = arith.constant 0.000000e+00 : f32
    %460 = vector.broadcast %cst_275 : f32 to vector<4x324xf32>
    %461 = arith.maximumf %459, %460 : vector<4x324xf32>
    %462 = vector.broadcast %7 : vector<1x324xf32> to vector<4x324xf32>
    %463 = arith.mulf %461, %462 : vector<4x324xf32>
    %c0_276 = arith.constant 0 : index
    %c0_277 = arith.constant 0 : index
    %c0_278 = arith.constant 0 : index
    %464 = vector.load %arg20[%c0_276, %c0_277, %c0_278] : memref<9x4x4xf32, #tpu.memory_space<vmem>>, vector<1x4x4xf32>
    %465 = vector.shape_cast %464 : vector<1x4x4xf32> to vector<4x4xf32>
    %466 = vector.extract_strided_slice %463 {offsets = [0, 305], sizes = [4, 19], strides = [1, 1]} : vector<4x324xf32> to vector<4x19xf32>
    %467 = vector.extract_strided_slice %463 {offsets = [0, 0], sizes = [4, 305], strides = [1, 1]} : vector<4x324xf32> to vector<4x305xf32>
    %468 = tpu.concatenate %466, %467 in 1 : vector<4x19xf32>, vector<4x305xf32> -> vector<4x324xf32>
    %cst_279 = arith.constant dense<0.000000e+00> : vector<4x324xf32>
    %469 = tpu.matmul %465, %468, %cst_279 {dimension_numbers = #tpu.dot_dimension_numbers<[1], [0], [0], [1], [0, 0, 1, 1], [], []>} : vector<4x4xf32>, vector<4x324xf32>, vector<4x324xf32> -> vector<4x324xf32>
    %c1_280 = arith.constant 1 : index
    %c0_281 = arith.constant 0 : index
    %c0_282 = arith.constant 0 : index
    %470 = vector.load %arg20[%c1_280, %c0_281, %c0_282] : memref<9x4x4xf32, #tpu.memory_space<vmem>>, vector<1x4x4xf32>
    %471 = vector.shape_cast %470 : vector<1x4x4xf32> to vector<4x4xf32>
    %472 = vector.extract_strided_slice %463 {offsets = [0, 306], sizes = [4, 18], strides = [1, 1]} : vector<4x324xf32> to vector<4x18xf32>
    %473 = vector.extract_strided_slice %463 {offsets = [0, 0], sizes = [4, 306], strides = [1, 1]} : vector<4x324xf32> to vector<4x306xf32>
    %474 = tpu.concatenate %472, %473 in 1 : vector<4x18xf32>, vector<4x306xf32> -> vector<4x324xf32>
    %cst_283 = arith.constant dense<0.000000e+00> : vector<4x324xf32>
    %475 = tpu.matmul %471, %474, %cst_283 {dimension_numbers = #tpu.dot_dimension_numbers<[1], [0], [0], [1], [0, 0, 1, 1], [], []>} : vector<4x4xf32>, vector<4x324xf32>, vector<4x324xf32> -> vector<4x324xf32>
    %476 = arith.addf %469, %475 : vector<4x324xf32>
    %c2_284 = arith.constant 2 : index
    %c0_285 = arith.constant 0 : index
    %c0_286 = arith.constant 0 : index
    %477 = vector.load %arg20[%c2_284, %c0_285, %c0_286] : memref<9x4x4xf32, #tpu.memory_space<vmem>>, vector<1x4x4xf32>
    %478 = vector.shape_cast %477 : vector<1x4x4xf32> to vector<4x4xf32>
    %479 = vector.extract_strided_slice %463 {offsets = [0, 307], sizes = [4, 17], strides = [1, 1]} : vector<4x324xf32> to vector<4x17xf32>
    %480 = vector.extract_strided_slice %463 {offsets = [0, 0], sizes = [4, 307], strides = [1, 1]} : vector<4x324xf32> to vector<4x307xf32>
    %481 = tpu.concatenate %479, %480 in 1 : vector<4x17xf32>, vector<4x307xf32> -> vector<4x324xf32>
    %cst_287 = arith.constant dense<0.000000e+00> : vector<4x324xf32>
    %482 = tpu.matmul %478, %481, %cst_287 {dimension_numbers = #tpu.dot_dimension_numbers<[1], [0], [0], [1], [0, 0, 1, 1], [], []>} : vector<4x4xf32>, vector<4x324xf32>, vector<4x324xf32> -> vector<4x324xf32>
    %483 = arith.addf %476, %482 : vector<4x324xf32>
    %c3_288 = arith.constant 3 : index
    %c0_289 = arith.constant 0 : index
    %c0_290 = arith.constant 0 : index
    %484 = vector.load %arg20[%c3_288, %c0_289, %c0_290] : memref<9x4x4xf32, #tpu.memory_space<vmem>>, vector<1x4x4xf32>
    %485 = vector.shape_cast %484 : vector<1x4x4xf32> to vector<4x4xf32>
    %486 = vector.extract_strided_slice %463 {offsets = [0, 323], sizes = [4, 1], strides = [1, 1]} : vector<4x324xf32> to vector<4x1xf32>
    %487 = vector.extract_strided_slice %463 {offsets = [0, 0], sizes = [4, 323], strides = [1, 1]} : vector<4x324xf32> to vector<4x323xf32>
    %488 = tpu.concatenate %486, %487 in 1 : vector<4x1xf32>, vector<4x323xf32> -> vector<4x324xf32>
    %cst_291 = arith.constant dense<0.000000e+00> : vector<4x324xf32>
    %489 = tpu.matmul %485, %488, %cst_291 {dimension_numbers = #tpu.dot_dimension_numbers<[1], [0], [0], [1], [0, 0, 1, 1], [], []>} : vector<4x4xf32>, vector<4x324xf32>, vector<4x324xf32> -> vector<4x324xf32>
    %490 = arith.addf %483, %489 : vector<4x324xf32>
    %c4_292 = arith.constant 4 : index
    %c0_293 = arith.constant 0 : index
    %c0_294 = arith.constant 0 : index
    %491 = vector.load %arg20[%c4_292, %c0_293, %c0_294] : memref<9x4x4xf32, #tpu.memory_space<vmem>>, vector<1x4x4xf32>
    %492 = vector.shape_cast %491 : vector<1x4x4xf32> to vector<4x4xf32>
    %cst_295 = arith.constant dense<0.000000e+00> : vector<4x324xf32>
    %493 = tpu.matmul %492, %463, %cst_295 {dimension_numbers = #tpu.dot_dimension_numbers<[1], [0], [0], [1], [0, 0, 1, 1], [], []>} : vector<4x4xf32>, vector<4x324xf32>, vector<4x324xf32> -> vector<4x324xf32>
    %494 = arith.addf %490, %493 : vector<4x324xf32>
    %c5_296 = arith.constant 5 : index
    %c0_297 = arith.constant 0 : index
    %c0_298 = arith.constant 0 : index
    %495 = vector.load %arg20[%c5_296, %c0_297, %c0_298] : memref<9x4x4xf32, #tpu.memory_space<vmem>>, vector<1x4x4xf32>
    %496 = vector.shape_cast %495 : vector<1x4x4xf32> to vector<4x4xf32>
    %497 = vector.extract_strided_slice %463 {offsets = [0, 1], sizes = [4, 323], strides = [1, 1]} : vector<4x324xf32> to vector<4x323xf32>
    %498 = vector.extract_strided_slice %463 {offsets = [0, 0], sizes = [4, 1], strides = [1, 1]} : vector<4x324xf32> to vector<4x1xf32>
    %499 = tpu.concatenate %497, %498 in 1 : vector<4x323xf32>, vector<4x1xf32> -> vector<4x324xf32>
    %cst_299 = arith.constant dense<0.000000e+00> : vector<4x324xf32>
    %500 = tpu.matmul %496, %499, %cst_299 {dimension_numbers = #tpu.dot_dimension_numbers<[1], [0], [0], [1], [0, 0, 1, 1], [], []>} : vector<4x4xf32>, vector<4x324xf32>, vector<4x324xf32> -> vector<4x324xf32>
    %501 = arith.addf %494, %500 : vector<4x324xf32>
    %c6_300 = arith.constant 6 : index
    %c0_301 = arith.constant 0 : index
    %c0_302 = arith.constant 0 : index
    %502 = vector.load %arg20[%c6_300, %c0_301, %c0_302] : memref<9x4x4xf32, #tpu.memory_space<vmem>>, vector<1x4x4xf32>
    %503 = vector.shape_cast %502 : vector<1x4x4xf32> to vector<4x4xf32>
    %504 = vector.extract_strided_slice %463 {offsets = [0, 17], sizes = [4, 307], strides = [1, 1]} : vector<4x324xf32> to vector<4x307xf32>
    %505 = vector.extract_strided_slice %463 {offsets = [0, 0], sizes = [4, 17], strides = [1, 1]} : vector<4x324xf32> to vector<4x17xf32>
    %506 = tpu.concatenate %504, %505 in 1 : vector<4x307xf32>, vector<4x17xf32> -> vector<4x324xf32>
    %cst_303 = arith.constant dense<0.000000e+00> : vector<4x324xf32>
    %507 = tpu.matmul %503, %506, %cst_303 {dimension_numbers = #tpu.dot_dimension_numbers<[1], [0], [0], [1], [0, 0, 1, 1], [], []>} : vector<4x4xf32>, vector<4x324xf32>, vector<4x324xf32> -> vector<4x324xf32>
    %508 = arith.addf %501, %507 : vector<4x324xf32>
    %c7_304 = arith.constant 7 : index
    %c0_305 = arith.constant 0 : index
    %c0_306 = arith.constant 0 : index
    %509 = vector.load %arg20[%c7_304, %c0_305, %c0_306] : memref<9x4x4xf32, #tpu.memory_space<vmem>>, vector<1x4x4xf32>
    %510 = vector.shape_cast %509 : vector<1x4x4xf32> to vector<4x4xf32>
    %511 = vector.extract_strided_slice %463 {offsets = [0, 18], sizes = [4, 306], strides = [1, 1]} : vector<4x324xf32> to vector<4x306xf32>
    %512 = vector.extract_strided_slice %463 {offsets = [0, 0], sizes = [4, 18], strides = [1, 1]} : vector<4x324xf32> to vector<4x18xf32>
    %513 = tpu.concatenate %511, %512 in 1 : vector<4x306xf32>, vector<4x18xf32> -> vector<4x324xf32>
    %cst_307 = arith.constant dense<0.000000e+00> : vector<4x324xf32>
    %514 = tpu.matmul %510, %513, %cst_307 {dimension_numbers = #tpu.dot_dimension_numbers<[1], [0], [0], [1], [0, 0, 1, 1], [], []>} : vector<4x4xf32>, vector<4x324xf32>, vector<4x324xf32> -> vector<4x324xf32>
    %515 = arith.addf %508, %514 : vector<4x324xf32>
    %c8_308 = arith.constant 8 : index
    %c0_309 = arith.constant 0 : index
    %c0_310 = arith.constant 0 : index
    %516 = vector.load %arg20[%c8_308, %c0_309, %c0_310] : memref<9x4x4xf32, #tpu.memory_space<vmem>>, vector<1x4x4xf32>
    %517 = vector.shape_cast %516 : vector<1x4x4xf32> to vector<4x4xf32>
    %518 = vector.extract_strided_slice %463 {offsets = [0, 19], sizes = [4, 305], strides = [1, 1]} : vector<4x324xf32> to vector<4x305xf32>
    %519 = vector.extract_strided_slice %463 {offsets = [0, 0], sizes = [4, 19], strides = [1, 1]} : vector<4x324xf32> to vector<4x19xf32>
    %520 = tpu.concatenate %518, %519 in 1 : vector<4x305xf32>, vector<4x19xf32> -> vector<4x324xf32>
    %cst_311 = arith.constant dense<0.000000e+00> : vector<4x324xf32>
    %521 = tpu.matmul %517, %520, %cst_311 {dimension_numbers = #tpu.dot_dimension_numbers<[1], [0], [0], [1], [0, 0, 1, 1], [], []>} : vector<4x4xf32>, vector<4x324xf32>, vector<4x324xf32> -> vector<4x324xf32>
    %522 = arith.addf %515, %521 : vector<4x324xf32>
    %c0_312 = arith.constant 0 : index
    %c0_313 = arith.constant 0 : index
    %523 = vector.load %arg21[%c0_312, %c0_313] : memref<4x1xf32, #tpu.memory_space<vmem>>, vector<4x1xf32>
    %524 = vector.broadcast %523 : vector<4x1xf32> to vector<4x324xf32>
    %525 = arith.addf %522, %524 : vector<4x324xf32>
    %526 = math.tanh %525 : vector<4x324xf32>
    %c0_314 = arith.constant 0 : index
    %c0_315 = arith.constant 0 : index
    %c0_316 = arith.constant 0 : index
    %527 = vector.load %arg22[%c0_314, %c0_315, %c0_316] : memref<1x4x324xf32, #tpu.memory_space<vmem>>, vector<1x4x324xf32>
    %528 = vector.shape_cast %527 : vector<1x4x324xf32> to vector<4x324xf32>
    %529 = vector.shape_cast %526 : vector<4x324xf32> to vector<1x4x324xf32>
    tpu.vector_store %arg22[%c0_314, %c0_315, %c0_316], %529 {strides = array<i32>} : memref<1x4x324xf32, #tpu.memory_space<vmem>>, vector<1x4x324xf32>,
    return
  }
  func.func @transform_0(%arg0: i32) -> (i32, i32, i32) {
    %c0_i32 = arith.constant 0 : i32
    %c0_i32_0 = arith.constant 0 : i32
    %c0_i32_1 = arith.constant 0 : i32
    return %arg0, %c0_i32, %c0_i32_0 : i32, i32, i32
  }
  func.func @transform_1(%arg0: i32) -> (i32, i32, i32) {
    %c0_i32 = arith.constant 0 : i32
    %c0_i32_0 = arith.constant 0 : i32
    %c0_i32_1 = arith.constant 0 : i32
    return %arg0, %c0_i32, %c0_i32_0 : i32, i32, i32
  }
  func.func @transform_2(%arg0: i32) -> (i32, i32, i32) {
    %c0_i32 = arith.constant 0 : i32
    %c0_i32_0 = arith.constant 0 : i32
    %c0_i32_1 = arith.constant 0 : i32
    return %arg0, %c0_i32, %c0_i32_0 : i32, i32, i32
  }
  func.func @transform_3(%arg0: i32) -> (i32, i32) {
    %c0_i32 = arith.constant 0 : i32
    %c0_i32_0 = arith.constant 0 : i32
    %c0_i32_1 = arith.constant 0 : i32
    return %c0_i32, %c0_i32_0 : i32, i32
  }
  func.func @transform_4(%arg0: i32) -> (i32, i32) {
    %c0_i32 = arith.constant 0 : i32
    %c0_i32_0 = arith.constant 0 : i32
    %c0_i32_1 = arith.constant 0 : i32
    return %c0_i32, %c0_i32_0 : i32, i32
  }
  func.func @transform_5(%arg0: i32) -> (i32, i32) {
    %c0_i32 = arith.constant 0 : i32
    %c0_i32_0 = arith.constant 0 : i32
    %c0_i32_1 = arith.constant 0 : i32
    return %c0_i32, %c0_i32_0 : i32, i32
  }
  func.func @transform_6(%arg0: i32) -> (i32, i32) {
    %c0_i32 = arith.constant 0 : i32
    %c0_i32_0 = arith.constant 0 : i32
    %c0_i32_1 = arith.constant 0 : i32
    return %c0_i32, %c0_i32_0 : i32, i32
  }
  func.func @transform_7(%arg0: i32) -> (i32, i32, i32) {
    %c0_i32 = arith.constant 0 : i32
    %c0_i32_0 = arith.constant 0 : i32
    %c0_i32_1 = arith.constant 0 : i32
    %c0_i32_2 = arith.constant 0 : i32
    return %c0_i32, %c0_i32_0, %c0_i32_1 : i32, i32, i32
  }
  func.func @transform_8(%arg0: i32) -> (i32, i32, i32) {
    %c0_i32 = arith.constant 0 : i32
    %c0_i32_0 = arith.constant 0 : i32
    %c0_i32_1 = arith.constant 0 : i32
    %c0_i32_2 = arith.constant 0 : i32
    return %c0_i32, %c0_i32_0, %c0_i32_1 : i32, i32, i32
  }
  func.func @transform_9(%arg0: i32) -> (i32, i32) {
    %c0_i32 = arith.constant 0 : i32
    %c0_i32_0 = arith.constant 0 : i32
    %c0_i32_1 = arith.constant 0 : i32
    return %c0_i32, %c0_i32_0 : i32, i32
  }
  func.func @transform_10(%arg0: i32) -> (i32, i32, i32) {
    %c0_i32 = arith.constant 0 : i32
    %c0_i32_0 = arith.constant 0 : i32
    %c0_i32_1 = arith.constant 0 : i32
    %c0_i32_2 = arith.constant 0 : i32
    return %c0_i32, %c0_i32_0, %c0_i32_1 : i32, i32, i32
  }
  func.func @transform_11(%arg0: i32) -> (i32, i32) {
    %c0_i32 = arith.constant 0 : i32
    %c0_i32_0 = arith.constant 0 : i32
    %c0_i32_1 = arith.constant 0 : i32
    return %c0_i32, %c0_i32_0 : i32, i32
  }
  func.func @transform_12(%arg0: i32) -> (i32, i32, i32) {
    %c0_i32 = arith.constant 0 : i32
    %c0_i32_0 = arith.constant 0 : i32
    %c0_i32_1 = arith.constant 0 : i32
    %c0_i32_2 = arith.constant 0 : i32
    return %c0_i32, %c0_i32_0, %c0_i32_1 : i32, i32, i32
  }
  func.func @transform_13(%arg0: i32) -> (i32, i32, i32) {
    %c0_i32 = arith.constant 0 : i32
    %c0_i32_0 = arith.constant 0 : i32
    %c0_i32_1 = arith.constant 0 : i32
    %c0_i32_2 = arith.constant 0 : i32
    return %c0_i32, %c0_i32_0, %c0_i32_1 : i32, i32, i32
  }
  func.func @transform_14(%arg0: i32) -> (i32, i32) {
    %c0_i32 = arith.constant 0 : i32
    %c0_i32_0 = arith.constant 0 : i32
    %c0_i32_1 = arith.constant 0 : i32
    return %c0_i32, %c0_i32_0 : i32, i32
  }
  func.func @transform_15(%arg0: i32) -> (i32, i32, i32) {
    %c0_i32 = arith.constant 0 : i32
    %c0_i32_0 = arith.constant 0 : i32
    %c0_i32_1 = arith.constant 0 : i32
    %c0_i32_2 = arith.constant 0 : i32
    return %c0_i32, %c0_i32_0, %c0_i32_1 : i32, i32, i32
  }
  func.func @transform_16(%arg0: i32) -> (i32, i32) {
    %c0_i32 = arith.constant 0 : i32
    %c0_i32_0 = arith.constant 0 : i32
    %c0_i32_1 = arith.constant 0 : i32
    return %c0_i32, %c0_i32_0 : i32, i32
  }
  func.func @transform_17(%arg0: i32) -> (i32, i32, i32) {
    %c0_i32 = arith.constant 0 : i32
    %c0_i32_0 = arith.constant 0 : i32
    %c0_i32_1 = arith.constant 0 : i32
    %c0_i32_2 = arith.constant 0 : i32
    return %c0_i32, %c0_i32_0, %c0_i32_1 : i32, i32, i32
  }
  func.func @transform_18(%arg0: i32) -> (i32, i32) {
    %c0_i32 = arith.constant 0 : i32
    %c0_i32_0 = arith.constant 0 : i32
    %c0_i32_1 = arith.constant 0 : i32
    return %c0_i32, %c0_i32_0 : i32, i32
  }
  func.func @transform_19(%arg0: i32) -> (i32, i32, i32) {
    %c0_i32 = arith.constant 0 : i32
    %c0_i32_0 = arith.constant 0 : i32
    %c0_i32_1 = arith.constant 0 : i32
    %c0_i32_2 = arith.constant 0 : i32
    return %c0_i32, %c0_i32_0, %c0_i32_1 : i32, i32, i32
  }
  func.func @transform_20(%arg0: i32) -> (i32, i32) {
    %c0_i32 = arith.constant 0 : i32
    %c0_i32_0 = arith.constant 0 : i32
    %c0_i32_1 = arith.constant 0 : i32
    return %c0_i32, %c0_i32_0 : i32, i32
  }
  func.func @transform_21(%arg0: i32) -> (i32, i32, i32) {
    %c0_i32 = arith.constant 0 : i32
    %c0_i32_0 = arith.constant 0 : i32
    %c0_i32_1 = arith.constant 0 : i32
    return %arg0, %c0_i32, %c0_i32_0 : i32, i32, i32
  }
}

</mosaic_0001>

<bundles_post_ra>
// kernel: decoder_pallas_forward.1
= control target key start
LH: loop header
LB: loop body
LE: loop exit
PB: predicated region body
PF: predicated region fallthrough
CT: control target
= control target key end

     0   :  { %s15352_s0 = inlined_call_operand.vmem [shape: f32[2,32,16], index: 0, kind: input, shape index: {}]   ;;  %s15353_s1 = inlined_call_operand.vmem [shape: f32[2,16,100], index: 1, kind: input, shape index: {}]   ;;  %s15354_s2 = inlined_call_operand.vmem [shape: f32[2,8,324], index: 2, kind: input, shape index: {}]   ;;  %s15355_s3 = inlined_call_operand.vmem [shape: f32[16,100], index: 3, kind: input, shape index: {}]   ;;  %s15356_s4 = inlined_call_operand.vmem [shape: f32[100,324], index: 4, kind: input, shape index: {}]   ;;  %s15357_s5 = inlined_call_operand.vmem [shape: f32[1,100], index: 5, kind: input, shape index: {}]   ;;  %s15358_s6 = inlined_call_operand.vmem [shape: f32[1,324], index: 6, kind: input, shape index: {}]   ;;  %s15359_s7 = inlined_call_operand.vmem [shape: f32[9,16,32], index: 7, kind: input, shape index: {}]   ;;  %s15360_s8 = inlined_call_operand.vmem [shape: f32[9,16,16], index: 8, kind: input, shape index: {}]   ;;  %s15361_s9 = inlined_call_operand.vmem [shape: f32[16,1], index: 9, kind: input, shape index: {}]   ;;  %s15362_s10 = inlined_call_operand.vmem [shape: f32[9,16,16], index: 10, kind: input, shape index: {}]   ;;  %s15363_s11 = inlined_call_operand.vmem [shape: f32[16,1], index: 11, kind: input, shape index: {}]   ;;  %s15364_s12 = inlined_call_operand.vmem [shape: f32[9,8,16], index: 12, kind: input, shape index: {}]   ;;  %s15365_s13 = inlined_call_operand.vmem [shape: f32[9,8,8], index: 13, kind: input, shape index: {}]   ;;  %s15366_s14 = inlined_call_operand.vmem [shape: f32[8,1], index: 14, kind: input, shape index: {}]   ;;  %s15367_s15 = inlined_call_operand.vmem [shape: f32[9,8,8], index: 15, kind: input, shape index: {}]   ;;  %s15368_s16 = inlined_call_operand.vmem [shape: f32[8,1], index: 16, kind: input, shape index: {}]   ;;  %s15369_s17 = inlined_call_operand.vmem [shape: f32[9,4,8], index: 17, kind: input, shape index: {}]   ;;  %s15370_s18 = inlined_call_operand.vmem [shape: f32[4,1], index: 18, kind: input, shape index: {}]   ;;  %s15371_s19 = inlined_call_operand.vmem [shape: f32[9,4,4], index: 19, kind: input, shape index: {}]   ;;  %s15372_s20 = inlined_call_operand.vmem [shape: f32[4,1], index: 20, kind: input, shape index: {}]   ;;  %s15373_s21 = inlined_call_operand.vmem [shape: f32[2,4,324], index: 21, kind: output, shape index: {}]  }
   0x1   :  { %15421 = sst [smem:[#allocation2_spill]] %s15352_s0 }
   0x2   :  { %15422 = sst [smem:[#allocation3_spill]] %s15353_s1 }
   0x3   :  { %15423 = sst [smem:[#allocation4_spill]] %s15354_s2  ;;  %s13585_s2 = smov 0  }
   0x4   :  { %15424 = sst [smem:[#allocation5_spill]] %s15355_s3 }
   0x5   :  { %15425 = sst [smem:[#allocation6_spill]] %s15356_s4 }
   0x6   :  { %15426 = sst [smem:[#allocation7_spill]] %s15357_s5 }
   0x7   :  { %15427 = sst [smem:[#allocation8_spill]] %s15358_s6 }
   0x8   :  { %15428 = sst [smem:[#allocation9_spill]] %s15359_s7 }
   0x9   :  { %15429 = sst [smem:[#allocation10_spill]] %s15360_s8 }
   0xa   :  { %15430 = sst [smem:[#allocation11_spill]] %s15361_s9 }
   0xb   :  { %15431 = sst [smem:[#allocation12_spill]] %s15362_s10 }
   0xc   :  { %15432 = sst [smem:[#allocation13_spill]] %s15363_s11 }
   0xd   :  { %15433 = sst [smem:[#allocation14_spill]] %s15364_s12 }
   0xe   :  { %15434 = sst [smem:[#allocation15_spill]] %s15365_s13 }
   0xf LB: > { %s11471_s25 = sadd.s32 4294967295, %s13439_s2   ;;  %p11475_p0 = scmp.ge.s32.totalorder %s13439_s2, 1  ;;  %s13439_s2 = sphi %s13585_s2, %s31_s2  }
  0x10   : > { %p607_p1 = scmp.lt.s32.totalorder %s13439_s2, 3 }
  0x12   : > { %p608_p2 = pnand %p11475_p0, %p607_p1 }
  0x13   : > { %s15435_s3 = sld [smem:[#allocation5_spill]] (!%p608_p2)  ;;  %p677_p3 = scmp.lt.s32.totalorder (!%p608_p2), %s11471_s25, 1  ;;  %vm710_vm0 = vcmask (!%p608_p2), 130048   ;;  %vm838_vm1 = vcmask (!%p608_p2), 89088   ;;  %vm942_vm2 = vcmask (!%p608_p2), 261120   ;;  %vm1051_vm3 = vcmask (!%p608_p2), 80896  }
  0x14   : > { %611 = sbr.rel (%p608_p2) target bundleno = 3064 (0xbf8), region = 104  ;;  %s15436_s22 = sld [smem:[#allocation2_spill]] (!%p608_p2)  ;;  %vm1266_vm4 = vcmask (!%p608_p2), 72704   ;;  %vm1481_vm5 = vcmask (!%p608_p2), 7168   ;;  %vm1868_vm6 = vcmask (!%p608_p2), 809984   ;;  %vm2083_vm7 = vcmask (!%p608_p2), 744448  }
  0x15   : > { %s15437_s26 = sld [smem:[#allocation3_spill]] (!%p608_p2)  ;;  %s13441_s28 = smov (!%p608_p2), 39   ;;  %vm2298_vm8 = vcmask (!%p608_p2), 736256   ;;  %vm2513_vm9 = vcmask (!%p608_p2), 728064   ;;  %vm15418_vm10 = vcmask (!%p608_p2), 1043456   ;;  %vm3667_vm13 = vcmask (!%p608_p2), 818176  }
  0x16   : > { %s13442_s29 = smov (!%p608_p2), 11   ;;  %s15438_s8 = sld [smem:[#allocation10_spill]] (!%p608_p2)  ;;  %vm3861_vm14 = vcmask (!%p608_p2), 154624   ;;  %vm3893_vm15 = vcmask (!%p608_p2), 64512  }
  0x17   : > { %s15439_s7 = sld [smem:[#allocation9_spill]] (!%p608_p2)  ;;  %s13443_s1 = smov (!%p608_p2), 38  }
  0x18   : > { %s13444_s24 = smov (!%p608_p2), 10   ;;  %s15376_s30 = smov (!%p608_p2), 127  }
  0x19   : > { %v708_v0 = vld [vmem:[%s15435_s3] sm:$0xff] (!%p608_p2)  ;;  %v709_v1 = vld [vmem:[%s15435_s3 + $0x8] sm:$0xff] (!%p608_p2)  ;;  %s15378_s5 = smov (!%p608_p2), 99   ;;  %s15440_s9 = sld [smem:[#allocation11_spill]] (!%p608_p2) }
  0x1a   : > { %v12510_v2 = vpack.c.bf16 (!%p608_p2), %v709_v1, %v708_v0  ;;  %s15442_s10 = sld [smem:[#allocation12_spill]] (!%p608_p2)  ;;  %s15454_s11 = sld [smem:[#allocation13_spill]] (!%p608_p2) }
  0x1b   : > { %s15502_s25 = smov (!%p677_p3, %s11471_s25), 1  ;;  %s15457_s13 = sld [smem:[#allocation15_spill]] }
  0x1c   : > { %12511 = vmatprep.subr.bf16.mxu0 %v12510_v2  ;;  %s11755_s0 = sshll.u32 %s15502_s25, 5  ;;  %s11756_s4 = sshll.u32 %s15502_s25, 4  ;;  %v843_v19 = vld [vmem:[%s15438_s8] sm:$0xff]  ;;  %v844_v20 = vld [vmem:[%s15438_s8 + $0x8] sm:$0xff] }
  0x1d   : > { %12513 = vmatpush3.bf16.msra.mxu0 %v12510_v2  ;;  %s681_s23 = scalar_lea.vmem %s15436_s22, %s11755_s0  ;;  %s686_s27 = scalar_lea.vmem %s15437_s26, %s11756_s4  ;;  %12017 = vmatprep.mubr.msk.f32.mxu1 %vm710_vm0, %v843_v19  ;;  %v808_v27 = vld [vmem:[%s15439_s7] sm:$0xff]  ;;  %v809_v55 = vld [vmem:[%s15439_s7 + $0x8] sm:$0xff]  ;;  %v11490_v61 = vld [vmem:[%s15439_s7 + $0x10] sm:$0xff] }
  0x1e   : > { %v697_v3 = vld [vmem:[%s681_s23] sm:$0xff]  ;;  %v13611_v5 = vld [vmem:[%s686_s27 + $0x8] sm:$0xff]  ;;  %v699_v7 = vld [vmem:[%s681_s23 + $0x10] sm:$0xff]  ;;  %s15388_s26 = smov 37   ;;  %s15385_s0 = smov 29  }
  0x1f   : > { %v13609_v4 = vld [vmem:[%s686_s27] sm:$0xff]  ;;  %12007 = vmatprep.mubr.msk.f32.mxu0 %vm710_vm0, %v697_v3  ;;  %v698_v6 = vld [vmem:[%s681_s23 + $0x8] sm:$0xff]  ;;  %v700_v9 = vld [vmem:[%s681_s23 + $0x18] sm:$0xff]  ;;  %s13446_s27 = smov 9   ;;  %s15386_s4 = smov 1  }
  0x20   : > { %v13616_v8 = vpack.i.bf16 %v13611_v5, %v13609_v4  ;;  %12008 = vmatmul.mubr.msk.f32.vlgmr.msra.gmra.mrb[0].mxu0 %vm710_vm0, %v698_v6  ;;  %s15379_s22 = smov 119   ;;  %s15380_s23 = smov 91   ;;  %v2702_v2 = vld [vmem:[%s15440_s9 + $0x8] sm:$0xff]  ;;  %v2701_v3 = vld [vmem:[%s15440_s9] sm:$0xff] }
  0x21   : > { %12010 = vmatprep.mubr.msk.f32.mxu0 %vm710_vm0, %v699_v7  ;;  %s15458_s12 = sld [smem:[#allocation14_spill]]  ;;  %s15459_s6 = sld [smem:[#allocation8_spill]] }
  0x22   : > { %12946 = vrot.lane.b32.xlu0 %v13616_v8, %s13441_s28  ;;  %s15473_s9 = smov 77  }
  0x24   : > { %12011 = vmatmul.mubr.msk.f32.gmra.mrb[2].mxu0 %vm710_vm0, %v700_v9 }
  0x26   : > { %12951 = vrot.lane.b32.xlu0 %v13616_v8, %s13442_s29 }
  0x94   : > { %v12947_v10 = vpop.permute.xlu0 %12946 }
  0x95   : > { %v12949_v12 = vunpack.i.h.bf16 %v12947_v10  ;;  %v12948_v13 = vunpack.i.l.bf16 %v12947_v10 }
  0x98   : > { %v12952_v11 = vpop.permute.xlu0 %12951 }
  0x99   : > { %v12954_v14 = vunpack.i.h.bf16 %v12952_v11  ;;  %v12953_v15 = vunpack.i.l.bf16 %v12952_v11 }
  0x9b   : > { %v859_v16 = vsel %vm838_vm1, %v12948_v13, %v12953_v15  ;;  %v860_v17 = vsel %vm838_vm1, %v12949_v12, %v12954_v14  ;;  %v13457_v13 = vmov 0  }
  0x9c   : > { %v12514_v18 = vpack.c.bf16 %v860_v17, %v859_v16  ;;  %13186 = vset.pattern.permute.xlu1 %v13457_v13  ;;  %13185 = vset.pattern.permute.xlu0 %v13457_v13  ;;  %v11491_v16 = vld [vmem:[%s15439_s7 + $0x18] sm:$0xff] }
  0x9e   : > { %12515 = vmatprep.subr.bf16.mxu1 %v12514_v18 }
  0x9f   : > { %12517 = vmatpush3.bf16.msra.mxu1 %v12514_v18 }
  0xa2   : > { %12018 = vmatmul.mubr.msk.f32.vlgmr.msra.gmra.mrb[0].mxu1 %vm710_vm0, %v844_v20 }
  0xa3   : > { %12028 = vmatprep.mubr.msk.f32.mxu1 %vm942_vm2, %v808_v27 }
  0xf3   : > { %v12009_v21 = vpop.f32.mrb[0].mxu0 }
  0xf4   : > { %v789_v22 = vpop.f32.mrb[1].mxu0 }
  0xf5   : > { %v13635_v23 = vpack.i.bf16 %v12009_v21, %v789_v22  ;;  %v13646_v28 = vpack.c.bf16 %v12009_v21, %v789_v22  ;;  %v11494_v22 = vld [vmem:[%s15438_s8 + $0x10] sm:$0xff] }
  0xf7   : > { %12956 = vrot.lane.b32.xlu1 %v13635_v23, %s13441_s28  ;;  %v12012_v24 = vpop.f32.mrb[2].mxu0 }
  0xf8   : > { %v799_v25 = vpop.f32.mrb[3].mxu0 }
  0xf9   : > { %v12965_v26 = vpack.i.bf16 %v12012_v24, %v799_v25  ;;  %v13648_v29 = vpack.c.bf16 %v12012_v24, %v799_v25 }
  0xfb   : > { %12961 = vrot.lane.b32.xlu1 %v13635_v23, %s13442_s29  ;;  %12966 = vrot.lane.b32.xlu0 %v12965_v26, %s13441_s28 }
  0xff   : > { %12976 = vrot.lane.b32.xlu1 %v12965_v26, %s13442_s29  ;;  %12971 = vrot.lane.b32.xlu0 %v13635_v23, %s13443_s1 }
 0x103   : > { %12981 = vrot.lane.b32.xlu1 %v13635_v23, %s13444_s24  ;;  %12986 = vrot.lane.b32.xlu0 %v12965_v26, %s13443_s1 }
 0x107   : > { %12991 = vrot.lane.b32.xlu1 %v12965_v26, %s13444_s24  ;;  %12996 = vrot.lane.b32.xlu0 %v13616_v8, %s13443_s1 }
 0x10b   : > { %13001 = vrot.lane.b32.xlu1 %v13616_v8, %s13444_s24  ;;  %13006 = vrot.lane.b32.xlu0 %v13635_v23, %s15388_s26 }
 0x10f   : > { %13011 = vrot.lane.b32.xlu1 %v13635_v23, %s13446_s27  ;;  %13016 = vrot.lane.b32.xlu0 %v12965_v26, %s15388_s26 }
 0x113   : > { %13021 = vrot.lane.b32.xlu1 %v12965_v26, %s13446_s27  ;;  %13026 = vrot.lane.b32.xlu0 %v13616_v8, %s15388_s26  ;;  %s15441_s26 = sld [smem:[#allocation7_spill]] }
 0x117   : > { %13031 = vrot.lane.b32.xlu1 %v13616_v8, %s13446_s27  ;;  %13036 = vrot.lane.b32.xlu0 %v13635_v23, %s15385_s0 }
 0x11b   : > { %13041 = vrot.lane.b32.xlu1 %v13635_v23, %s15386_s4  ;;  %13046 = vrot.lane.b32.xlu0 %v12965_v26, %s15385_s0 }
 0x11f   : > { %13051 = vrot.lane.b32.xlu1 %v12965_v26, %s15386_s4  ;;  %13056 = vrot.lane.b32.xlu0 %v13616_v8, %s15385_s0  ;;  %s15444_s0 = smov 1  }
 0x123   : > { %13061 = vrot.lane.b32.xlu1 %v13616_v8, %s15386_s4  ;;  %13066 = vrot.lane.b32.xlu0 %v13635_v23, %s15376_s30  ;;  %s15445_s4 = smov 29  }
 0x127   : > { %13071 = vrot.lane.b32.xlu1 %v13635_v23, %s15378_s5  ;;  %13076 = vrot.lane.b32.xlu0 %v12965_v26, %s15376_s30 }
 0x12b   : > { %13081 = vrot.lane.b32.xlu1 %v12965_v26, %s15378_s5  ;;  %13086 = vrot.lane.b32.xlu0 %v13616_v8, %s15376_s30  ;;  %s15383_s30 = smov 118  }
 0x12f   : > { %13091 = vrot.lane.b32.xlu1 %v13616_v8, %s15378_s5  ;;  %13096 = vrot.lane.b32.xlu0 %v13635_v23, %s15379_s22  ;;  %s15384_s5 = smov 90  }
 0x133   : > { %13101 = vrot.lane.b32.xlu1 %v13635_v23, %s15380_s23  ;;  %13106 = vrot.lane.b32.xlu0 %v12965_v26, %s15379_s22 }
 0x137   : > { %13111 = vrot.lane.b32.xlu1 %v12965_v26, %s15380_s23  ;;  %13116 = vrot.lane.b32.xlu0 %v13616_v8, %s15379_s22  ;;  %s15381_s22 = smov 117  }
 0x13b   : > { %13121 = vrot.lane.b32.xlu1 %v13616_v8, %s15380_s23  ;;  %13126 = vrot.lane.b32.xlu0 %v13635_v23, %s15383_s30  ;;  %s15382_s23 = smov 89  }
 0x13f   : > { %13131 = vrot.lane.b32.xlu1 %v13635_v23, %s15384_s5  ;;  %13136 = vrot.lane.b32.xlu0 %v12965_v26, %s15383_s30 }
 0x143   : > { %13141 = vrot.lane.b32.xlu1 %v12965_v26, %s15384_s5  ;;  %13146 = vrot.lane.b32.xlu0 %v13616_v8, %s15383_s30  ;;  %s15446_s30 = smov 99  }
 0x147   : > { %13151 = vrot.lane.b32.xlu1 %v13616_v8, %s15384_s5  ;;  %13156 = vrot.lane.b32.xlu0 %v13635_v23, %s15381_s22  ;;  %s15447_s5 = smov 127  }
 0x14b   : > { %13161 = vrot.lane.b32.xlu1 %v13635_v23, %s15382_s23  ;;  %13166 = vrot.lane.b32.xlu0 %v12965_v26, %s15381_s22 }
 0x14f   : > { %13171 = vrot.lane.b32.xlu1 %v12965_v26, %s15382_s23  ;;  %13176 = vrot.lane.b32.xlu0 %v13616_v8, %s15381_s22  ;;  %s15450_s22 = smov 90  }
 0x153   : > { %13181 = vrot.lane.b32.xlu1 %v13616_v8, %s15382_s23  ;;  %2705 = vperm.xlu0 %13185, %v2701_v3   ;;  %s15412_s23 = smov 19  }
 0x157   : > { %2710 = vperm.xlu1 %13186, %v2702_v2  }
 0x169   : > { %v12957_v30 = vpop.permute.xlu1 %12956 }
 0x16a   : > { %v12959_v33 = vunpack.i.h.bf16 %v12957_v30  ;;  %v12958_v34 = vunpack.i.l.bf16 %v12957_v30 }
 0x16d   : > { %v12962_v31 = vpop.permute.xlu1 %12961  ;;  %v12967_v32 = vpop.permute.xlu0 %12966 }
 0x16e   : > { %v12964_v35 = vunpack.i.h.bf16 %v12962_v31  ;;  %v12963_v36 = vunpack.i.l.bf16 %v12962_v31  ;;  %v12969_v37 = vunpack.i.h.bf16 %v12967_v32  ;;  %v12968_v38 = vunpack.i.l.bf16 %v12967_v32 }
 0x170   : > { %v839_v39 = vsel %vm838_vm1, %v12958_v34, %v12963_v36  ;;  %v840_v40 = vsel %vm838_vm1, %v12959_v33, %v12964_v35 }
 0x171   : > { %v12977_v41 = vpop.permute.xlu1 %12976  ;;  %v12972_v42 = vpop.permute.xlu0 %12971  ;;  %v12518_v43 = vpack.c.bf16 %v840_v40, %v839_v39  ;;  %v11495_v40 = vld [vmem:[%s15438_s8 + $0x18] sm:$0xff] }
 0x172   : > { %v12979_v44 = vunpack.i.h.bf16 %v12977_v41  ;;  %v12978_v45 = vunpack.i.l.bf16 %v12977_v41  ;;  %v12974_v51 = vunpack.i.h.bf16 %v12972_v42  ;;  %v12973_v52 = vunpack.i.l.bf16 %v12972_v42 }
 0x173   : > { %12519 = vmatprep.subr.bf16.mxu1 %v12518_v43 }
 0x174   : > { %12521 = vmatpush3.bf16.msra.mxu1 %v12518_v43  ;;  %v841_v46 = vsel %vm838_vm1, %v12968_v38, %v12978_v45  ;;  %v842_v47 = vsel %vm838_vm1, %v12969_v37, %v12979_v44 }
 0x175   : > { %v12982_v48 = vpop.permute.xlu1 %12981  ;;  %v12987_v49 = vpop.permute.xlu0 %12986  ;;  %v12522_v50 = vpack.c.bf16 %v842_v47, %v841_v46  ;;  %v11498_v46 = vld [vmem:[%s15439_s7 + $0x20] sm:$0xff] }
 0x176   : > { %v12984_v53 = vunpack.i.h.bf16 %v12982_v48  ;;  %v12983_v54 = vunpack.i.l.bf16 %v12982_v48  ;;  %v12989_v62 = vunpack.i.h.bf16 %v12987_v49  ;;  %v12988_v63 = vunpack.i.l.bf16 %v12987_v49 }
 0x177   : > { %12523 = vmatprep.subr.bf16.mxu1 %v12522_v50 }
 0x178   : > { %12525 = vmatpush3.bf16.msra.mxu1 %v12522_v50  ;;  %v1052_v56 = vsel %vm1051_vm3, %v12973_v52, %v12983_v54  ;;  %v1053_v57 = vsel %vm1051_vm3, %v12974_v51, %v12984_v53 }
 0x179   : > { %v12992_v58 = vpop.permute.xlu1 %12991  ;;  %v12997_v59 = vpop.permute.xlu0 %12996  ;;  %v12526_v60 = vpack.c.bf16 %v1053_v57, %v1052_v56 }
 0x17a   : > { %v12994_v0 = vunpack.i.h.bf16 %v12992_v58  ;;  %v12993_v1 = vunpack.i.l.bf16 %v12992_v58  ;;  %v12999_v6 = vunpack.i.h.bf16 %v12997_v59  ;;  %v12998_v7 = vunpack.i.l.bf16 %v12997_v59  ;;  %v11499_v58 = vld [vmem:[%s15439_s7 + $0x28] sm:$0xff] }
 0x17b   : > { %12029 = vmatmul.mubr.msk.f32.vlgmr.msra.gmra.mrb[0].mxu1 %vm942_vm2, %v809_v55  ;;  %12527 = vmatprep.subr.bf16.mxu1 %v12526_v60 }
 0x17c   : > { %12529 = vmatpush3.bf16.msra.mxu1 %v12526_v60  ;;  %v1054_v8 = vsel %vm1051_vm3, %v12988_v63, %v12993_v1  ;;  %v1055_v9 = vsel %vm1051_vm3, %v12989_v62, %v12994_v0  ;;  %12039 = vmatprep.mubr.msk.f32.mxu1 %vm942_vm2, %v11490_v61  ;;  %v11502_v63 = vld [vmem:[%s15438_s8 + $0x20] sm:$0xff] }
 0x17d   : > { %v13002_v10 = vpop.permute.xlu1 %13001  ;;  %v13007_v11 = vpop.permute.xlu0 %13006  ;;  %v12530_v12 = vpack.c.bf16 %v1055_v9, %v1054_v8 }
 0x17e   : > { %v13004_v14 = vunpack.i.h.bf16 %v13002_v10  ;;  %v13003_v15 = vunpack.i.l.bf16 %v13002_v10  ;;  %v13009_v23 = vunpack.i.h.bf16 %v13007_v11  ;;  %v13008_v24 = vunpack.i.l.bf16 %v13007_v11 }
 0x17f   : > { %12531 = vmatprep.subr.bf16.mxu1 %v12530_v12 }
 0x180   : > { %12533 = vmatpush3.bf16.msra.mxu1 %v12530_v12  ;;  %v1154_v17 = vsel %vm1051_vm3, %v12998_v7, %v13003_v15  ;;  %v1155_v18 = vsel %vm1051_vm3, %v12999_v6, %v13004_v14  ;;  %v11503_v12 = vld [vmem:[%s15438_s8 + $0x28] sm:$0xff]  ;;  %v11506_v15 = vld [vmem:[%s15439_s7 + $0x30] sm:$0xff] }
 0x181   : > { %v13012_v19 = vpop.permute.xlu1 %13011  ;;  %v13017_v20 = vpop.permute.xlu0 %13016  ;;  %v12534_v21 = vpack.c.bf16 %v1155_v18, %v1154_v17 }
 0x182   : > { %v13014_v25 = vunpack.i.h.bf16 %v13012_v19  ;;  %v13013_v26 = vunpack.i.l.bf16 %v13012_v19  ;;  %v13019_v34 = vunpack.i.h.bf16 %v13017_v20  ;;  %v13018_v35 = vunpack.i.l.bf16 %v13017_v20  ;;  %v11507_v20 = vld [vmem:[%s15439_s7 + $0x38] sm:$0xff] }
 0x183   : > { %12040 = vmatmul.mubr.msk.f32.vlgmr.msra.gmra.mrb[0].mxu1 %vm942_vm2, %v11491_v16  ;;  %12535 = vmatprep.subr.bf16.mxu1 %v12534_v21 }
 0x184   : > { %12537 = vmatpush3.bf16.msra.mxu1 %v12534_v21  ;;  %v1267_v27 = vsel %vm1266_vm4, %v13008_v24, %v13013_v26  ;;  %v1268_v30 = vsel %vm1266_vm4, %v13009_v23, %v13014_v25  ;;  %12046 = vmatprep.mubr.msk.f32.mxu1 %vm710_vm0, %v11494_v22  ;;  %v11510_v21 = vld [vmem:[%s15438_s8 + $0x30] sm:$0xff]  ;;  %v11511_v24 = vld [vmem:[%s15438_s8 + $0x38] sm:$0xff] }
 0x185   : > { %v13022_v31 = vpop.permute.xlu1 %13021  ;;  %v13027_v32 = vpop.permute.xlu0 %13026  ;;  %v12538_v33 = vpack.c.bf16 %v1268_v30, %v1267_v27  ;;  %v11514_v27 = vld [vmem:[%s15439_s7 + $0x40] sm:$0xff] }
 0x186   : > { %v13024_v36 = vunpack.i.h.bf16 %v13022_v31  ;;  %v13023_v37 = vunpack.i.l.bf16 %v13022_v31  ;;  %v13029_v38 = vunpack.i.h.bf16 %v13027_v32  ;;  %v13028_v39 = vunpack.i.l.bf16 %v13027_v32 }
 0x187   : > { %12539 = vmatprep.subr.bf16.mxu1 %v12538_v33  ;;  %v12570_v32 = vpack.c.bf16 %v13611_v5, %v13609_v4  ;;  %v11518_v4 = vld [vmem:[%s15438_s8 + $0x40] sm:$0xff] }
 0x188   : > { %v1269_v41 = vsel %vm1266_vm4, %v13018_v35, %v13023_v37  ;;  %v1270_v42 = vsel %vm1266_vm4, %v13019_v34, %v13024_v36  ;;  %v11515_v37 = vld [vmem:[%s15439_s7 + $0x48] sm:$0xff] }
 0x189   : > { %v13032_v43 = vpop.permute.xlu1 %13031  ;;  %v13037_v44 = vpop.permute.xlu0 %13036  ;;  %v12542_v45 = vpack.c.bf16 %v1270_v42, %v1269_v41 }
 0x18a   : > { %v13034_v47 = vunpack.i.h.bf16 %v13032_v43  ;;  %v13033_v48 = vunpack.i.l.bf16 %v13032_v43  ;;  %v13039_v53 = vunpack.i.h.bf16 %v13037_v44  ;;  %v13038_v54 = vunpack.i.l.bf16 %v13037_v44 }
 0x18b   : > { %12047 = vmatmul.mubr.msk.f32.vlgmr.msra.gmra.mrb[0].mxu1 %vm710_vm0, %v11495_v40 }
 0x18c   : > { %12541 = vmatpush3.bf16.msra.mxu1 %v12538_v33  ;;  %12057 = vmatprep.mubr.msk.f32.mxu1 %vm942_vm2, %v11498_v46  ;;  %v1369_v49 = vsel %vm1266_vm4, %v13028_v39, %v13033_v48  ;;  %v1370_v50 = vsel %vm1266_vm4, %v13029_v38, %v13034_v47  ;;  %v11519_v48 = vld [vmem:[%s15438_s8 + $0x48] sm:$0xff] }
 0x18d   : > { %12543 = vmatprep.subr.bf16.mxu1 %v12542_v45  ;;  %v13042_v51 = vpop.permute.xlu1 %13041  ;;  %v12546_v52 = vpack.c.bf16 %v1370_v50, %v1369_v49  ;;  %v13047_v57 = vpop.permute.xlu0 %13046 }
 0x18e   : > { %v13044_v55 = vunpack.i.h.bf16 %v13042_v51  ;;  %v13043_v56 = vunpack.i.l.bf16 %v13042_v51  ;;  %v13049_v2 = vunpack.i.h.bf16 %v13047_v57  ;;  %v13048_v3 = vunpack.i.l.bf16 %v13047_v57  ;;  %v11522_v51 = vld [vmem:[%s15439_s7 + $0x50] sm:$0xff] }
 0x190   : > { %12545 = vmatpush3.bf16.msra.mxu1 %v12542_v45  ;;  %v1482_v59 = vsel %vm1481_vm5, %v13038_v54, %v13043_v56  ;;  %v1483_v60 = vsel %vm1481_vm5, %v13039_v53, %v13044_v55 }
 0x191   : > { %v13052_v61 = vpop.permute.xlu1 %13051  ;;  %12547 = vmatprep.subr.bf16.mxu1 %v12546_v52  ;;  %v12550_v62 = vpack.c.bf16 %v1483_v60, %v1482_v59  ;;  %v13057_v6 = vpop.permute.xlu0 %13056 }
 0x192   : > { %v13054_v0 = vunpack.i.h.bf16 %v13052_v61  ;;  %v13053_v1 = vunpack.i.l.bf16 %v13052_v61  ;;  %v13059_v8 = vunpack.i.h.bf16 %v13057_v6  ;;  %v13058_v9 = vunpack.i.l.bf16 %v13057_v6 }
 0x193   : > { %12058 = vmatmul.mubr.msk.f32.vlgmr.msra.gmra.mrb[0].mxu1 %vm942_vm2, %v11499_v58 }
 0x194   : > { %12549 = vmatpush3.bf16.msra.mxu1 %v12546_v52  ;;  %12064 = vmatprep.mubr.msk.f32.mxu1 %vm710_vm0, %v11502_v63  ;;  %v1484_v13 = vsel %vm1481_vm5, %v13048_v3, %v13053_v1  ;;  %v1485_v14 = vsel %vm1481_vm5, %v13049_v2, %v13054_v0  ;;  %v11526_v3 = vld [vmem:[%s15438_s8 + $0x50] sm:$0xff] }
 0x195   : > { %12551 = vmatprep.subr.bf16.mxu1 %v12550_v62  ;;  %v13062_v7 = vpop.permute.xlu1 %13061  ;;  %v12554_v18 = vpack.c.bf16 %v1485_v14, %v1484_v13  ;;  %v13067_v22 = vpop.permute.xlu0 %13066 }
 0x196   : > { %v13064_v10 = vunpack.i.h.bf16 %v13062_v7  ;;  %v13063_v11 = vunpack.i.l.bf16 %v13062_v7  ;;  %v13069_v33 = vunpack.i.h.bf16 %v13067_v22  ;;  %v13068_v34 = vunpack.i.l.bf16 %v13067_v22 }
 0x198   : > { %v1584_v16 = vsel %vm1481_vm5, %v13058_v9, %v13063_v11  ;;  %v1585_v17 = vsel %vm1481_vm5, %v13059_v8, %v13064_v10 }
 0x199   : > { %v12558_v19 = vpack.c.bf16 %v1585_v17, %v1584_v16  ;;  %v13072_v23 = vpop.permute.xlu1 %13071  ;;  %v13077_v25 = vpop.permute.xlu0 %13076  ;;  %v11527_v17 = vld [vmem:[%s15438_s8 + $0x58] sm:$0xff] }
 0x19a   : > { %v13074_v30 = vunpack.i.h.bf16 %v13072_v23  ;;  %v13073_v31 = vunpack.i.l.bf16 %v13072_v23  ;;  %v13078_v41 = vunpack.i.l.bf16 %v13077_v25 }
 0x19b   : > { %12065 = vmatmul.mubr.msk.f32.vlgmr.msra.gmra.mrb[0].mxu1 %vm710_vm0, %v11503_v12 }
 0x19c   : > { %12553 = vmatpush3.bf16.msra.mxu1 %v12550_v62  ;;  %12075 = vmatprep.mubr.msk.f32.mxu1 %vm942_vm2, %v11506_v15  ;;  %v1870_v38 = vsel %vm1868_vm6, %v13069_v33, %v13074_v30  ;;  %v11523_v62 = vld [vmem:[%s15439_s7 + $0x58] sm:$0xff]  ;;  %v11531_v33 = vld [vmem:[%s15439_s7 + $0x68] sm:$0xff] }
 0x19d   : > { %12555 = vmatprep.subr.bf16.mxu1 %v12554_v18  ;;  %v13082_v26 = vpop.permute.xlu1 %13081  ;;  %v13087_v35 = vpop.permute.xlu0 %13086 }
 0x19e   : > { %v13084_v39 = vunpack.i.h.bf16 %v13082_v26  ;;  %v13083_v40 = vunpack.i.l.bf16 %v13082_v26  ;;  %v13089_v44 = vunpack.i.h.bf16 %v13087_v35  ;;  %v13088_v45 = vunpack.i.l.bf16 %v13087_v35 }
 0x1a0   : > { %12557 = vmatpush3.bf16.msra.mxu1 %v12554_v18  ;;  %v1871_v49 = vsel %vm1868_vm6, %v13078_v41, %v13083_v40 }
 0x1a1   : > { %12559 = vmatprep.subr.bf16.mxu1 %v12558_v19  ;;  %v13092_v36 = vpop.permute.xlu1 %13091  ;;  %v13097_v42 = vpop.permute.xlu0 %13096 }
 0x1a2   : > { %v13094_v46 = vunpack.i.h.bf16 %v13092_v36  ;;  %v13093_v47 = vunpack.i.l.bf16 %v13092_v36  ;;  %v13099_v60 = vunpack.i.h.bf16 %v13097_v42  ;;  %v13098_v61 = vunpack.i.l.bf16 %v13097_v42  ;;  %v11534_v36 = vld [vmem:[%s15438_s8 + $0x60] sm:$0xff] }
 0x1a3   : > { %12076 = vmatmul.mubr.msk.f32.vlgmr.msra.gmra.mrb[0].mxu1 %vm942_vm2, %v11507_v20  ;;  %v11530_v20 = vld [vmem:[%s15439_s7 + $0x60] sm:$0xff] }
 0x1a4   : > { %12561 = vmatpush3.bf16.msra.mxu1 %v12558_v19  ;;  %12082 = vmatprep.mubr.msk.f32.mxu1 %vm710_vm0, %v11510_v21  ;;  %v1971_v52 = vsel %vm1868_vm6, %v13088_v45, %v13093_v47  ;;  %v1972_v53 = vsel %vm1868_vm6, %v13089_v44, %v13094_v46  ;;  %v11535_v44 = vld [vmem:[%s15438_s8 + $0x68] sm:$0xff] }
 0x1a5   : > { %12563 = vmatprep.subr.bf16.mxu1 %v13646_v28  ;;  %v13102_v43 = vpop.permute.xlu1 %13101  ;;  %v13107_v54 = vpop.permute.xlu0 %13106  ;;  %v12582_v59 = vpack.c.bf16 %v1972_v53, %v1971_v52 }
 0x1a6   : > { %v13104_v57 = vunpack.i.h.bf16 %v13102_v43  ;;  %v13103_v58 = vunpack.i.l.bf16 %v13102_v43  ;;  %v13109_v9 = vunpack.i.h.bf16 %v13107_v54  ;;  %v13108_v10 = vunpack.i.l.bf16 %v13107_v54 }
 0x1a8   : > { %v2084_v63 = vsel %vm2083_vm7, %v13098_v61, %v13103_v58  ;;  %v2085_v0 = vsel %vm2083_vm7, %v13099_v60, %v13104_v57  ;;  %v11539_v60 = vld [vmem:[%s15439_s7 + $0x78] sm:$0xff] }
 0x1a9   : > { %v13112_v55 = vpop.permute.xlu1 %13111  ;;  %v13117_v1 = vpop.permute.xlu0 %13116  ;;  %v12586_v6 = vpack.c.bf16 %v2085_v0, %v2084_v63  ;;  %v11542_v63 = vld [vmem:[%s15438_s8 + $0x70] sm:$0xff] }
 0x1aa   : > { %v13114_v7 = vunpack.i.h.bf16 %v13112_v55  ;;  %v13113_v8 = vunpack.i.l.bf16 %v13112_v55  ;;  %v13119_v11 = vunpack.i.h.bf16 %v13117_v1  ;;  %v13118_v12 = vunpack.i.l.bf16 %v13117_v1 }
 0x1ab   : > { %12083 = vmatmul.mubr.msk.f32.vlgmr.msra.gmra.mrb[0].mxu1 %vm710_vm0, %v11511_v24 }
 0x1ac   : > { %12565 = vmatpush3.bf16.msra.mxu1 %v13646_v28  ;;  %12093 = vmatprep.mubr.msk.f32.mxu1 %vm942_vm2, %v11514_v27  ;;  %v1869_v28 = vsel %vm1868_vm6, %v13068_v34, %v13073_v31  ;;  %v2086_v18 = vsel %vm2083_vm7, %v13108_v10, %v13113_v8  ;;  %v2087_v19 = vsel %vm2083_vm7, %v13109_v9, %v13114_v7 }
 0x1ad   : > { %12567 = vmatprep.subr.bf16.mxu1 %v13648_v29  ;;  %v12574_v5 = vpack.c.bf16 %v1870_v38, %v1869_v28  ;;  %v13122_v2 = vpop.permute.xlu1 %13121  ;;  %v13127_v15 = vpop.permute.xlu0 %13126  ;;  %v12590_v23 = vpack.c.bf16 %v2087_v19, %v2086_v18 }
 0x1ae   : > { %v13124_v13 = vunpack.i.h.bf16 %v13122_v2  ;;  %v13123_v14 = vunpack.i.l.bf16 %v13122_v2  ;;  %v13129_v31 = vunpack.i.h.bf16 %v13127_v15 }
 0x1b0   : > { %12569 = vmatpush3.bf16.msra.mxu1 %v13648_v29  ;;  %v13079_v29 = vunpack.i.h.bf16 %v13077_v25  ;;  %v2186_v21 = vsel %vm2083_vm7, %v13118_v12, %v13123_v14  ;;  %v2187_v22 = vsel %vm2083_vm7, %v13119_v11, %v13124_v13  ;;  %v11543_v13 = vld [vmem:[%s15438_s8 + $0x78] sm:$0xff] }
 0x1b1   : > { %12571 = vmatprep.subr.bf16.mxu1 %v12570_v32  ;;  %v13132_v16 = vpop.permute.xlu1 %13131  ;;  %v13137_v26 = vpop.permute.xlu0 %13136  ;;  %v12594_v30 = vpack.c.bf16 %v2187_v22, %v2186_v21  ;;  %v11547_v21 = vld [vmem:[%s15439_s7 + $0x88] sm:$0xff]  ;;  %v11550_v22 = vld [vmem:[%s15438_s8 + $0x80] sm:$0xff] }
 0x1b2   : > { %v1872_v50 = vsel %vm1868_vm6, %v13079_v29, %v13084_v39  ;;  %v13134_v24 = vunpack.i.h.bf16 %v13132_v16  ;;  %v13133_v25 = vunpack.i.l.bf16 %v13132_v16  ;;  %v13139_v39 = vunpack.i.h.bf16 %v13137_v26  ;;  %v11546_v16 = vld [vmem:[%s15439_s7 + $0x80] sm:$0xff] }
 0x1b3   : > { %12094 = vmatmul.mubr.msk.f32.vlgmr.msra.gmra.mrb[0].mxu1 %vm942_vm2, %v11515_v37  ;;  %v12578_v56 = vpack.c.bf16 %v1872_v50, %v1871_v49  ;;  %v13138_v40 = vunpack.i.l.bf16 %v13137_v26  ;;  %v11538_v49 = vld [vmem:[%s15439_s7 + $0x70] sm:$0xff]  ;;  %v13914_v26 = vld [vmem:[%s15441_s26] ss:$0 sm:$0xff]  ;;  %s15443_s26 = smov 37   ;;  %s15470_s7 = smov 19  }
 0x1b4   : > { %12573 = vmatpush3.bf16.msra.mxu1 %v12570_v32  ;;  %12100 = vmatprep.mubr.msk.f32.mxu1 %vm710_vm0, %v11518_v4  ;;  %v13128_v32 = vunpack.i.l.bf16 %v13127_v15  ;;  %v2300_v35 = vsel %vm2298_vm8, %v13129_v31, %v13134_v24 }
 0x1b5   : > { %12575 = vmatprep.subr.bf16.mxu1 %v12574_v5  ;;  %v13142_v27 = vpop.permute.xlu1 %13141  ;;  %v13147_v37 = vpop.permute.xlu0 %13146 }
 0x1b6   : > { %v2299_v34 = vsel %vm2298_vm8, %v13128_v32, %v13133_v25  ;;  %v13144_v4 = vunpack.i.h.bf16 %v13142_v27  ;;  %v13149_v29 = vunpack.i.h.bf16 %v13147_v37  ;;  %v13148_v41 = vunpack.i.l.bf16 %v13147_v37 }
 0x1b7   : > { %v12598_v38 = vpack.c.bf16 %v2300_v35, %v2299_v34  ;;  %v11555_v34 = vld [vmem:[%s15442_s10 + $0x10] sm:$0xff] }
 0x1b8   : > { %v2302_v46 = vsel %vm2298_vm8, %v13139_v39, %v13144_v4  ;;  %12179 = vmatprep.mubr.msk.f32.mxu0 %vm710_vm0, %v11555_v34 }
 0x1b9   : > { %v13152_v28 = vpop.permute.xlu1 %13151  ;;  %v13157_v47 = vpop.permute.xlu0 %13156 }
 0x1ba   : > { %v13154_v42 = vunpack.i.h.bf16 %v13152_v28  ;;  %v13153_v43 = vunpack.i.l.bf16 %v13152_v28  ;;  %v13158_v57 = vunpack.i.l.bf16 %v13157_v47  ;;  %v3607_v28 = vld [vmem:[%s15454_s11 + $0x8] sm:$0xff] }
 0x1bb   : > { %12101 = vmatmul.mubr.msk.f32.vlgmr.msra.gmra.mrb[0].mxu1 %vm710_vm0, %v11519_v48 }
 0x1bc   : > { %12577 = vmatpush3.bf16.msra.mxu1 %v12574_v5  ;;  %12111 = vmatprep.mubr.msk.f32.mxu1 %vm942_vm2, %v11522_v51  ;;  %v13143_v5 = vunpack.i.l.bf16 %v13142_v27  ;;  %v2401_v50 = vsel %vm2298_vm8, %v13148_v41, %v13153_v43  ;;  %v2402_v51 = vsel %vm2298_vm8, %v13149_v29, %v13154_v42 }
 0x1bd   : > { %12579 = vmatprep.subr.bf16.mxu1 %v12578_v56  ;;  %v13162_v48 = vpop.permute.xlu1 %13161  ;;  %v12606_v55 = vpack.c.bf16 %v2402_v51, %v2401_v50  ;;  %v13167_v58 = vpop.permute.xlu0 %13166  ;;  %v11556_v51 = vld [vmem:[%s15442_s10 + $0x18] sm:$0xff] }
 0x1be   : > { %v2301_v45 = vsel %vm2298_vm8, %v13138_v40, %v13143_v5  ;;  %v13164_v53 = vunpack.i.h.bf16 %v13162_v48  ;;  %v13163_v54 = vunpack.i.l.bf16 %v13162_v48  ;;  %v13169_v7 = vunpack.i.h.bf16 %v13167_v58 }
 0x1bf   : > { %v12602_v52 = vpack.c.bf16 %v2302_v46, %v2301_v45  ;;  %v13168_v8 = vunpack.i.l.bf16 %v13167_v58 }
 0x1c0   : > { %12581 = vmatpush3.bf16.msra.mxu1 %v12578_v56  ;;  %v13159_v56 = vunpack.i.h.bf16 %v13157_v47  ;;  %v2514_v61 = vsel %vm2513_vm9, %v13158_v57, %v13163_v54  ;;  %v2723_v57 = vld [vmem:[%s15442_s10] sm:$0xff] }
 0x1c1   : > { %12583 = vmatprep.subr.bf16.mxu1 %v12582_v59  ;;  %v13177_v2 = vpop.permute.xlu0 %13176 }
 0x1c2   : > { %v13179_v11 = vunpack.i.h.bf16 %v13177_v2  ;;  %v13178_v12 = vunpack.i.l.bf16 %v13177_v2 }
 0x1c3   : > { %12112 = vmatmul.mubr.msk.f32.vlgmr.msra.gmra.mrb[0].mxu1 %vm942_vm2, %v11523_v62  ;;  %v2515_v62 = vsel %vm2513_vm9, %v13159_v56, %v13164_v53 }
 0x1c4   : > { %12585 = vmatpush3.bf16.msra.mxu1 %v12582_v59  ;;  %12118 = vmatprep.mubr.msk.f32.mxu1 %vm710_vm0, %v11526_v3  ;;  %v13172_v59 = vpop.permute.xlu1 %13171  ;;  %v12610_v0 = vpack.c.bf16 %v2515_v62, %v2514_v61 }
 0x1c5   : > { %12587 = vmatprep.subr.bf16.mxu1 %v12586_v6  ;;  %v13174_v3 = vunpack.i.h.bf16 %v13172_v59 }
 0x1c7   : > { %v2517_v15 = vsel %vm2513_vm9, %v13169_v7, %v13174_v3 }
 0x1c8   : > { %v13182_v1 = vpop.permute.xlu1 %13181 }
 0x1c9   : > { %v13184_v9 = vunpack.i.h.bf16 %v13182_v1  ;;  %v13183_v10 = vunpack.i.l.bf16 %v13182_v1 }
 0x1cb   : > { %12119 = vmatmul.mubr.msk.f32.vlgmr.msra.gmra.mrb[0].mxu1 %vm710_vm0, %v11527_v17  ;;  %v2616_v17 = vsel %vm2513_vm9, %v13178_v12, %v13183_v10  ;;  %v2617_v18 = vsel %vm2513_vm9, %v13179_v11, %v13184_v9  ;;  %v2724_v9 = vld [vmem:[%s15442_s10 + $0x8] sm:$0xff] }
 0x1cc   : > { %12589 = vmatpush3.bf16.msra.mxu1 %v12586_v6  ;;  %12129 = vmatprep.mubr.msk.f32.mxu1 %vm942_vm2, %v11530_v20  ;;  %v13173_v6 = vunpack.i.l.bf16 %v13172_v59  ;;  %v12618_v20 = vpack.c.bf16 %v2617_v18, %v2616_v17  ;;  %v11565_v17 = vld [vmem:[%s15442_s10 + $0x30] sm:$0xff] }
 0x1cd   : > { %12591 = vmatprep.subr.bf16.mxu1 %v12590_v23 }
 0x1ce   : > { %v2516_v14 = vsel %vm2513_vm9, %v13168_v8, %v13173_v6 }
 0x1cf   : > { %v12614_v19 = vpack.c.bf16 %v2517_v15, %v2516_v14  ;;  %v11562_v14 = vld [vmem:[%s15442_s10 + $0x28] sm:$0xff] }
 0x1d0   : > { %12593 = vmatpush3.bf16.msra.mxu1 %v12590_v23  ;;  %v11551_v23 = vld [vmem:[%s15438_s8 + $0x88] sm:$0xff]  ;;  %s15472_s8 = smov 17  }
 0x1d1   : > { %12595 = vmatprep.subr.bf16.mxu1 %v12594_v30 }
 0x1d2   : > { %v2706_v25 = vpop.permute.xlu0 %2705 }
 0x1d3   : > { %12130 = vmatmul.mubr.msk.f32.vlgmr.msra.gmra.mrb[0].mxu1 %vm942_vm2, %v11531_v33 }
 0x1d4   : > { %12597 = vmatpush3.bf16.msra.mxu1 %v12594_v30  ;;  %12136 = vmatprep.mubr.msk.f32.mxu1 %vm710_vm0, %v11534_v36 }
 0x1d5   : > { %12599 = vmatprep.subr.bf16.mxu1 %v12598_v38 }
 0x1d6   : > { %v2711_v24 = vpop.permute.xlu1 %2710 }
 0x1db   : > { %12137 = vmatmul.mubr.msk.f32.vlgmr.msra.gmra.mrb[0].mxu1 %vm710_vm0, %v11535_v44 }
 0x1dc   : > { %12601 = vmatpush3.bf16.msra.mxu1 %v12598_v38  ;;  %12147 = vmatprep.mubr.msk.f32.mxu1 %vm942_vm2, %v11538_v49  ;;  %v3606_v38 = vld [vmem:[%s15454_s11] sm:$0xff] }
 0x1dd   : > { %12603 = vmatprep.subr.bf16.mxu1 %v12602_v52 }
 0x1e0   : > { %12605 = vmatpush3.bf16.msra.mxu1 %v12602_v52 }
 0x1e1   : > { %12607 = vmatprep.subr.bf16.mxu1 %v12606_v55 }
 0x1e3   : > { %12148 = vmatmul.mubr.msk.f32.vlgmr.msra.gmra.mrb[0].mxu1 %vm942_vm2, %v11539_v60 }
 0x1e4   : > { %12609 = vmatpush3.bf16.msra.mxu1 %v12606_v55  ;;  %12154 = vmatprep.mubr.msk.f32.mxu1 %vm710_vm0, %v11542_v63 }
 0x1e5   : > { %12611 = vmatprep.subr.bf16.mxu1 %v12610_v0 }
 0x1eb   : > { %12155 = vmatmul.mubr.msk.f32.vlgmr.msra.gmra.mrb[0].mxu1 %vm710_vm0, %v11543_v13  ;;  %v11561_v13 = vld [vmem:[%s15442_s10 + $0x20] sm:$0xff] }
 0x1ec   : > { %12613 = vmatpush3.bf16.msra.mxu1 %v12610_v0  ;;  %12165 = vmatprep.mubr.msk.f32.mxu1 %vm942_vm2, %v11546_v16 }
 0x1ed   : > { %12615 = vmatprep.subr.bf16.mxu1 %v12614_v19 }
 0x1f0   : > { %12617 = vmatpush3.bf16.msra.mxu1 %v12614_v19 }
 0x1f1   : > { %12619 = vmatprep.subr.bf16.mxu1 %v12618_v20 }
 0x1f3   : > { %12166 = vmatmul.mubr.msk.f32.vlgmr.msra.gmra.mrb[0].mxu1 %vm942_vm2, %v11547_v21  ;;  %vm4202_vm2 = vcmask 146432  }
 0x1f4   : > { %12621 = vmatpush3.bf16.msra.mxu1 %v12618_v20  ;;  %12172 = vmatprep.mubr.msk.f32.mxu1 %vm710_vm0, %v11550_v22  ;;  %v11566_v22 = vld [vmem:[%s15442_s10 + $0x38] sm:$0xff] }
 0x1fb   : > { %12173 = vmatmul.mubr.msk.f32.vlgmr.msra.gmra.mrb[0].mxu1 %vm710_vm0, %v11551_v23 }
 0x2ce   : > { %v12174_v27 = vpop.f32.mrb[0].mxu1 }
 0x2cf   : > { %v2714_v30 = vadd.f32 %v12174_v27, %v2711_v24  ;;  %v2690_v31 = vpop.f32.mrb[1].mxu1 }
 0x2d0   : > { %v2713_v32 = vadd.f32 %v2706_v25, %v2690_v31 }
 0x2d1   : > { %v2722_v33 = vmul.f32 %v13914_v26, %v2714_v30  ;;  %v11569_v30 = vld [vmem:[%s15442_s10 + $0x40] sm:$0xff] }
 0x2d2   : > { %v2721_v35 = vmul.f32 %v13914_v26, %v2713_v32 }
 0x2d4   : > { %v13192_v36 = vpack.i.bf16 %v2722_v33, %v2721_v35  ;;  %v13924_v37 = vpack.c.bf16 %v2722_v33, %v2721_v35 }
 0x2d6   : > { %13193 = vrot.lane.b32.xlu0 %v13192_v36, %s13444_s24  ;;  %13188 = vrot.lane.b32.xlu1 %v13192_v36, %s13443_s1  ;;  %s15448_s24 = smov 91   ;;  %s15449_s1 = smov 119  }
 0x2da   : > { %13203 = vrot.lane.b32.xlu0 %v13192_v36, %s13442_s29  ;;  %13198 = vrot.lane.b32.xlu1 %v13192_v36, %s13441_s28  ;;  %s15451_s29 = smov 118   ;;  %s15452_s28 = smov 89  }
 0x2de   : > { %13213 = vrot.lane.b32.xlu0 %v13192_v36, %s13446_s27  ;;  %13208 = vrot.lane.b32.xlu1 %v13192_v36, %s15443_s26  ;;  %s15453_s27 = smov 117   ;;  %s15416_s26 = smov 18  }
 0x2e2   : > { %13223 = vrot.lane.b32.xlu0 %v13192_v36, %s15444_s0  ;;  %13218 = vrot.lane.b32.xlu1 %v13192_v36, %s15445_s4  ;;  %s15414_s4 = smov 78  }
 0x2e6   : > { %13233 = vrot.lane.b32.xlu0 %v13192_v36, %s15446_s30  ;;  %13228 = vrot.lane.b32.xlu1 %v13192_v36, %s15447_s5  ;;  %s15408_s30 = smov 17  }
 0x2ea   : > { %13243 = vrot.lane.b32.xlu0 %v13192_v36, %s15448_s24  ;;  %13238 = vrot.lane.b32.xlu1 %v13192_v36, %s15449_s1  ;;  %s15455_s24 = sld [smem:[#allocation6_spill]]  ;;  %s15406_s1 = smov 77  }
 0x2ee   : > { %13253 = vrot.lane.b32.xlu0 %v13192_v36, %s15450_s22  ;;  %13248 = vrot.lane.b32.xlu1 %v13192_v36, %s15451_s29  ;;  %s12901_s22 = smul.u32 24, %s15502_s25  ;;  %s15394_s29 = smov 111  }
 0x2f2   : > { %13263 = vrot.lane.b32.xlu0 %v13192_v36, %s15452_s28  ;;  %13258 = vrot.lane.b32.xlu1 %v13192_v36, %s15453_s27  ;;  %v11570_v36 = vld [vmem:[%s15442_s10 + $0x48] sm:$0xff]  ;;  %s15456_s27 = sld [smem:[#allocation4_spill]]  ;;  %s15410_s28 = smov 79  }
 0x2f6   : > { %3615 = vperm.xlu0 %13185, %v3607_v28   ;;  %3610 = vperm.xlu1 %13186, %v3606_v38  }
 0x2f8   : > { %s14123_s3 = scalar_lea.vmem %s15456_s27, %s12901_s22  ;;  %s15390_s22 = smov 61  }
 0x2f9   : > { %s15392_s27 = smov 67  }
 0x348   : > { %v13194_v4 = vpop.permute.xlu0 %13193  ;;  %v13189_v5 = vpop.permute.xlu1 %13188 }
 0x349   : > { %v13196_v39 = vunpack.i.h.bf16 %v13194_v4  ;;  %v13195_v40 = vunpack.i.l.bf16 %v13194_v4  ;;  %v13191_v29 = vunpack.i.h.bf16 %v13189_v5  ;;  %v13190_v41 = vunpack.i.l.bf16 %v13189_v5 }
 0x34b   : > { %v2756_v42 = vsel %vm1051_vm3, %v13190_v41, %v13195_v40  ;;  %v2757_v43 = vsel %vm1051_vm3, %v13191_v29, %v13196_v39  ;;  %v11573_v39 = vld [vmem:[%s15442_s10 + $0x50] sm:$0xff]  ;;  %vm4546_vm3 = vcmask 138240  }
 0x34c   : > { %v13204_v44 = vpop.permute.xlu0 %13203  ;;  %v13199_v45 = vpop.permute.xlu1 %13198  ;;  %v12622_v46 = vpack.c.bf16 %v2757_v43, %v2756_v42  ;;  %v11574_v43 = vld [vmem:[%s15442_s10 + $0x58] sm:$0xff] }
 0x34d   : > { %v13206_v47 = vunpack.i.h.bf16 %v13204_v44  ;;  %v13205_v48 = vunpack.i.l.bf16 %v13204_v44  ;;  %v13201_v49 = vunpack.i.h.bf16 %v13199_v45  ;;  %v13200_v50 = vunpack.i.l.bf16 %v13199_v45 }
 0x34e   : > { %12623 = vmatprep.subr.bf16.mxu0 %v12622_v46 }
 0x34f   : > { %12625 = vmatpush3.bf16.msra.mxu0 %v12622_v46  ;;  %v2739_v52 = vsel %vm838_vm1, %v13200_v50, %v13205_v48  ;;  %v2740_v53 = vsel %vm838_vm1, %v13201_v49, %v13206_v47  ;;  %v11577_v48 = vld [vmem:[%s15442_s10 + $0x60] sm:$0xff]  ;;  %vm13462_vm1 = vmmov 0  }
 0x350   : > { %v13214_v54 = vpop.permute.xlu0 %13213  ;;  %v13209_v55 = vpop.permute.xlu1 %13208  ;;  %v12626_v56 = vpack.c.bf16 %v2740_v53, %v2739_v52 }
 0x351   : > { %v13216_v58 = vunpack.i.h.bf16 %v13214_v54  ;;  %v13215_v59 = vunpack.i.l.bf16 %v13214_v54  ;;  %v13211_v60 = vunpack.i.h.bf16 %v13209_v55  ;;  %v13210_v61 = vunpack.i.l.bf16 %v13209_v55  ;;  %v11578_v54 = vld [vmem:[%s15442_s10 + $0x68] sm:$0xff] }
 0x352   : > { %12180 = vmatmul.mubr.msk.f32.vlgmr.msra.gmra.mrb[4].mxu0 %vm710_vm0, %v11556_v51  ;;  %12627 = vmatprep.subr.bf16.mxu0 %v12626_v56 }
 0x353   : > { %12629 = vmatpush3.bf16.msra.mxu0 %v12626_v56  ;;  %v2935_v62 = vsel %vm1266_vm4, %v13210_v61, %v13215_v59  ;;  %v2936_v63 = vsel %vm1266_vm4, %v13211_v60, %v13216_v58  ;;  %12186 = vmatprep.mubr.msk.f32.mxu0 %vm710_vm0, %v2723_v57  ;;  %v11581_v57 = vld [vmem:[%s15442_s10 + $0x70] sm:$0xff]  ;;  %v3629_v59 = vld [vmem:[%s15455_s24 + $0x8] sm:$0xff]  ;;  %v3632_v60 = vld [vmem:[%s15455_s24 + $0x20] sm:$0xff]  ;;  %vm5525_vm4 = vcmask 1039360  }
 0x354   : > { %v13224_v0 = vpop.permute.xlu0 %13223  ;;  %v13219_v1 = vpop.permute.xlu1 %13218  ;;  %v12630_v2 = vpack.c.bf16 %v2936_v63, %v2935_v62  ;;  %v11582_v61 = vld [vmem:[%s15442_s10 + $0x78] sm:$0xff]  ;;  %v11585_v62 = vld [vmem:[%s15442_s10 + $0x80] sm:$0xff]  ;;  %v12658_v63 = vpack.c.bf16 %v3632_v60, %v3629_v59 }
 0x355   : > { %v13226_v3 = vunpack.i.h.bf16 %v13224_v0  ;;  %v13225_v6 = vunpack.i.l.bf16 %v13224_v0  ;;  %v13221_v7 = vunpack.i.h.bf16 %v13219_v1  ;;  %v13220_v8 = vunpack.i.l.bf16 %v13219_v1  ;;  %v3628_v0 = vld [vmem:[%s15455_s24] sm:$0xff]  ;;  %v3631_v1 = vld [vmem:[%s15455_s24 + $0x18] sm:$0xff] }
 0x356   : > { %12631 = vmatprep.subr.bf16.mxu0 %v12630_v2 }
 0x357   : > { %v3035_v10 = vsel %vm1481_vm5, %v13220_v8, %v13225_v6  ;;  %v3036_v11 = vsel %vm1481_vm5, %v13221_v7, %v13226_v3  ;;  %v3638_v3 = vld [vmem:[%s15455_s24 + $0x50] sm:$0xff]  ;;  %v11586_v6 = vld [vmem:[%s15442_s10 + $0x88] sm:$0xff]  ;;  %v12660_v7 = vpack.c.bf16 %v3631_v1, %v3628_v0 }
 0x358   : > { %v12634_v12 = vpack.c.bf16 %v3036_v11, %v3035_v10  ;;  %v13234_v15 = vpop.permute.xlu0 %13233  ;;  %v13229_v16 = vpop.permute.xlu1 %13228  ;;  %v3637_v10 = vld [vmem:[%s15455_s24 + $0x48] sm:$0xff] }
 0x359   : > { %v13236_v18 = vunpack.i.h.bf16 %v13234_v15  ;;  %v13235_v19 = vunpack.i.l.bf16 %v13234_v15  ;;  %v13231_v20 = vunpack.i.h.bf16 %v13229_v16  ;;  %v13230_v21 = vunpack.i.l.bf16 %v13229_v16  ;;  %v3641_v11 = vld [vmem:[%s15455_s24 + $0x68] sm:$0xff]  ;;  %v3640_v15 = vld [vmem:[%s15455_s24 + $0x60] sm:$0xff]  ;;  %v3643_v16 = vld [vmem:[%s15455_s24 + $0x78] sm:$0xff] }
 0x35a   : > { %12187 = vmatmul.mubr.msk.f32.vlgmr.msra.gmra.mrb[4].mxu0 %vm710_vm0, %v2724_v9  ;;  %v3634_v9 = vld [vmem:[%s15455_s24 + $0x30] sm:$0xff]  ;;  %v3657_v0 = vld [vmem:[%s15455_s24 + $0xe8] sm:$0xff] }
 0x35b   : > { %12633 = vmatpush3.bf16.msra.mxu0 %v12630_v2  ;;  %12193 = vmatprep.mubr.msk.f32.mxu0 %vm710_vm0, %v11561_v13  ;;  %v3221_v23 = vsel %vm1868_vm6, %v13230_v21, %v13235_v19  ;;  %v3222_v24 = vsel %vm1868_vm6, %v13231_v20, %v13236_v18  ;;  %v3635_v2 = vld [vmem:[%s15455_s24 + $0x38] sm:$0xff]  ;;  %v12664_v13 = vpack.c.bf16 %v3637_v10, %v3634_v9  ;;  %v3650_v18 = vld [vmem:[%s15455_s24 + $0xb0] sm:$0xff]  ;;  %vm5870_vm6 = vcmask 908288  }
 0x35c   : > { %12635 = vmatprep.subr.bf16.mxu0 %v12634_v12  ;;  %v13244_v25 = vpop.permute.xlu0 %13243  ;;  %v13239_v27 = vpop.permute.xlu1 %13238  ;;  %v12642_v31 = vpack.c.bf16 %v3222_v24, %v3221_v23  ;;  %v12662_v8 = vpack.c.bf16 %v3638_v3, %v3635_v2  ;;  %v12668_v19 = vpack.c.bf16 %v3643_v16, %v3640_v15  ;;  %v3646_v21 = vld [vmem:[%s15455_s24 + $0x90] sm:$0xff]  ;;  %v3653_v23 = vld [vmem:[%s15455_s24 + $0xc8] sm:$0xff]  ;;  %v3656_v24 = vld [vmem:[%s15455_s24 + $0xe0] sm:$0xff] }
 0x35d   : > { %v13246_v32 = vunpack.i.h.bf16 %v13244_v25  ;;  %v13245_v33 = vunpack.i.l.bf16 %v13244_v25  ;;  %v13241_v34 = vunpack.i.h.bf16 %v13239_v27  ;;  %v13240_v35 = vunpack.i.l.bf16 %v13239_v27  ;;  %v3660_v2 = vld [vmem:[%s15455_s24 + $0x100] sm:$0xff]  ;;  %v3663_v3 = vld [vmem:[%s15455_s24 + $0x118] sm:$0xff] }
 0x35e   : > { %v12674_v27 = vpack.c.bf16 %v3656_v24, %v3653_v23 }
 0x35f   : > { %v3321_v28 = vsel %vm2083_vm7, %v13240_v35, %v13245_v33  ;;  %v3322_v38 = vsel %vm2083_vm7, %v13241_v34, %v13246_v32  ;;  %v3659_v33 = vld [vmem:[%s15455_s24 + $0xf8] sm:$0xff]  ;;  %v3662_v34 = vld [vmem:[%s15455_s24 + $0x110] sm:$0xff]  ;;  %vm5542_vm7 = vcmask 547840  }
 0x360   : > { %v13254_v4 = vpop.permute.xlu0 %13253  ;;  %v13249_v5 = vpop.permute.xlu1 %13248  ;;  %v3658_v35 = vld [vmem:[%s15455_s24 + $0xf0] sm:$0xff] }
 0x361   : > { %v13256_v40 = vunpack.i.h.bf16 %v13254_v4  ;;  %v13255_v29 = vunpack.i.l.bf16 %v13254_v4  ;;  %v13251_v41 = vunpack.i.h.bf16 %v13249_v5  ;;  %v13250_v42 = vunpack.i.l.bf16 %v13249_v5  ;;  %v3665_v5 = vld [vmem:[%s15455_s24 + $0x128] sm:$0xf] }
 0x362   : > { %12194 = vmatmul.mubr.msk.f32.vlgmr.msra.gmra.mrb[4].mxu0 %vm710_vm0, %v11562_v14 }
 0x363   : > { %12637 = vmatpush3.bf16.msra.mxu0 %v12634_v12  ;;  %12200 = vmatprep.mubr.msk.f32.mxu0 %vm710_vm0, %v11565_v17  ;;  %v3421_v44 = vsel %vm2298_vm8, %v13250_v42, %v13255_v29  ;;  %v3422_v45 = vsel %vm2298_vm8, %v13251_v41, %v13256_v40  ;;  %v3644_v12 = vld [vmem:[%s15455_s24 + $0x80] sm:$0xff]  ;;  %v3647_v17 = vld [vmem:[%s15455_s24 + $0x98] sm:$0xff]  ;;  %v14129_v42 = vld [vmem:[%s14123_s3 + $0x8] sm:$0xff]  ;;  %vm5887_vm8 = vcmask 416768  }
 0x364   : > { %12639 = vmatprep.subr.bf16.mxu0 %v13924_v37  ;;  %v13264_v46 = vpop.permute.xlu0 %13263  ;;  %v13259_v47 = vpop.permute.xlu1 %13258  ;;  %v12650_v49 = vpack.c.bf16 %v3422_v45, %v3421_v44  ;;  %v12666_v14 = vpack.c.bf16 %v3644_v12, %v3641_v11  ;;  %v12670_v20 = vpack.c.bf16 %v3650_v18, %v3647_v17  ;;  %v3664_v40 = vld [vmem:[%s15455_s24 + $0x120] sm:$0xf]  ;;  %3883 = vrot.lane.b32.xlu0 %v14129_v42, %s15412_s23 }
 0x365   : > { %v13266_v50 = vunpack.i.h.bf16 %v13264_v46  ;;  %v13265_v51 = vunpack.i.l.bf16 %v13264_v46  ;;  %v13261_v52 = vunpack.i.h.bf16 %v13259_v47  ;;  %v13260_v53 = vunpack.i.l.bf16 %v13259_v47  ;;  %v14126_v41 = vld [vmem:[%s14123_s3] sm:$0xff] }
 0x366   : > { %3881 = vrot.lane.b32.xlu1 %v14126_v41, %s15412_s23 }
 0x367   : > { %v3521_v55 = vsel %vm2513_vm9, %v13260_v53, %v13265_v51  ;;  %v3522_v56 = vsel %vm2513_vm9, %v13261_v52, %v13266_v50  ;;  %v3639_v52 = vld [vmem:[%s15455_s24 + $0x58] sm:$0xff]  ;;  %vm6215_vm9 = vcmask 900096  }
 0x368   : > { %v12654_v58 = vpack.c.bf16 %v3522_v56, %v3521_v55 }
 0x36a   : > { %12201 = vmatmul.mubr.msk.f32.vlgmr.msra.gmra.mrb[4].mxu0 %vm710_vm0, %v11566_v22  ;;  %v3649_v22 = vld [vmem:[%s15455_s24 + $0xa8] sm:$0xff] }
 0x36b   : > { %12641 = vmatpush3.bf16.msra.mxu0 %v13924_v37  ;;  %12207 = vmatprep.mubr.msk.f32.mxu0 %vm710_vm0, %v11569_v30  ;;  %v12646_v37 = vpack.c.bf16 %v3322_v38, %v3321_v28  ;;  %v12672_v25 = vpack.c.bf16 %v3649_v22, %v3646_v21  ;;  %v3652_v30 = vld [vmem:[%s15455_s24 + $0xc0] sm:$0xff]  ;;  %v3661_v28 = vld [vmem:[%s15455_s24 + $0x108] sm:$0xff]  ;;  %v13458_v38 = vmov 0.0  }
 0x36c   : > { %12643 = vmatprep.subr.bf16.mxu0 %v12642_v31  ;;  %v12680_v4 = vpack.c.bf16 %v3661_v28, %v3658_v35  ;;  %12283 = vmatprep.mubr.msk.f32.mxu1 %vm13462_vm1, %v13458_v38 }
 0x372   : > { %12208 = vmatmul.mubr.msk.f32.vlgmr.msra.gmra.mrb[4].mxu0 %vm710_vm0, %v11570_v36  ;;  %v12678_v36 = vpack.c.bf16 %v3662_v34, %v3659_v33 }
 0x373   : > { %12645 = vmatpush3.bf16.msra.mxu0 %v12642_v31  ;;  %12214 = vmatprep.mubr.msk.f32.mxu0 %vm710_vm0, %v11573_v39  ;;  %v3655_v31 = vld [vmem:[%s15455_s24 + $0xd8] sm:$0xff]  ;;  %v3630_v39 = vld [vmem:[%s15455_s24 + $0x10] sm:$0xff] }
 0x374   : > { %12647 = vmatprep.subr.bf16.mxu0 %v12646_v37  ;;  %v12676_v32 = vpack.c.bf16 %v3655_v31, %v3652_v30 }
 0x375   : > { %v3611_v45 = vpop.permute.xlu1 %3610 }
 0x37a   : > { %12215 = vmatmul.mubr.msk.f32.vlgmr.msra.gmra.mrb[4].mxu0 %vm710_vm0, %v11574_v43  ;;  %v3616_v43 = vpop.permute.xlu0 %3615 }
 0x37b   : > { %12649 = vmatpush3.bf16.msra.mxu0 %v12646_v37  ;;  %12221 = vmatprep.mubr.msk.f32.mxu0 %vm710_vm0, %v11577_v48  ;;  %v3633_v37 = vld [vmem:[%s15455_s24 + $0x28] sm:$0xff] }
 0x37c   : > { %12651 = vmatprep.subr.bf16.mxu0 %v12650_v49  ;;  %v12682_v29 = vpack.c.bf16 %v3633_v37, %v3630_v39 }
 0x382   : > { %12222 = vmatmul.mubr.msk.f32.vlgmr.msra.gmra.mrb[4].mxu0 %vm710_vm0, %v11578_v54 }
 0x383   : > { %12653 = vmatpush3.bf16.msra.mxu0 %v12650_v49  ;;  %12228 = vmatprep.mubr.msk.f32.mxu0 %vm710_vm0, %v11581_v57  ;;  %v3636_v49 = vld [vmem:[%s15455_s24 + $0x40] sm:$0xff]  ;;  %v3642_v57 = vld [vmem:[%s15455_s24 + $0x70] sm:$0xff] }
 0x384   : > { %12655 = vmatprep.subr.bf16.mxu0 %v12654_v58  ;;  %v12686_v55 = vpack.c.bf16 %v3639_v52, %v3636_v49 }
 0x38a   : > { %12229 = vmatmul.mubr.msk.f32.vlgmr.msra.gmra.mrb[4].mxu0 %vm710_vm0, %v11582_v61  ;;  %v3648_v61 = vld [vmem:[%s15455_s24 + $0xa0] sm:$0xff] }
 0x38b   : > { %12657 = vmatpush3.bf16.msra.mxu0 %v12654_v58  ;;  %12235 = vmatprep.mubr.msk.f32.mxu0 %vm710_vm0, %v11585_v62  ;;  %v3645_v58 = vld [vmem:[%s15455_s24 + $0x88] sm:$0xff]  ;;  %v3651_v62 = vld [vmem:[%s15455_s24 + $0xb8] sm:$0xff] }
 0x38c   : > { %12659 = vmatprep.subr.bf16.mxu0 %v12658_v63  ;;  %v12690_v60 = vpack.c.bf16 %v3645_v58, %v3642_v57  ;;  %v12694_v63 = vpack.c.bf16 %v3651_v62, %v3648_v61  ;;  %v3836_v58 = vld [vmem:[%s15458_s12] sm:$0xff] }
 0x392   : > { %12236 = vmatmul.mubr.msk.f32.vlgmr.msra.gmra.mrb[4].mxu0 %vm710_vm0, %v11586_v6  ;;  %v12702_v6 = vpack.c.bf16 %v3663_v3, %v3660_v2 }
 0x393   : > { %12661 = vmatpush1.bf16.msra.mxu0 %v12660_v7  ;;  %3748 = vmatprep.mubr.f32.mxu0 %v13458_v38  ;;  %v3666_v7 = vld [vmem:[%s15455_s24 + $0x130] sm:$0xf] }
 0x394   : > { %12663 = vmatprep.subr.bf16.mxu0 %v12662_v8  ;;  %v14179_v8 = vld [vmem:[%s14123_s3 + $0x10] sm:$0xff]  ;;  %s15398_s3 = smov 110  }
 0x395   : > { %3876 = vrot.lane.b32.xlu1 %v14179_v8, %s15410_s28 }
 0x397   : > { %12665 = vmatpush1.bf16.msra.mxu0 %v12664_v13 }
 0x398   : > { %12667 = vmatprep.subr.bf16.mxu0 %v12666_v14  ;;  %v14192_v14 = vld [vmem:[%s15457_s13] sm:$0xff] }
 0x39b   : > { %12669 = vmatpush1.bf16.msra.mxu0 %v12668_v19 }
 0x39c   : > { %12671 = vmatprep.subr.bf16.mxu0 %v12670_v20 }
 0x39f   : > { %12673 = vmatpush1.bf16.msra.mxu0 %v12672_v25 }
 0x3a0   : > { %12675 = vmatprep.subr.bf16.mxu0 %v12674_v27 }
 0x3a3   : > { %12677 = vmatpush1.bf16.msra.mxu0 %v12676_v32  ;;  %v13464_v32 = vmov 0.0|0.0  }
 0x3a4   : > { %12679 = vmatprep.subr.bf16.mxu0 %v12678_v36  ;;  %12717 = vmatprep.subr.bf16.mxu1 %v13464_v32 }
 0x3a7   : > { %12681 = vmatpush1.bf16.msra.mxu0 %v12680_v4 }
 0x3a8   : > { %11589 = vmatprep.subr.msk.mxu0 %vm15418_vm10, %v3665_v5 }
 0x3ab   : > { %11590 = vmatpush1.msk.msra.mxu0 %vm15418_vm10, %v3664_v40 }
 0x3ac   : > { %12683 = vmatprep.subr.bf16.mxu0 %v12682_v29 }
 0x3d6   : > { %v14183_v11 = vpop.permute.xlu0 %3883 }
 0x3d8   : > { %v3882_v9 = vpop.permute.xlu1 %3881 }
 0x3d9   : > { %v3887_v13 = vsel %vm3861_vm14, %v3882_v9, %v14183_v11 }
 0x407   : > { %v3877_v10 = vpop.permute.xlu1 %3876 }
 0x408   : > { %v3892_v12 = vsel %vm3861_vm14, %v3877_v10, %v3882_v9 }
 0x465   : > { %v12237_v44 = vpop.f32.mrb[4].mxu0 }
 0x466   : > { %v3619_v46 = vadd.f32 %v12237_v44, %v3616_v43  ;;  %v3595_v47 = vpop.f32.mrb[5].mxu0  ;;  %v6891_v44 = vld [vmem:[%s15366_s14] sm:$0xff] }
 0x467   : > { %v3618_v48 = vadd.f32 %v3611_v45, %v3595_v47 }
 0x468   : > { %v3623_v50 = vmul.f32 0.01, %v3619_v46  ;;  %vm3621_vm12 = vcmp.ge.f32.partialorder %v3619_v46, 0.0 }
 0x469   : > { %vm3620_vm11 = vcmp.ge.f32.partialorder %v3618_v48, 0.0  ;;  %v3622_v51 = vmul.f32 0.01, %v3618_v48 }
 0x46a   : > { %v3625_v56 = vsel %vm3621_vm12, %v3619_v46, %v3623_v50  ;;  %vm15419_vm12 = vcmask 400384  }
 0x46b   : > { %v3624_v53 = vsel %vm3620_vm11, %v3618_v48, %v3622_v51  ;;  %v3627_v59 = vmul.f32 %v13914_v26, %v3625_v56  ;;  %vm6232_vm11 = vcmask 408576  }
 0x46c   : > { %v3626_v54 = vmul.f32 %v13914_v26, %v3624_v53  ;;  %v3654_v26 = vld [vmem:[%s15455_s24 + $0xd0] sm:$0xff] }
 0x46d   : > { %v12698_v1 = vpack.c.bf16 %v3657_v0, %v3654_v26 }
 0x46e   : > { %11591 = vmatmul.mubr.msk.f32.vlgmr.msra.gmra.mrb[6].mxu0 %vm3667_vm13, %v3626_v54 }
 0x46f   : > { %12685 = vmatpush3.bf16.msra.mxu0 %v12682_v29  ;;  %3754 = vmatprep.mubr.f32.mxu0 %v13458_v38 }
 0x470   : > { %12687 = vmatprep.subr.bf16.mxu0 %v12686_v55 }
 0x472   : > { %11592 = vmatmul.mubr.msk.f32.gmra.mrb[8].mxu0 %vm3667_vm13, %v3627_v59 }
 0x473   : > { %12689 = vmatpush3.bf16.msra.mxu0 %v12686_v55  ;;  %12264 = vmatprep.mubr.msk.f32.mxu0 %vm3667_vm13, %v3626_v54 }
 0x474   : > { %12691 = vmatprep.subr.bf16.mxu0 %v12690_v60 }
 0x477   : > { %12693 = vmatpush3.bf16.msra.mxu0 %v12690_v60 }
 0x478   : > { %12695 = vmatprep.subr.bf16.mxu0 %v12694_v63 }
 0x47b   : > { %12697 = vmatpush3.bf16.msra.mxu0 %v12694_v63 }
 0x47c   : > { %12699 = vmatprep.subr.bf16.mxu0 %v12698_v1 }
 0x47f   : > { %12701 = vmatpush3.bf16.msra.mxu0 %v12698_v1 }
 0x480   : > { %12703 = vmatprep.subr.bf16.mxu0 %v12702_v6 }
 0x483   : > { %12705 = vmatpush3.bf16.msra.mxu0 %v12702_v6 }
 0x484   : > { %12262 = vmatprep.subr.msk.mxu0 %vm15418_vm10, %v3666_v7 }
 0x487   : > { %12263 = vmatpush3.msk.msra.mxu0 %vm15418_vm10, %v3666_v7 }
 0x488   : > { %12265 = vmatmul.mubr.msk.f32.vlgmr.msra.gmra.mrb[10].mxu0 %vm3667_vm13, %v3627_v59  ;;  %3897 = vmatprep.subr.mxu0 %v3887_v13  ;;  %vm15420_vm13 = vcmask 891904  }
 0x489   : > { %3961 = vmatprep.mubr.f32.mxu0 %v13458_v38  ;;  %3898 = vmatpush1.msra.mxu0 %v3892_v12 }
 0x48a   : > { %12267 = vmatprep.subr.mxu0 %v13458_v38 }
 0x48c   : > { %11596 = vmatmul.mubr.msk.f32.vlgmr.msra.gmra.mrb[12].mxu0 %vm3893_vm15, %v14192_v14 }
 0x48d   : > { %12269 = vmatprep.mubr.msk.f32.mxu0 %vm13462_vm1, %v13458_v38 }
 0x541   : > { %v14194_v15 = vpop.f32.mrb[6].mxu0 }
 0x542   : > { %v14198_v16 = vpop.f32.mrb[7].mxu0 }
 0x543   : > { %v13267_v17 = vpack.i.bf16 %v14198_v16, %v14194_v15 }
 0x545   : > { %13268 = vrot.lane.b32.xlu0 %v13267_v17, %s15412_s23  ;;  %v14203_v18 = vpop.f32.mrb[8].mxu0 }
 0x546   : > { %v14205_v19 = vpop.f32.mrb[9].mxu0  ;;  %v14209_v20 = vpack.i.bf16 %v14203_v18, %v14194_v15  ;;  %v12736_v23 = vpack.c.bf16 %v14203_v18, %v14194_v15 }
 0x547   : > { %v13272_v21 = vpack.i.bf16 %v14205_v19, %v14203_v18  ;;  %v12734_v22 = vpack.c.bf16 %v14205_v19, %v14198_v16  ;;  %v14531_v18 = vld [vmem:[%s15458_s12 + $0x20] sm:$0xff] }
 0x549   : > { %13273 = vrot.lane.b32.xlu1 %v13272_v21, %s15412_s23 }
 0x54d   : > { %3885 = vrot.lane.b32.xlu1 %v14179_v8, %s15412_s23 }
 0x551   : > { %13278 = vrot.lane.b32.xlu1 %v13267_v17, %s15416_s26 }
 0x55b   : > { %v14225_v24 = vpop.f32.mrb[10].mxu0 }
 0x55c   : > { %v14227_v25 = vpop.f32.mrb[11].mxu0  ;;  %v14231_v27 = vpack.i.bf16 %v14225_v24, %v14205_v19 }
 0x55d   : > { %v13297_v30 = vpack.i.bf16 %v14225_v24, %v14227_v25  ;;  %v14237_v31 = vpack.i.bf16 %v14227_v25, %v14198_v16  ;;  %v12739_v33 = vpack.c.bf16 %v14225_v24, %v14227_v25 }
 0x55f   : > { %13298 = vrot.lane.b32.xlu1 %v13297_v30, %s15414_s4  ;;  %13283 = vrot.lane.b32.xlu0 %v13297_v30, %s15410_s28 }
 0x563   : > { %4369 = vrot.lane.b32.xlu1 %v14129_v42, %s15416_s26  ;;  %13288 = vrot.lane.b32.xlu0 %v13297_v30, %s15412_s23 }
 0x567   : > { %13303 = vrot.lane.b32.xlu1 %v13267_v17, %s15408_s30  ;;  %13293 = vrot.lane.b32.xlu0 %v13272_v21, %s15416_s26 }
 0x56b   : > { %13313 = vrot.lane.b32.xlu1 %v13297_v30, %s15406_s1  ;;  %4367 = vrot.lane.b32.xlu0 %v14126_v41, %s15416_s26 }
 0x56f   : > { %4713 = vrot.lane.b32.xlu1 %v14129_v42, %s15408_s30  ;;  %4364 = vrot.lane.b32.xlu0 %v14179_v8, %s15414_s4 }
 0x573   : > { %13318 = vrot.lane.b32.xlu1 %v13267_v17, %s15444_s0  ;;  %13308 = vrot.lane.b32.xlu0 %v13272_v21, %s15408_s30 }
 0x577   : > { %13328 = vrot.lane.b32.xlu1 %v13297_v30, %s15390_s22  ;;  %4711 = vrot.lane.b32.xlu0 %v14126_v41, %s15408_s30 }
 0x57b   : > { %5056 = vrot.lane.b32.xlu1 %v14129_v42, %s15444_s0  ;;  %4708 = vrot.lane.b32.xlu0 %v14179_v8, %s15406_s1 }
 0x57f   : > { %13333 = vrot.lane.b32.xlu1 %v14231_v27, %s15447_s5  ;;  %13323 = vrot.lane.b32.xlu0 %v13272_v21, %s15444_s0 }
 0x583   : > { %4371 = vrot.lane.b32.xlu1 %v14179_v8, %s15416_s26  ;;  %5054 = vrot.lane.b32.xlu0 %v14126_v41, %s15444_s0 }
 0x587   : > { %13343 = vrot.lane.b32.xlu1 %v13297_v30, %s15416_s26  ;;  %5051 = vrot.lane.b32.xlu0 %v14179_v8, %s15390_s22  ;;  %s15400_s22 = smov 51  }
 0x58b   : > { %5696 = vrot.lane.b32.xlu1 %v14129_v42, %s15447_s5  ;;  %13338 = vrot.lane.b32.xlu0 %v14209_v20, %s15447_s5 }
 0x58f   : > { %4715 = vrot.lane.b32.xlu1 %v14179_v8, %s15408_s30  ;;  %5698 = vrot.lane.b32.xlu0 %v14179_v8, %s15447_s5 }
 0x593   : > { %5694 = vrot.lane.b32.xlu1 %v14126_v41, %s15447_s5  ;;  %13353 = vrot.lane.b32.xlu0 %v14237_v31, %s15447_s5 }
 0x597   : > { %13348 = vrot.lane.b32.xlu1 %v14231_v27, %s15394_s29  ;;  %13358 = vrot.lane.b32.xlu0 %v14209_v20, %s15394_s29 }
 0x59b   : > { %5058 = vrot.lane.b32.xlu1 %v14179_v8, %s15444_s0  ;;  %13363 = vrot.lane.b32.xlu0 %v13297_v30, %s15408_s30 }
 0x59f   : > { %6043 = vrot.lane.b32.xlu1 %v14179_v8, %s15394_s29  ;;  %13368 = vrot.lane.b32.xlu0 %v13297_v30, %s15444_s0 }
 0x5a3   : > { %6039 = vrot.lane.b32.xlu1 %v14126_v41, %s15394_s29  ;;  %13373 = vrot.lane.b32.xlu0 %v14237_v31, %s15394_s29 }
 0x5a7   : > { %13383 = vrot.lane.b32.xlu1 %v14231_v27, %s15398_s3  ;;  %6041 = vrot.lane.b32.xlu0 %v14129_v42, %s15394_s29  ;;  %s15396_s29 = smov 50  }
 0x5ab   : > { %5705 = vrot.lane.b32.xlu1 %v14126_v41, %s15392_s27  ;;  %13378 = vrot.lane.b32.xlu0 %v14209_v20, %s15392_s27  ;;  %s15404_s27 = smov 109  }
 0x5af   : > { %6386 = vrot.lane.b32.xlu1 %v14129_v42, %s15398_s3  ;;  %13388 = vrot.lane.b32.xlu0 %v14209_v20, %s15398_s3 }
 0x5b3   : > { %6050 = vrot.lane.b32.xlu1 %v14126_v41, %s15400_s22  ;;  %13393 = vrot.lane.b32.xlu0 %v14237_v31, %s15398_s3 }
 0x5b7   : > { %6384 = vrot.lane.b32.xlu1 %v14126_v41, %s15398_s3  ;;  %13398 = vrot.lane.b32.xlu0 %v14209_v20, %s15400_s22  ;;  %v13269_v34 = vpop.permute.xlu0 %13268  ;;  %s15402_s22 = smov 49  }
 0x5b8   : > { %v13271_v35 = vunpack.i.h.bf16 %v13269_v34  ;;  %v13270_v36 = vunpack.i.l.bf16 %v13269_v34 }
 0x5ba   : > { %v3862_v39 = vsel %vm3861_vm14, %v13270_v36, %v13271_v35 }
 0x5bb   : > { %13408 = vrot.lane.b32.xlu1 %v14231_v27, %s15404_s27  ;;  %6388 = vrot.lane.b32.xlu0 %v14179_v8, %s15398_s3  ;;  %v13274_v28 = vpop.permute.xlu1 %13273  ;;  %s15463_s3 = smov 51  }
 0x5bc   : > { %v13276_v4 = vunpack.i.h.bf16 %v13274_v28  ;;  %v13275_v5 = vunpack.i.l.bf16 %v13274_v28 }
 0x5be   : > { %v3864_v37 = vsel %vm3861_vm14, %v13275_v5, %v13276_v4 }
 0x5bf   : > { %6395 = vrot.lane.b32.xlu1 %v14126_v41, %s15396_s29  ;;  %13403 = vrot.lane.b32.xlu0 %v14209_v20, %s15396_s29  ;;  %v3886_v40 = vpop.permute.xlu1 %3885  ;;  %v12706_v29 = vpack.c.bf16 %v3864_v37, %v3862_v39  ;;  %s15462_s29 = smov 67  }
 0x5c0   : > { %v3888_v43 = vsel %vm3861_vm14, %v14183_v11, %v3886_v40 }
 0x5c1   : > { %12268 = vmatpush3.msra.mxu0 %v3888_v43 }
 0x5c2   : > { %12707 = vmatprep.subr.bf16.mxu0 %v12706_v29  ;;  %12270 = vmatmul.mubr.msk.f32.vlgmr.msra.gmra.mrb[14].mxu0 %vm3893_vm15, %v14192_v14  ;;  %v14412_v29 = vld [vmem:[%s15457_s13 + $0x8] sm:$0xff] }
 0x5c3   : > { %6731 = vrot.lane.b32.xlu1 %v14129_v42, %s15404_s27  ;;  %13413 = vrot.lane.b32.xlu0 %v14237_v31, %s15404_s27  ;;  %v14349_v45 = vpop.permute.xlu1 %13278 }
 0x5c4   : > { %4105 = vmatprep.mubr.f32.mxu0 %v13458_v38  ;;  %v13281_v57 = vunpack.i.h.bf16 %v14349_v45  ;;  %v13280_v59 = vunpack.i.l.bf16 %v14349_v45  ;;  %v14476_v45 = vld [vmem:[%s15458_s12 + $0x18] sm:$0xff] }
 0x5c6   : > { %v4203_v9 = vsel %vm4202_vm2, %v13280_v59, %v13281_v57 }
 0x5c7   : > { %6729 = vrot.lane.b32.xlu1 %v14126_v41, %s15404_s27  ;;  %13418 = vrot.lane.b32.xlu0 %v14209_v20, %s15404_s27 }
 0x5cb   : > { %6894 = vperm.xlu1 %13186, %v6891_v44   ;;  %13423 = vrot.lane.b32.xlu0 %v14209_v20, %s15402_s22  ;;  %v14391_v20 = vld [vmem:[%s15458_s12 + $0x8] sm:$0xff] }
 0x5cf   : > { %6733 = vrot.lane.b32.xlu0 %v14179_v8, %s15404_s27  ;;  %s15461_s27 = smov 111  }
 0x5d1   : > { %v13299_v46 = vpop.permute.xlu1 %13298  ;;  %v13284_v47 = vpop.permute.xlu0 %13283 }
 0x5d2   : > { %v13286_v48 = vunpack.i.h.bf16 %v13284_v47  ;;  %v13285_v49 = vunpack.i.l.bf16 %v13284_v47  ;;  %v13300_v60 = vunpack.i.l.bf16 %v13299_v46  ;;  %v13301_v1 = vunpack.i.h.bf16 %v13299_v46 }
 0x5d3   : > { %6740 = vrot.lane.b32.xlu0 %v14126_v41, %s15402_s22  ;;  %s15460_s22 = smov 61  }
 0x5d4   : > { %v3873_v50 = vsel %vm3861_vm14, %v13286_v48, %v13275_v5  ;;  %v3872_v51 = vsel %vm3861_vm14, %v13285_v49, %v13270_v36  ;;  %v4213_v6 = vsel %vm4202_vm2, %v13300_v60, %v13280_v59 }
 0x5d5   : > { %v14357_v52 = vpop.permute.xlu1 %4369  ;;  %v13289_v53 = vpop.permute.xlu0 %13288  ;;  %v12708_v54 = vpack.c.bf16 %v3873_v50, %v3872_v51 }
 0x5d6   : > { %v13291_v55 = vunpack.i.h.bf16 %v13289_v53  ;;  %v13290_v56 = vunpack.i.l.bf16 %v13289_v53 }
 0x5d7   : > { %12709 = vmatpush1.bf16.msra.mxu0 %v12708_v54 }
 0x5d8   : > { %v3865_v61 = vsel %vm3861_vm14, %v13276_v4, %v13291_v55  ;;  %v3863_v62 = vsel %vm3861_vm14, %v13271_v35, %v13290_v56  ;;  %12710 = vmatprep.subr.bf16.mxu0 %v13464_v32  ;;  %v14432_v56 = vld [vmem:[%s15458_s12 + $0x10] sm:$0xff] }
 0x5d9   : > { %v14367_v63 = vpop.permute.xlu1 %13303  ;;  %v14369_v26 = vpop.permute.xlu0 %13293  ;;  %v12711_v0 = vpack.c.bf16 %v3865_v61, %v3863_v62 }
 0x5da   : > { %v13296_v2 = vunpack.i.h.bf16 %v14369_v26  ;;  %v13295_v3 = vunpack.i.l.bf16 %v14369_v26  ;;  %11598 = vmatmul.mubr.msk.f32.vlgmr.msra.gmra.mrb[12].mxu0 %vm710_vm0, %v3836_v58  ;;  %v13306_v31 = vunpack.i.h.bf16 %v14367_v63  ;;  %v13305_v34 = vunpack.i.l.bf16 %v14367_v63 }
 0x5db   : > { %12712 = vmatpush3.bf16.msra.mxu0 %v12711_v0  ;;  %12276 = vmatprep.mubr.msk.f32.mxu0 %vm13462_vm1, %v13458_v38 }
 0x5dc   : > { %v4214_v7 = vsel %vm4202_vm2, %v13301_v1, %v13295_v3  ;;  %v4205_v10 = vsel %vm4202_vm2, %v13295_v3, %v13296_v2  ;;  %v4547_v43 = vsel %vm4546_vm3, %v13305_v34, %v13306_v31 }
 0x5dd   : > { %v13314_v11 = vpop.permute.xlu1 %13313  ;;  %v4368_v12 = vpop.permute.xlu0 %4367  ;;  %v12713_v13 = vpack.c.bf16 %v4205_v10, %v4203_v9  ;;  %v12715_v14 = vpack.c.bf16 %v4214_v7, %v4213_v6 }
 0x5de   : > { %12277 = vmatmul.mubr.msk.f32.vlgmr.msra.gmra.mrb[16].mxu0 %vm710_vm0, %v3836_v58  ;;  %v4373_v17 = vsel %vm4202_vm2, %v4368_v12, %v14357_v52  ;;  %v13315_v35 = vunpack.i.l.bf16 %v13314_v11  ;;  %v13316_v4 = vunpack.i.h.bf16 %v13314_v11 }
 0x5df   : > { %12714 = vmatprep.subr.bf16.mxu0 %v12713_v13  ;;  %4282 = vmatprep.mubr.f32.mxu0 %v13458_v38 }
 0x5e0   : > { %12716 = vmatpush1.bf16.msra.mxu0 %v12715_v14  ;;  %v4557_v37 = vsel %vm4546_vm3, %v13315_v35, %v13305_v34 }
 0x5e1   : > { %v14393_v21 = vpop.permute.xlu1 %4713  ;;  %v4365_v27 = vpop.permute.xlu0 %4364  ;;  %4382 = vmatprep.subr.mxu0 %v4373_v17 }
 0x5e2   : > { %v4378_v30 = vsel %vm4202_vm2, %v4365_v27, %v4368_v12  ;;  %v14454_v12 = vld [vmem:[%s15457_s13 + $0x10] sm:$0xff] }
 0x5e3   : > { %11601 = vmatmul.mubr.msk.f32.vlgmr.msra.gmra.mrb[12].mxu0 %vm710_vm0, %v14391_v20 }
 0x5e4   : > { %4383 = vmatpush1.msra.mxu0 %v4378_v30  ;;  %4446 = vmatprep.mubr.f32.mxu0 %v13458_v38 }
 0x5e5   : > { %v14401_v36 = vpop.permute.xlu1 %13318  ;;  %v14403_v28 = vpop.permute.xlu0 %13308 }
 0x5e6   : > { %v13311_v5 = vunpack.i.h.bf16 %v14403_v28  ;;  %v13310_v39 = vunpack.i.l.bf16 %v14403_v28  ;;  %v13321_v54 = vunpack.i.h.bf16 %v14401_v36  ;;  %v13320_v55 = vunpack.i.l.bf16 %v14401_v36 }
 0x5e8   : > { %v4558_v40 = vsel %vm4546_vm3, %v13316_v4, %v13310_v39  ;;  %v4549_v44 = vsel %vm4546_vm3, %v13310_v39, %v13311_v5  ;;  %v4890_v0 = vsel %vm1481_vm5, %v13320_v55, %v13321_v54 }
 0x5e9   : > { %v13329_v46 = vpop.permute.xlu1 %13328  ;;  %v4712_v47 = vpop.permute.xlu0 %4711  ;;  %v12720_v48 = vpack.c.bf16 %v4549_v44, %v4547_v43  ;;  %v12722_v49 = vpack.c.bf16 %v4558_v40, %v4557_v37 }
 0x5ea   : > { %v4717_v50 = vsel %vm4546_vm3, %v4712_v47, %v14393_v21  ;;  %v13331_v3 = vunpack.i.h.bf16 %v13329_v46  ;;  %v13330_v6 = vunpack.i.l.bf16 %v13329_v46 }
 0x5eb   : > { %11604 = vmatmul.mubr.msk.f32.vlgmr.msra.gmra.mrb[12].mxu0 %vm3893_vm15, %v14412_v29  ;;  %12721 = vmatprep.subr.bf16.mxu0 %v12720_v48 }
 0x5ec   : > { %12723 = vmatpush1.bf16.msra.mxu0 %v12722_v49  ;;  %4626 = vmatprep.mubr.f32.mxu0 %v13458_v38  ;;  %v4900_v13 = vsel %vm1481_vm5, %v13330_v6, %v13320_v55 }
 0x5ed   : > { %v14425_v51 = vpop.permute.xlu1 %5056  ;;  %v4709_v53 = vpop.permute.xlu0 %4708  ;;  %4726 = vmatprep.subr.mxu0 %v4717_v50 }
 0x5ee   : > { %v4722_v58 = vsel %vm4546_vm3, %v4709_v53, %v4712_v47 }
 0x5f1   : > { %v14435_v59 = vpop.permute.xlu1 %13333  ;;  %v14437_v60 = vpop.permute.xlu0 %13323 }
 0x5f2   : > { %v13326_v61 = vunpack.i.h.bf16 %v14437_v60  ;;  %v13325_v62 = vunpack.i.l.bf16 %v14437_v60  ;;  %v13336_v49 = vunpack.i.h.bf16 %v14435_v59  ;;  %v13335_v50 = vunpack.i.l.bf16 %v14435_v59  ;;  %v11627_v59 = vld [vmem:[%s15457_s13 + $0x28] sm:$0xff] }
 0x5f3   : > { %11607 = vmatmul.mubr.msk.f32.vlgmr.msra.gmra.mrb[12].mxu0 %vm710_vm0, %v14432_v56 }
 0x5f4   : > { %4727 = vmatpush1.msra.mxu0 %v4722_v58  ;;  %v4892_v1 = vsel %vm1481_vm5, %v13325_v62, %v13326_v61  ;;  %4790 = vmatprep.mubr.f32.mxu0 %v13458_v38  ;;  %v4901_v11 = vsel %vm1481_vm5, %v13331_v3, %v13325_v62 }
 0x5f5   : > { %v4372_v7 = vpop.permute.xlu1 %4371  ;;  %v5055_v9 = vpop.permute.xlu0 %5054  ;;  %v12727_v10 = vpack.c.bf16 %v4892_v1, %v4890_v0  ;;  %v12729_v34 = vpack.c.bf16 %v4901_v11, %v4900_v13 }
 0x5f6   : > { %v5060_v35 = vsel %vm1481_vm5, %v5055_v9, %v14425_v51  ;;  %v4374_v44 = vsel %vm4202_vm2, %v14357_v52, %v4372_v7  ;;  %v14505_v52 = vld [vmem:[%s15457_s13 + $0x18] sm:$0xff] }
 0x5f7   : > { %12728 = vmatprep.subr.bf16.mxu0 %v12727_v10 }
 0x5f9   : > { %v13344_v14 = vpop.permute.xlu1 %13343  ;;  %v5052_v17 = vpop.permute.xlu0 %5051 }
 0x5fa   : > { %v13346_v27 = vunpack.i.h.bf16 %v13344_v14  ;;  %v13345_v30 = vunpack.i.l.bf16 %v13344_v14 }
 0x5fb   : > { %11610 = vmatmul.mubr.msk.f32.vlgmr.msra.gmra.mrb[12].mxu0 %vm3893_vm15, %v14454_v12 }
 0x5fc   : > { %v4204_v4 = vsel %vm4202_vm2, %v13281_v57, %v13345_v30  ;;  %v4206_v39 = vsel %vm4202_vm2, %v13296_v2, %v13346_v27  ;;  %12730 = vmatpush1.bf16.msra.mxu0 %v12729_v34  ;;  %4969 = vmatprep.mubr.f32.mxu0 %v13458_v38  ;;  %v5065_v57 = vsel %vm1481_vm5, %v5052_v17, %v5055_v9 }
 0x5fd   : > { %v14468_v37 = vpop.permute.xlu1 %5696  ;;  %v14470_v40 = vpop.permute.xlu0 %13338  ;;  %v12718_v43 = vpack.c.bf16 %v4206_v39, %v4204_v4  ;;  %5069 = vmatprep.subr.mxu0 %v5060_v35  ;;  %v11624_v4 = vld [vmem:[%s15458_s12 + $0x28] sm:$0xff] }
 0x5fe   : > { %v13340_v3 = vunpack.i.l.bf16 %v14470_v40 }
 0x5ff   : > { %12719 = vmatpush3.bf16.msra.mxu1 %v12718_v43 }
 0x600   : > { %12286 = vmatprep.subr.mxu1 %v13458_v38 }
 0x601   : > { %v4716_v26 = vpop.permute.xlu1 %4715  ;;  %v14479_v2 = vpop.permute.xlu0 %5698 }
 0x602   : > { %12284 = vmatmul.mubr.msk.f32.vlgmr.msra.gmra.mrb[2].mxu1 %vm710_vm0, %v14391_v20  ;;  %v4718_v9 = vsel %vm4546_vm3, %v14393_v21, %v4716_v26  ;;  %v11621_v21 = vld [vmem:[%s15457_s13 + $0x20] sm:$0xff]  ;;  %v5701_v17 = vsel %vm5525_vm4, %v14468_v37, %v14479_v2 }
 0x603   : > { %12287 = vmatpush3.msra.mxu1 %v4374_v44  ;;  %11613 = vmatmul.mubr.msk.f32.vlgmr.msra.gmra.mrb[12].mxu0 %vm710_vm0, %v14476_v45 }
 0x604   : > { %5070 = vmatpush1.msra.mxu0 %v5065_v57  ;;  %12288 = vmatprep.mubr.msk.f32.mxu1 %vm13462_vm1, %v13458_v38 }
 0x605   : > { %12735 = vmatprep.subr.bf16.mxu0 %v12734_v22  ;;  %v14492_v46 = vpop.permute.xlu1 %5694  ;;  %v14494_v47 = vpop.permute.xlu0 %13353  ;;  %5133 = vmatprep.mubr.f32.mxu0 %v13458_v38 }
 0x606   : > { %12289 = vmatmul.mubr.msk.f32.vlgmr.msra.gmra.mrb[4].mxu1 %vm3893_vm15, %v14412_v29  ;;  %12724 = vmatprep.subr.bf16.mxu1 %v13464_v32  ;;  %v13356_v22 = vunpack.i.h.bf16 %v14494_v47  ;;  %v13355_v20 = vunpack.i.l.bf16 %v14494_v47  ;;  %v5700_v57 = vsel %vm5525_vm4, %v14492_v46, %v14468_v37 }
 0x607   : > { %12295 = vmatprep.mubr.msk.f32.mxu1 %vm13462_vm1, %v13458_v38 }
 0x608   : > { %v5526_v11 = vsel %vm5525_vm4, %v13340_v3, %v13355_v20 }
 0x609   : > { %v14507_v16 = vpop.permute.xlu1 %13348  ;;  %v14509_v19 = vpop.permute.xlu0 %13358 }
 0x60a   : > { %v13351_v30 = vunpack.i.h.bf16 %v14507_v16  ;;  %v13350_v34 = vunpack.i.l.bf16 %v14507_v16  ;;  %v13360_v16 = vunpack.i.l.bf16 %v14509_v19 }
 0x60b   : > { %11616 = vmatmul.mubr.msk.f32.vlgmr.msra.gmra.mrb[12].mxu0 %vm3893_vm15, %v14505_v52 }
 0x60c   : > { %12737 = vmatpush1.bf16.msra.mxu0 %v12736_v23  ;;  %5282 = vmatprep.mubr.f32.mxu0 %v13458_v38 }
 0x60d   : > { %v5059_v29 = vpop.permute.xlu1 %5058  ;;  %v13364_v48 = vpop.permute.xlu0 %13363  ;;  %5367 = vmatprep.subr.mxu0 %v14129_v42  ;;  %v5527_v42 = vsel %vm5525_vm4, %v13355_v20, %v13356_v22 }
 0x60e   : > { %v13366_v53 = vunpack.i.h.bf16 %v13364_v48  ;;  %v13365_v55 = vunpack.i.l.bf16 %v13364_v48  ;;  %v5061_v35 = vsel %vm1481_vm5, %v14425_v51, %v5059_v29 }
 0x610   : > { %v4548_v58 = vsel %vm4546_vm3, %v13306_v31, %v13365_v55  ;;  %v4550_v15 = vsel %vm4546_vm3, %v13311_v5, %v13366_v53  ;;  %v5529_v31 = vsel %vm5525_vm4, %v13335_v50, %v13336_v49  ;;  %v13341_v5 = vunpack.i.h.bf16 %v14470_v40 }
 0x611   : > { %v14536_v23 = vpop.permute.xlu1 %6043  ;;  %v13369_v62 = vpop.permute.xlu0 %13368  ;;  %v12725_v0 = vpack.c.bf16 %v4550_v15, %v4548_v58  ;;  %v12741_v28 = vpack.c.bf16 %v5529_v31, %v5527_v42 }
 0x612   : > { %v13371_v63 = vunpack.i.h.bf16 %v13369_v62  ;;  %v13370_v1 = vunpack.i.l.bf16 %v13369_v62  ;;  %v5528_v36 = vsel %vm5525_vm4, %v13341_v5, %v13335_v50 }
 0x613   : > { %12726 = vmatpush3.bf16.msra.mxu1 %v12725_v0  ;;  %11619 = vmatmul.mubr.msk.f32.vlgmr.msra.gmra.mrb[12].mxu0 %vm710_vm0, %v14531_v18 }
 0x614   : > { %5368 = vmatpush1.msra.mxu0 %v14126_v41  ;;  %12298 = vmatprep.subr.mxu1 %v13458_v38  ;;  %v4891_v41 = vsel %vm1481_vm5, %v13321_v54, %v13370_v1  ;;  %v4893_v10 = vsel %vm1481_vm5, %v13326_v61, %v13371_v63 }
 0x615   : > { %12742 = vmatprep.subr.bf16.mxu0 %v12741_v28  ;;  %v14547_v6 = vpop.permute.xlu1 %6039  ;;  %v14549_v7 = vpop.permute.xlu0 %13373  ;;  %5431 = vmatprep.mubr.f32.mxu0 %v13458_v38  ;;  %v12732_v61 = vpack.c.bf16 %v4893_v10, %v4891_v41 }
 0x616   : > { %12296 = vmatmul.mubr.msk.f32.vlgmr.msra.gmra.mrb[6].mxu1 %vm710_vm0, %v14432_v56  ;;  %v12743_v56 = vpack.c.bf16 %v5528_v36, %v5526_v11  ;;  %v13376_v13 = vunpack.i.h.bf16 %v14549_v7  ;;  %v13375_v14 = vunpack.i.l.bf16 %v14549_v7 }
 0x617   : > { %12299 = vmatpush3.msra.mxu1 %v4718_v9  ;;  %12300 = vmatprep.mubr.msk.f32.mxu1 %vm13462_vm1, %v13458_v38 }
 0x618   : > { %12731 = vmatprep.subr.bf16.mxu1 %v13464_v32  ;;  %v5872_v51 = vsel %vm5870_vm6, %v13375_v14, %v13376_v13 }
 0x619   : > { %v14570_v54 = vpop.permute.xlu1 %13383  ;;  %v14572_v60 = vpop.permute.xlu0 %6041 }
 0x61a   : > { %12301 = vmatmul.mubr.msk.f32.vlgmr.msra.gmra.mrb[8].mxu1 %vm3893_vm15, %v14454_v12  ;;  %v13386_v53 = vunpack.i.h.bf16 %v14570_v54  ;;  %v13385_v58 = vunpack.i.l.bf16 %v14570_v54  ;;  %v6045_v3 = vsel %vm5870_vm6, %v14547_v6, %v14572_v60 }
 0x61b   : > { %12733 = vmatpush3.bf16.msra.mxu1 %v12732_v61  ;;  %11622 = vmatmul.mubr.msk.f32.vlgmr.msra.gmra.mrb[12].mxu0 %vm3893_vm15, %v11621_v21 }
 0x61c   : > { %12744 = vmatpush1.bf16.msra.mxu0 %v12743_v56  ;;  %12307 = vmatprep.mubr.msk.f32.mxu1 %vm13462_vm1, %v13458_v38  ;;  %v6219_v5 = vsel %vm6215_vm9, %v13385_v58, %v13386_v53 }
 0x61d   : > { %5712 = vmatprep.subr.mxu0 %v5701_v17  ;;  %v14584_v27 = vpop.permute.xlu1 %5705  ;;  %v13379_v12 = vpop.permute.xlu0 %13378  ;;  %12310 = vmatprep.subr.mxu1 %v13458_v38 }
 0x61e   : > { %12308 = vmatmul.mubr.msk.f32.vlgmr.msra.gmra.mrb[10].mxu1 %vm710_vm0, %v14476_v45  ;;  %5612 = vmatprep.mubr.f32.mxu0 %v13458_v38  ;;  %v13381_v40 = vunpack.i.h.bf16 %v13379_v12  ;;  %v13380_v43 = vunpack.i.l.bf16 %v13379_v12  ;;  %v5874_v45 = vsel %vm5870_vm6, %v13350_v34, %v13351_v30  ;;  %v5708_v15 = vsel %vm5542_vm7, %v14479_v2, %v14584_v27  ;;  %v11630_v2 = vld [vmem:[%s15458_s12 + $0x30] sm:$0xff]  ;;  %v11636_v27 = vld [vmem:[%s15458_s12 + $0x38] sm:$0xff] }
 0x61f   : > { %12311 = vmatpush3.msra.mxu1 %v5061_v35  ;;  %12312 = vmatprep.mubr.msk.f32.mxu1 %vm13462_vm1, %v13458_v38  ;;  %v12748_v44 = vpack.c.bf16 %v5874_v45, %v5872_v51 }
 0x620   : > { %12738 = vmatprep.subr.bf16.mxu1 %v13464_v32  ;;  %v5544_v24 = vsel %vm5542_vm7, %v13336_v49, %v13381_v40  ;;  %v5543_v25 = vsel %vm5542_vm7, %v13356_v22, %v13380_v43  ;;  %v11639_v43 = vld [vmem:[%s15457_s13 + $0x38] sm:$0xff] }
 0x621   : > { %v14603_v39 = vpop.permute.xlu0 %13388  ;;  %v14611_v26 = vpop.permute.xlu1 %6386  ;;  %v12746_v22 = vpack.c.bf16 %v5544_v24, %v5543_v25 }
 0x622   : > { %12313 = vmatmul.mubr.msk.f32.vlgmr.msra.gmra.mrb[12].mxu1 %vm3893_vm15, %v14505_v52  ;;  %v13361_v52 = vunpack.i.h.bf16 %v14509_v19  ;;  %v13391_v9 = vunpack.i.h.bf16 %v14603_v39  ;;  %v13390_v41 = vunpack.i.l.bf16 %v14603_v39 }
 0x623   : > { %12740 = vmatpush3.bf16.msra.mxu1 %v12739_v33  ;;  %11625 = vmatmul.mubr.msk.f32.vlgmr.msra.gmra.mrb[12].mxu0 %vm710_vm0, %v11624_v4  ;;  %v5871_v33 = vsel %vm5870_vm6, %v13360_v16, %v13375_v14 }
 0x624   : > { %5713 = vmatpush1.msra.mxu0 %v5700_v57  ;;  %12319 = vmatprep.mubr.msk.f32.mxu1 %vm13462_vm1, %v13458_v38  ;;  %v5873_v46 = vsel %vm5870_vm6, %v13361_v52, %v13350_v34 }
 0x625   : > { %12749 = vmatprep.subr.bf16.mxu0 %v12748_v44  ;;  %v14621_v37 = vpop.permute.xlu0 %13393  ;;  %12322 = vmatprep.subr.mxu1 %v13458_v38  ;;  %v6051_v47 = vpop.permute.xlu1 %6050  ;;  %v12750_v48 = vpack.c.bf16 %v5873_v46, %v5871_v33 }
 0x626   : > { %12320 = vmatmul.mubr.msk.f32.vlgmr.msra.gmra.mrb[14].mxu1 %vm710_vm0, %v14531_v18  ;;  %5776 = vmatprep.mubr.f32.mxu0 %v13458_v38  ;;  %v13396_v49 = vunpack.i.h.bf16 %v14621_v37  ;;  %v13395_v50 = vunpack.i.l.bf16 %v14621_v37 }
 0x627   : > { %12323 = vmatpush3.msra.mxu1 %v14179_v8  ;;  %12324 = vmatprep.mubr.msk.f32.mxu1 %vm13462_vm1, %v13458_v38  ;;  %v6046_v8 = vsel %vm5870_vm6, %v14572_v60, %v14536_v23  ;;  %v11633_v60 = vld [vmem:[%s15457_s13 + $0x30] sm:$0xff] }
 0x628   : > { %12745 = vmatprep.subr.bf16.mxu1 %v13464_v32  ;;  %v6217_v0 = vsel %vm6215_vm9, %v13395_v50, %v13396_v49  ;;  %v6216_v54 = vsel %vm6215_vm9, %v13390_v41, %v13395_v50 }
 0x629   : > { %v13399_v19 = vpop.permute.xlu0 %13398  ;;  %v14663_v62 = vpop.permute.xlu1 %6384  ;;  %v12755_v7 = vpack.c.bf16 %v6219_v5, %v6217_v0 }
 0x62a   : > { %v13401_v20 = vunpack.i.h.bf16 %v13399_v19  ;;  %v13400_v29 = vunpack.i.l.bf16 %v13399_v19  ;;  %12325 = vmatmul.mubr.msk.f32.vlgmr.msra.gmra.mrb[16].mxu1 %vm3893_vm15, %v11621_v21  ;;  %v6053_v21 = vsel %vm5887_vm8, %v14536_v23, %v6051_v47  ;;  %v6218_v23 = vsel %vm6215_vm9, %v13391_v9, %v13385_v58 }
 0x62b   : > { %12747 = vmatpush3.bf16.msra.mxu1 %v12746_v22  ;;  %11628 = vmatmul.mubr.msk.f32.vlgmr.msra.gmra.mrb[12].mxu0 %vm3893_vm15, %v11627_v59  ;;  %v12757_v14 = vpack.c.bf16 %v6218_v23, %v6216_v54  ;;  %v6390_v24 = vsel %vm6215_vm9, %v14663_v62, %v14611_v26  ;;  %v11645_v22 = vld [vmem:[%s15457_s13 + $0x40] sm:$0xff] }
 0x62c   : > { %12751 = vmatpush1.bf16.msra.mxu0 %v12750_v48  ;;  %12331 = vmatprep.mubr.msk.f32.mxu1 %vm13462_vm1, %v13458_v38  ;;  %v5889_v18 = vsel %vm5887_vm8, %v13351_v30, %v13401_v20  ;;  %v5888_v42 = vsel %vm5887_vm8, %v13376_v13, %v13400_v29 }
 0x62d   : > { %6057 = vmatprep.subr.mxu0 %v6046_v8  ;;  %v6389_v55 = vpop.permute.xlu0 %6388  ;;  %12334 = vmatprep.subr.mxu1 %v13458_v38  ;;  %v12753_v1 = vpack.c.bf16 %v5889_v18, %v5888_v42  ;;  %v14682_v10 = vpop.permute.xlu1 %13408 }
 0x62e   : > { %12332 = vmatmul.mubr.msk.f32.vlgmr.msra.gmra.mrb[18].mxu1 %vm710_vm0, %v11624_v4  ;;  %5957 = vmatprep.mubr.f32.mxu0 %v13458_v38  ;;  %v6391_v17 = vsel %vm6215_vm9, %v14611_v26, %v6389_v55  ;;  %v13411_v4 = vunpack.i.h.bf16 %v14682_v10  ;;  %v13410_v51 = vunpack.i.l.bf16 %v14682_v10 }
 0x62f   : > { %12335 = vmatpush3.msra.mxu1 %v5708_v15  ;;  %12336 = vmatprep.mubr.msk.f32.mxu1 %vm13462_vm1, %v13458_v38 }
 0x630   : > { %12752 = vmatprep.subr.bf16.mxu1 %v13464_v32  ;;  %v6564_v37 = vsel %vm15420_vm13, %v13410_v51, %v13411_v4 }
 0x631   : > { %v13404_v63 = vpop.permute.xlu0 %13403  ;;  %v6396_v13 = vpop.permute.xlu1 %6395 }
 0x632   : > { %v13406_v31 = vunpack.i.h.bf16 %v13404_v63  ;;  %v13405_v28 = vunpack.i.l.bf16 %v13404_v63  ;;  %12337 = vmatmul.mubr.msk.f32.vlgmr.msra.gmra.mrb[20].mxu1 %vm3893_vm15, %v11627_v59  ;;  %v6398_v34 = vsel %vm6232_vm11, %v6389_v55, %v6396_v13 }
 0x633   : > { %12754 = vmatpush3.bf16.msra.mxu1 %v12753_v1  ;;  %11631 = vmatmul.mubr.msk.f32.vlgmr.msra.gmra.mrb[12].mxu0 %vm710_vm0, %v11630_v2 }
 0x634   : > { %6058 = vmatpush1.msra.mxu0 %v6045_v3  ;;  %12343 = vmatprep.mubr.msk.f32.mxu1 %vm13462_vm1, %v13458_v38  ;;  %v6234_v6 = vsel %vm6232_vm11, %v13386_v53, %v13406_v31  ;;  %v6233_v36 = vsel %vm6232_vm11, %v13396_v49, %v13405_v28 }
 0x635   : > { %12756 = vmatprep.subr.bf16.mxu0 %v12755_v7  ;;  %v14684_v11 = vpop.permute.xlu0 %13413  ;;  %12346 = vmatprep.subr.mxu1 %v13458_v38  ;;  %v12760_v56 = vpack.c.bf16 %v6234_v6, %v6233_v36  ;;  %v6732_v20 = vpop.permute.xlu1 %6731 }
 0x636   : > { %12344 = vmatmul.mubr.msk.f32.vlgmr.msra.gmra.mrb[22].mxu1 %vm710_vm0, %v11630_v2  ;;  %6121 = vmatprep.mubr.f32.mxu0 %v13458_v38  ;;  %v13416_v12 = vunpack.i.h.bf16 %v14684_v11  ;;  %v13415_v30 = vunpack.i.l.bf16 %v14684_v11 }
 0x637   : > { %12347 = vmatpush3.msra.mxu1 %v6053_v21  ;;  %12348 = vmatprep.mubr.msk.f32.mxu1 %vm13462_vm1, %v13458_v38 }
 0x638   : > { %12759 = vmatprep.subr.bf16.mxu1 %v13464_v32  ;;  %v6562_v44 = vsel %vm15420_vm13, %v13415_v30, %v13416_v12 }
 0x639   : > { %v13419_v61 = vpop.permute.xlu0 %13418  ;;  %v12762_v59 = vpack.c.bf16 %v6564_v37, %v6562_v44  ;;  %v6730_v8 = vpop.permute.xlu1 %6729 }
 0x63a   : > { %12349 = vmatmul.mubr.msk.f32.vlgmr.msra.gmra.mrb[24].mxu1 %vm3893_vm15, %v11633_v60  ;;  %v13421_v25 = vunpack.i.h.bf16 %v13419_v61  ;;  %v13420_v33 = vunpack.i.l.bf16 %v13419_v61  ;;  %v6735_v49 = vsel %vm15420_vm13, %v6730_v8, %v6732_v20 }
 0x63b   : > { %12761 = vmatpush3.bf16.msra.mxu1 %v12760_v56  ;;  %11634 = vmatmul.mubr.msk.f32.vlgmr.msra.gmra.mrb[12].mxu0 %vm3893_vm15, %v11633_v60 }
 0x63c   : > { %12758 = vmatpush1.bf16.msra.mxu0 %v12757_v14  ;;  %12355 = vmatprep.mubr.msk.f32.mxu1 %vm13462_vm1, %v13458_v38  ;;  %v6563_v47 = vsel %vm15420_vm13, %v13421_v25, %v13410_v51  ;;  %v6561_v19 = vsel %vm15420_vm13, %v13420_v33, %v13415_v30 }
 0x63d   : > { %v13424_v35 = vpop.permute.xlu0 %13423  ;;  %6402 = vmatprep.subr.mxu0 %v6391_v17  ;;  %12358 = vmatprep.subr.mxu1 %v13458_v38  ;;  %v12764_v29 = vpack.c.bf16 %v6563_v47, %v6561_v19 }
 0x63e   : > { %v13426_v39 = vunpack.i.h.bf16 %v13424_v35  ;;  %v13425_v40 = vunpack.i.l.bf16 %v13424_v35  ;;  %12356 = vmatmul.mubr.msk.f32.vlgmr.msra.gmra.mrb[26].mxu1 %vm710_vm0, %v11636_v27  ;;  %6302 = vmatprep.mubr.f32.mxu0 %v13458_v38 }
 0x63f   : > { %12359 = vmatpush3.msra.mxu1 %v6398_v34  ;;  %12360 = vmatprep.mubr.msk.f32.mxu1 %vm13462_vm1, %v13458_v38 }
 0x640   : > { %v6579_v45 = vsel %vm15419_vm12, %v13411_v4, %v13426_v39  ;;  %v6578_v57 = vsel %vm15419_vm12, %v13416_v12, %v13425_v40  ;;  %12766 = vmatprep.subr.bf16.mxu1 %v13464_v32  ;;  %v11642_v32 = vld [vmem:[%s15458_s12 + $0x40] sm:$0xff] }
 0x641   : > { %v6734_v52 = vpop.permute.xlu0 %6733  ;;  %v12767_v16 = vpack.c.bf16 %v6579_v45, %v6578_v57 }
 0x642   : > { %12361 = vmatmul.mubr.msk.f32.vlgmr.msra.gmra.mrb[28].mxu1 %vm3893_vm15, %v11639_v43  ;;  %v6736_v48 = vsel %vm15420_vm13, %v6732_v20, %v6734_v52 }
 0x643   : > { %11637 = vmatmul.mubr.msk.f32.vlgmr.msra.gmra.mrb[12].mxu0 %vm710_vm0, %v11636_v27  ;;  %12768 = vmatpush3.bf16.msra.mxu1 %v12767_v16 }
 0x644   : > { %6403 = vmatpush1.msra.mxu0 %v6390_v24  ;;  %12367 = vmatprep.mubr.msk.f32.mxu1 %vm13462_vm1, %v13458_v38 }
 0x645   : > { %12763 = vmatprep.subr.bf16.mxu0 %v12762_v59  ;;  %v6741_v46 = vpop.permute.xlu0 %6740  ;;  %12370 = vmatprep.subr.mxu1 %v13458_v38 }
 0x646   : > { %12368 = vmatmul.mubr.msk.f32.vlgmr.msra.gmra.mrb[30].mxu1 %vm710_vm0, %v11642_v32  ;;  %v6743_v26 = vsel %vm15419_vm12, %v6734_v52, %v6741_v46  ;;  %6466 = vmatprep.mubr.f32.mxu0 %v13458_v38  ;;  %v6901_v46 = vlaneseq }
 0x647   : > { %12371 = vmatpush3.msra.mxu1 %v6743_v26  ;;  %12372 = vmatprep.mubr.msk.f32.mxu1 %vm13462_vm1, %v13458_v38 }
 0x648   : > { %v6902_v26 = vshrl.u32 %v6901_v46, 7 }
 0x64a   : > { %12373 = vmatmul.mubr.msk.f32.vlgmr.msra.gmra.mrb[32].mxu1 %vm3893_vm15, %v11645_v22  ;;  %v6903_v47 = vsub.s32 0, %v6902_v26  ;;  %v6907_v19 = vsub.s32 1, %v6902_v26  ;;  %v6911_v20 = vsub.s32 2, %v6902_v26 }
 0x64b   : > { %11640 = vmatmul.mubr.msk.f32.vlgmr.msra.gmra.mrb[12].mxu0 %vm3893_vm15, %v11639_v43  ;;  %7022 = vmatprep.mubr.f32.mxu1 %v13458_v38 }
 0x64c   : > { %12765 = vmatpush1.bf16.msra.mxu0 %v12764_v29  ;;  %6647 = vmatprep.mubr.f32.mxu0 %v13458_v38 }
 0x64d   : > { %6747 = vmatprep.subr.mxu0 %v6736_v48  ;;  %v6895_v48 = vpop.permute.xlu1 %6894 }
 0x653   : > { %11643 = vmatmul.mubr.msk.f32.vlgmr.msra.gmra.mrb[12].mxu0 %vm710_vm0, %v11642_v32 }
 0x654   : > { %6748 = vmatpush1.msra.mxu0 %v6735_v49  ;;  %6811 = vmatprep.mubr.f32.mxu0 %v13458_v38 }
 0x655   : > { %12375 = vmatprep.subr.mxu0 %v13458_v38 }
 0x65b   : > { %11646 = vmatmul.mubr.msk.f32.vlgmr.msra.gmra.mrb[12].mxu0 %vm3893_vm15, %v11645_v22  ;;  %v707_v22 = vld [vmem:[%s15459_s6] sm:$0x7]  ;;  %s15469_s6 = smov 78  }
 0x65c   : > { %12377 = vmatprep.mubr.msk.f32.mxu0 %vm13462_vm1, %v13458_v38  ;;  %v14764_v29 = vrot.slane %v707_v22, %v6903_v47  ;;  %v14766_v49 = vrot.slane %v707_v22, %v6907_v19 }
 0x695   : > { %v4034_v50 = vpop.f32.mrb[14].mxu0 }
 0x696   : > { %v12271_v53 = vpop.f32.mrb[15].mxu0 }
 0x6b1   : > { %v4178_v55 = vpop.f32.mrb[16].mxu0 }
 0x6b2   : > { %v4179_v58 = vadd.f32 %v4178_v55, %v4034_v50  ;;  %v12278_v15 = vpop.f32.mrb[17].mxu0 }
 0x6b3   : > { %v14768_v15 = vrot.slane %v707_v22, %v6911_v20 }
 0x6d5   : > { %v4355_v18 = vpop.f32.mrb[2].mxu1 }
 0x6d6   : > { %v4361_v42 = vadd.f32 %v4355_v18, %v4179_v58  ;;  %v12285_v62 = vpop.f32.mrb[3].mxu1 }
 0x6d9   : > { %v4519_v2 = vpop.f32.mrb[4].mxu1 }
 0x6da   : > { %v4525_v0 = vadd.f32 %v4519_v2, %v4361_v42  ;;  %v12290_v63 = vpop.f32.mrb[5].mxu1  ;;  %v8376_v2 = vld [vmem:[%s15368_s16] sm:$0xff] }
 0x6e9   : > { %v4699_v1 = vpop.f32.mrb[6].mxu1 }
 0x6ea   : > { %v4705_v31 = vadd.f32 %v4699_v1, %v4525_v0  ;;  %v12297_v28 = vpop.f32.mrb[7].mxu1 }
 0x6eb   : > { %v11648_v28 = vld [vmem:[%s15367_s15 + $0x8] sm:$0xff] }
 0x6ed   : > { %v4863_v5 = vpop.f32.mrb[8].mxu1 }
 0x6ee   : > { %v4869_v3 = vadd.f32 %v4863_v5, %v4705_v31  ;;  %v12302_v7 = vpop.f32.mrb[9].mxu1 }
 0x6f1   : > { %v5042_v9 = vpop.f32.mrb[10].mxu1 }
 0x6f2   : > { %v5048_v41 = vadd.f32 %v5042_v9, %v4869_v3  ;;  %v12309_v10 = vpop.f32.mrb[11].mxu1 }
 0x6f5   : > { %v5206_v11 = vpop.f32.mrb[12].mxu1 }
 0x6f6   : > { %v5212_v21 = vadd.f32 %v5206_v11, %v5048_v41  ;;  %v12314_v6 = vpop.f32.mrb[13].mxu1 }
 0x6f9   : > { %v5355_v36 = vpop.f32.mrb[14].mxu1 }
 0x6fa   : > { %v5361_v54 = vadd.f32 %v5355_v36, %v5212_v21  ;;  %v12321_v60 = vpop.f32.mrb[15].mxu1  ;;  %v6919_v21 = vld [vmem:[%s15367_s15] sm:$0xff] }
 0x6fd   : > { %v5504_v23 = vpop.f32.mrb[16].mxu1 }
 0x6fe   : > { %v5510_v61 = vadd.f32 %v5504_v23, %v5361_v54  ;;  %v12326_v56 = vpop.f32.mrb[17].mxu1 }
 0x6ff   : > { %v11653_v56 = vld [vmem:[%s15367_s15 + $0x10] sm:$0xff] }
 0x701   : > { %v5685_v13 = vpop.f32.mrb[18].mxu1 }
 0x702   : > { %v5691_v14 = vadd.f32 %v5685_v13, %v5510_v61  ;;  %v12333_v17 = vpop.f32.mrb[19].mxu1 }
 0x705   : > { %v5849_v27 = vpop.f32.mrb[20].mxu1 }
 0x706   : > { %v5855_v12 = vadd.f32 %v5849_v27, %v5691_v14  ;;  %v12338_v30 = vpop.f32.mrb[21].mxu1 }
 0x709   : > { %v6030_v34 = vpop.f32.mrb[22].mxu1 }
 0x70a   : > { %v6036_v35 = vadd.f32 %v6030_v34, %v5855_v12  ;;  %v12345_v4 = vpop.f32.mrb[23].mxu1 }
 0x70b   : > { %v11656_v4 = vld [vmem:[%s15367_s15 + $0x18] sm:$0xff] }
 0x70d   : > { %v6194_v51 = vpop.f32.mrb[24].mxu1 }
 0x70e   : > { %v6200_v39 = vadd.f32 %v6194_v51, %v6036_v35  ;;  %v12350_v40 = vpop.f32.mrb[25].mxu1 }
 0x711   : > { %v6375_v43 = vpop.f32.mrb[26].mxu1 }
 0x712   : > { %v6381_v45 = vadd.f32 %v6375_v43, %v6200_v39  ;;  %v12357_v57 = vpop.f32.mrb[27].mxu1 }
 0x715   : > { %v6539_v44 = vpop.f32.mrb[28].mxu1 }
 0x716   : > { %v6545_v52 = vadd.f32 %v6539_v44, %v6381_v45  ;;  %v12362_v16 = vpop.f32.mrb[29].mxu1  ;;  %v11659_v44 = vld [vmem:[%s15367_s15 + $0x20] sm:$0xff] }
 0x719   : > { %v6720_v37 = vpop.f32.mrb[30].mxu1 }
 0x71a   : > { %v6726_v24 = vadd.f32 %v6720_v37, %v6545_v52  ;;  %v12369_v25 = vpop.f32.mrb[31].mxu1 }
 0x71d   : > { %v6884_v33 = vpop.f32.mrb[32].mxu1 }
 0x71e   : > { %v6890_v59 = vadd.f32 %v6884_v33, %v6726_v24  ;;  %v12374_v32 = vpop.f32.mrb[33].mxu1 }
 0x71f   : > { %v11662_v32 = vld [vmem:[%s15367_s15 + $0x28] sm:$0xff] }
 0x720   : > { %v6899_v58 = vadd.f32 %v6895_v48, %v6890_v59 }
 0x722   : > { %v14781_v62 = vmul.f32 %v14768_v15, %v6899_v58  ;;  %v11668_v58 = vld [vmem:[%s15367_s15 + $0x38] sm:$0xff] }
 0x72e   : > { %v6813_v8 = vpop.f32.mrb[12].mxu0 }
 0x72f   : > { %v6897_v50 = vadd.f32 %v6895_v48, %v6813_v8  ;;  %v6815_v53 = vpop.f32.mrb[13].mxu0 }
 0x730   : > { %v6898_v55 = vadd.f32 %v6895_v48, %v6815_v53  ;;  %v11665_v48 = vld [vmem:[%s15367_s15 + $0x30] sm:$0xff] }
 0x731   : > { %v14771_v18 = vmul.f32 %v14764_v29, %v6897_v50 }
 0x732   : > { %v14774_v42 = vmul.f32 %v14766_v49, %v6898_v55 }
 0x733   : > { %6943 = vrot.lane.b32.xlu0 %v14771_v18, %s15416_s26 }
 0x734   : > { %6945 = vrot.lane.b32.xlu1 %v14774_v42, %s15416_s26 }
 0x737   : > { %6940 = vrot.lane.b32.xlu0 %v14781_v62, %s15414_s4  ;;  %s15471_s4 = smov 79  }
 0x738   : > { %6926 = vrot.lane.b32.xlu1 %v14771_v18, %s15412_s23 }
 0x73b   : > { %6928 = vrot.lane.b32.xlu0 %v14774_v42, %s15412_s23 }
 0x73c   : > { %6921 = vrot.lane.b32.xlu1 %v14781_v62, %s15410_s28  ;;  %s15466_s28 = smov 109  }
 0x73f   : > { %7248 = vrot.lane.b32.xlu0 %v14771_v18, %s15408_s30 }
 0x740   : > { %7250 = vrot.lane.b32.xlu1 %v14774_v42, %s15408_s30 }
 0x743   : > { %7245 = vrot.lane.b32.xlu0 %v14781_v62, %s15406_s1  ;;  %s15464_s1 = smov 110  }
 0x744   : > { %7412 = vrot.lane.b32.xlu1 %v14771_v18, %s15444_s0 }
 0x747   : > { %7414 = vrot.lane.b32.xlu0 %v14774_v42, %s15444_s0 }
 0x748   : > { %7409 = vrot.lane.b32.xlu1 %v14781_v62, %s15460_s22 }
 0x74b   : > { %6947 = vrot.lane.b32.xlu0 %v14781_v62, %s15416_s26  ;;  %s15468_s26 = smov 18  }
 0x74c   : > { %6930 = vrot.lane.b32.xlu1 %v14781_v62, %s15412_s23  ;;  %s15467_s23 = smov 49  }
 0x74f   : > { %7252 = vrot.lane.b32.xlu0 %v14781_v62, %s15408_s30  ;;  %s15465_s30 = smov 50  }
 0x750   : > { %7726 = vrot.lane.b32.xlu1 %v14781_v62, %s15447_s5 }
 0x753   : > { %7724 = vrot.lane.b32.xlu0 %v14774_v42, %s15447_s5 }
 0x754   : > { %7722 = vrot.lane.b32.xlu1 %v14771_v18, %s15447_s5 }
 0x757   : > { %7416 = vrot.lane.b32.xlu0 %v14781_v62, %s15444_s0 }
 0x758   : > { %7886 = vrot.lane.b32.xlu1 %v14771_v18, %s15461_s27 }
 0x75b   : > { %7890 = vrot.lane.b32.xlu0 %v14781_v62, %s15461_s27 }
 0x75c   : > { %7888 = vrot.lane.b32.xlu1 %v14774_v42, %s15461_s27 }
 0x75f   : > { %7733 = vrot.lane.b32.xlu0 %v14771_v18, %s15462_s29 }
 0x760   : > { %7897 = vrot.lane.b32.xlu1 %v14771_v18, %s15463_s3 }
 0x763   : > { %8054 = vrot.lane.b32.xlu0 %v14781_v62, %s15464_s1 }
 0x764   : > { %8052 = vrot.lane.b32.xlu1 %v14774_v42, %s15464_s1 }
 0x767   : > { %8050 = vrot.lane.b32.xlu0 %v14771_v18, %s15464_s1 }
 0x768   : > { %8061 = vrot.lane.b32.xlu1 %v14771_v18, %s15465_s30 }
 0x76b   : > { %8216 = vrot.lane.b32.xlu0 %v14774_v42, %s15466_s28 }
 0x76c   : > { %8218 = vrot.lane.b32.xlu1 %v14781_v62, %s15466_s28 }
 0x76f   : > { %8214 = vrot.lane.b32.xlu0 %v14771_v18, %s15466_s28 }
 0x770   : > { %8225 = vrot.lane.b32.xlu1 %v14771_v18, %s15467_s23 }
 0x773   : > { %8379 = vperm.xlu0 %13185, %v8376_v2  }
 0x7a5   : > { %v6944_v0 = vpop.permute.xlu0 %6943 }
 0x7a6   : > { %v6946_v63 = vpop.permute.xlu1 %6945 }
 0x7a7   : > { %v6949_v1 = vsel %vm4202_vm2, %v6944_v0, %v6946_v63 }
 0x7a8   : > { %6958 = vmatprep.subr.mxu1 %v6949_v1 }
 0x7a9   : > { %v6941_v31 = vpop.permute.xlu0 %6940 }
 0x7aa   : > { %v6954_v5 = vsel %vm4202_vm2, %v6941_v31, %v6944_v0  ;;  %v6927_v3 = vpop.permute.xlu1 %6926  ;;  %v11671_v31 = vld [vmem:[%s15367_s15 + $0x40] sm:$0xff] }
 0x7ab   : > { %6959 = vmatpush1.msra.mxu1 %v6954_v5 }
 0x7ac   : > { %11649 = vmatmul.mubr.msk.f32.vlgmr.msra.gmra.mrb[34].mxu1 %vm3893_vm15, %v11648_v28 }
 0x7ad   : > { %v6929_v7 = vpop.permute.xlu0 %6928  ;;  %7166 = vmatprep.mubr.f32.mxu1 %v13458_v38 }
 0x7ae   : > { %v6922_v9 = vpop.permute.xlu1 %6921  ;;  %v6932_v41 = vsel %vm3861_vm14, %v6927_v3, %v6929_v7 }
 0x7af   : > { %v6937_v10 = vsel %vm3861_vm14, %v6922_v9, %v6927_v3  ;;  %7102 = vmatprep.subr.mxu1 %v6932_v41 }
 0x7b0   : > { %7103 = vmatpush1.msra.mxu1 %v6937_v10 }
 0x7b1   : > { %v7249_v11 = vpop.permute.xlu0 %7248 }
 0x7b2   : > { %v7251_v6 = vpop.permute.xlu1 %7250 }
 0x7b3   : > { %v7254_v36 = vsel %vm4546_vm3, %v7249_v11, %v7251_v6 }
 0x7b4   : > { %11651 = vmatmul.mubr.msk.f32.vlgmr.msra.gmra.mrb[34].mxu1 %vm3893_vm15, %v6919_v21  ;;  %7263 = vmatprep.subr.mxu1 %v7254_v36 }
 0x7b5   : > { %v7246_v54 = vpop.permute.xlu0 %7245  ;;  %7327 = vmatprep.mubr.f32.mxu1 %v13458_v38 }
 0x7b6   : > { %v7259_v60 = vsel %vm4546_vm3, %v7246_v54, %v7249_v11  ;;  %v7413_v23 = vpop.permute.xlu1 %7412 }
 0x7b7   : > { %7264 = vmatpush1.msra.mxu1 %v7259_v60 }
 0x7b9   : > { %v7415_v61 = vpop.permute.xlu0 %7414 }
 0x7ba   : > { %v7410_v13 = vpop.permute.xlu1 %7409  ;;  %v7418_v14 = vsel %vm1481_vm5, %v7413_v23, %v7415_v61 }
 0x7bb   : > { %v7423_v17 = vsel %vm1481_vm5, %v7410_v13, %v7413_v23  ;;  %7427 = vmatprep.subr.mxu1 %v7418_v14 }
 0x7bc   : > { %11654 = vmatmul.mubr.msk.f32.vlgmr.msra.gmra.mrb[34].mxu1 %vm3893_vm15, %v11653_v56 }
 0x7bd   : > { %7428 = vmatpush1.msra.mxu1 %v7423_v17  ;;  %v6948_v27 = vpop.permute.xlu0 %6947  ;;  %7491 = vmatprep.mubr.f32.mxu1 %v13458_v38 }
 0x7be   : > { %v6950_v12 = vsel %vm4202_vm2, %v6946_v63, %v6948_v27  ;;  %7576 = vmatprep.subr.mxu1 %v14774_v42  ;;  %v6931_v30 = vpop.permute.xlu1 %6930 }
 0x7bf   : > { %v6933_v34 = vsel %vm3861_vm14, %v6929_v7, %v6931_v30  ;;  %12376 = vmatpush3.msra.mxu0 %v6950_v12 }
 0x7c0   : > { %12378 = vmatmul.mubr.msk.f32.vlgmr.msra.gmra.mrb[18].mxu0 %vm3893_vm15, %v11648_v28  ;;  %12380 = vmatprep.subr.mxu0 %v13458_v38 }
 0x7c1   : > { %v7253_v35 = vpop.permute.xlu0 %7252  ;;  %12381 = vmatpush3.msra.mxu0 %v6933_v34  ;;  %12382 = vmatprep.mubr.msk.f32.mxu0 %vm13462_vm1, %v13458_v38 }
 0x7c2   : > { %v7255_v51 = vsel %vm4546_vm3, %v7251_v6, %v7253_v35  ;;  %v7727_v39 = vpop.permute.xlu1 %7726  ;;  %12385 = vmatprep.subr.mxu0 %v13458_v38 }
 0x7c4   : > { %12383 = vmatmul.mubr.msk.f32.vlgmr.msra.gmra.mrb[20].mxu0 %vm3893_vm15, %v6919_v21  ;;  %11657 = vmatmul.mubr.msk.f32.vlgmr.msra.gmra.mrb[34].mxu1 %vm3893_vm15, %v11656_v4 }
 0x7c5   : > { %12386 = vmatpush3.msra.mxu0 %v7255_v51  ;;  %7577 = vmatpush1.msra.mxu1 %v14771_v18  ;;  %v7725_v40 = vpop.permute.xlu0 %7724 }
 0x7c6   : > { %v7723_v43 = vpop.permute.xlu1 %7722  ;;  %v7729_v45 = vsel %vm5525_vm4, %v7725_v40, %v7727_v39  ;;  %12387 = vmatprep.mubr.msk.f32.mxu0 %vm13462_vm1, %v13458_v38  ;;  %12390 = vmatprep.subr.mxu0 %v13458_v38 }
 0x7c7   : > { %7740 = vmatprep.subr.mxu1 %v7729_v45  ;;  %7640 = vmatprep.mubr.f32.mxu1 %v13458_v38  ;;  %v7728_v37 = vsel %vm5525_vm4, %v7723_v43, %v7725_v40 }
 0x7c8   : > { %12388 = vmatmul.mubr.msk.f32.vlgmr.msra.gmra.mrb[22].mxu0 %vm3893_vm15, %v11653_v56 }
 0x7c9   : > { %v7417_v57 = vpop.permute.xlu0 %7416  ;;  %12392 = vmatprep.mubr.msk.f32.mxu0 %vm13462_vm1, %v13458_v38 }
 0x7ca   : > { %v7419_v52 = vsel %vm1481_vm5, %v7415_v61, %v7417_v57  ;;  %v7887_v16 = vpop.permute.xlu1 %7886 }
 0x7cb   : > { %12391 = vmatpush3.msra.mxu0 %v7419_v52 }
 0x7cc   : > { %11660 = vmatmul.mubr.msk.f32.vlgmr.msra.gmra.mrb[34].mxu1 %vm3893_vm15, %v11659_v44  ;;  %12395 = vmatprep.subr.mxu0 %v13458_v38 }
 0x7cd   : > { %7741 = vmatpush1.msra.mxu1 %v7728_v37  ;;  %v7891_v24 = vpop.permute.xlu0 %7890  ;;  %12393 = vmatmul.mubr.msk.f32.vlgmr.msra.gmra.mrb[24].mxu0 %vm3893_vm15, %v11656_v4 }
 0x7ce   : > { %12396 = vmatpush3.msra.mxu0 %v14781_v62  ;;  %v7889_v25 = vpop.permute.xlu1 %7888  ;;  %12397 = vmatprep.mubr.msk.f32.mxu0 %vm13462_vm1, %v13458_v38 }
 0x7cf   : > { %v7893_v33 = vsel %vm5870_vm6, %v7889_v25, %v7891_v24  ;;  %12400 = vmatprep.subr.mxu0 %v13458_v38  ;;  %7804 = vmatprep.mubr.f32.mxu1 %v13458_v38  ;;  %v7892_v19 = vsel %vm5870_vm6, %v7887_v16, %v7889_v25 }
 0x7d0   : > { %7904 = vmatprep.subr.mxu1 %v7893_v33 }
 0x7d1   : > { %v7734_v59 = vpop.permute.xlu0 %7733  ;;  %12398 = vmatmul.mubr.msk.f32.vlgmr.msra.gmra.mrb[26].mxu0 %vm3893_vm15, %v11659_v44 }
 0x7d2   : > { %v7736_v46 = vsel %vm5542_vm7, %v7727_v39, %v7734_v59  ;;  %v7898_v26 = vpop.permute.xlu1 %7897  ;;  %12402 = vmatprep.mubr.msk.f32.mxu0 %vm13462_vm1, %v13458_v38 }
 0x7d3   : > { %v7900_v47 = vsel %vm5887_vm8, %v7891_v24, %v7898_v26  ;;  %12401 = vmatpush3.msra.mxu0 %v7736_v46 }
 0x7d4   : > { %11663 = vmatmul.mubr.msk.f32.vlgmr.msra.gmra.mrb[34].mxu1 %vm3893_vm15, %v11662_v32  ;;  %12405 = vmatprep.subr.mxu0 %v13458_v38 }
 0x7d5   : > { %7905 = vmatpush1.msra.mxu1 %v7892_v19  ;;  %v8055_v22 = vpop.permute.xlu0 %8054  ;;  %12403 = vmatmul.mubr.msk.f32.vlgmr.msra.gmra.mrb[28].mxu0 %vm3893_vm15, %v11662_v32 }
 0x7d6   : > { %12406 = vmatpush3.msra.mxu0 %v7900_v47  ;;  %v8053_v20 = vpop.permute.xlu1 %8052  ;;  %12407 = vmatprep.mubr.msk.f32.mxu0 %vm13462_vm1, %v13458_v38  ;;  %v9854_v47 = vld [vmem:[%s15370_s18] sm:$0xf] }
 0x7d7   : > { %v8057_v8 = vsel %vm6215_vm9, %v8053_v20, %v8055_v22  ;;  %7968 = vmatprep.mubr.f32.mxu1 %v13458_v38  ;;  %12410 = vmatprep.subr.mxu0 %v13458_v38 }
 0x7d8   : > { %8068 = vmatprep.subr.mxu1 %v8057_v8  ;;  %v11674_v8 = vld [vmem:[%s15369_s17 + $0x4] sm:$0xf] }
 0x7d9   : > { %v8051_v50 = vpop.permute.xlu0 %8050  ;;  %12408 = vmatmul.mubr.msk.f32.vlgmr.msra.gmra.mrb[30].mxu0 %vm3893_vm15, %v11665_v48 }
 0x7da   : > { %v8056_v53 = vsel %vm6215_vm9, %v8051_v50, %v8053_v20  ;;  %v8062_v55 = vpop.permute.xlu1 %8061  ;;  %12412 = vmatprep.mubr.msk.f32.mxu0 %vm13462_vm1, %v13458_v38 }
 0x7db   : > { %v8064_v18 = vsel %vm6232_vm11, %v8055_v22, %v8062_v55 }
 0x7dc   : > { %11666 = vmatmul.mubr.msk.f32.vlgmr.msra.gmra.mrb[34].mxu1 %vm3893_vm15, %v11665_v48  ;;  %12411 = vmatpush3.msra.mxu0 %v8064_v18 }
 0x7dd   : > { %8069 = vmatpush1.msra.mxu1 %v8056_v53  ;;  %v8217_v42 = vpop.permute.xlu0 %8216  ;;  %12413 = vmatmul.mubr.msk.f32.vlgmr.msra.gmra.mrb[32].mxu0 %vm3893_vm15, %v11668_v58 }
 0x7de   : > { %v8219_v62 = vpop.permute.xlu1 %8218  ;;  %8132 = vmatprep.mubr.f32.mxu1 %v13458_v38  ;;  %12415 = vmatprep.subr.mxu0 %v13458_v38 }
 0x7df   : > { %v8221_v2 = vsel %vm15420_vm13, %v8217_v42, %v8219_v62  ;;  %12417 = vmatprep.mubr.msk.f32.mxu0 %vm13462_vm1, %v13458_v38 }
 0x7e0   : > { %8232 = vmatprep.subr.mxu1 %v8221_v2  ;;  %v8397_v2 = vld [vmem:[%s15369_s17] sm:$0xf] }
 0x7e1   : > { %v8215_v0 = vpop.permute.xlu0 %8214 }
 0x7e2   : > { %v8220_v63 = vsel %vm15420_vm13, %v8215_v0, %v8217_v42  ;;  %v8226_v1 = vpop.permute.xlu1 %8225 }
 0x7e3   : > { %v8228_v28 = vsel %vm15419_vm12, %v8219_v62, %v8226_v1 }
 0x7e4   : > { %11669 = vmatmul.mubr.msk.f32.vlgmr.msra.gmra.mrb[34].mxu1 %vm3893_vm15, %v11668_v58  ;;  %12416 = vmatpush3.msra.mxu0 %v8228_v28 }
 0x7e5   : > { %8233 = vmatpush1.msra.mxu1 %v8220_v63  ;;  %12418 = vmatmul.mubr.msk.f32.vlgmr.msra.gmra.mrb[34].mxu0 %vm3893_vm15, %v11671_v31 }
 0x7e6   : > { %8296 = vmatprep.mubr.f32.mxu1 %v13458_v38  ;;  %12420 = vmatprep.subr.mxu0 %v13458_v38 }
 0x7e7   : > { %12422 = vmatprep.mubr.msk.f32.mxu0 %vm13462_vm1, %v13458_v38 }
 0x7ec   : > { %11672 = vmatmul.mubr.msk.f32.vlgmr.msra.gmra.mrb[34].mxu1 %vm3893_vm15, %v11671_v31 }
 0x7ed   : > { %8500 = vmatprep.mubr.f32.mxu1 %v13458_v38 }
 0x7f2   : > { %v8380_v40 = vpop.permute.xlu0 %8379 }
 0x893   : > { %v7095_v5 = vpop.f32.mrb[18].mxu0 }
 0x894   : > { %v12379_v3 = vpop.f32.mrb[19].mxu0 }
 0x895   : > { %v11679_v3 = vld [vmem:[%s15369_s17 + $0x8] sm:$0xf] }
 0x897   : > { %v7239_v7 = vpop.f32.mrb[20].mxu0 }
 0x898   : > { %v7240_v9 = vadd.f32 %v7239_v7, %v7095_v5  ;;  %v12384_v41 = vpop.f32.mrb[21].mxu0 }
 0x89b   : > { %v7400_v10 = vpop.f32.mrb[22].mxu0 }
 0x89c   : > { %v7406_v11 = vadd.f32 %v7400_v10, %v7240_v9  ;;  %v12389_v21 = vpop.f32.mrb[23].mxu0 }
 0x8a0   : > { %v7564_v6 = vpop.f32.mrb[24].mxu0 }
 0x8a1   : > { %v7570_v36 = vadd.f32 %v7564_v6, %v7406_v11  ;;  %v12394_v54 = vpop.f32.mrb[25].mxu0 }
 0x8a2   : > { %v11682_v54 = vld [vmem:[%s15369_s17 + $0xc] sm:$0xf] }
 0x8a4   : > { %v7713_v60 = vpop.f32.mrb[26].mxu0 }
 0x8a5   : > { %v7719_v23 = vadd.f32 %v7713_v60, %v7570_v36  ;;  %v12399_v61 = vpop.f32.mrb[27].mxu0 }
 0x8a8   : > { %v7877_v56 = vpop.f32.mrb[28].mxu0 }
 0x8a9   : > { %v7883_v13 = vadd.f32 %v7877_v56, %v7719_v23  ;;  %v12404_v14 = vpop.f32.mrb[29].mxu0 }
 0x8ac   : > { %v8041_v17 = vpop.f32.mrb[30].mxu0 }
 0x8ad   : > { %v8047_v27 = vadd.f32 %v8041_v17, %v7883_v13  ;;  %v12409_v12 = vpop.f32.mrb[31].mxu0  ;;  %v11685_v17 = vld [vmem:[%s15369_s17 + $0x10] sm:$0xf] }
 0x8b0   : > { %v8205_v30 = vpop.f32.mrb[32].mxu0 }
 0x8b1   : > { %v8211_v34 = vadd.f32 %v8205_v30, %v8047_v27  ;;  %v12414_v35 = vpop.f32.mrb[33].mxu0 }
 0x8b8   : > { %v8369_v4 = vpop.f32.mrb[34].mxu0 }
 0x8b9   : > { %v8375_v51 = vadd.f32 %v8369_v4, %v8211_v34  ;;  %v12419_v39 = vpop.f32.mrb[35].mxu0 }
 0x8ba   : > { %v11688_v39 = vld [vmem:[%s15369_s17 + $0x14] sm:$0xf] }
 0x8bb   : > { %v8384_v43 = vadd.f32 %v8380_v40, %v8375_v51 }
 0x8bd   : > { %v8390_v16 = vmul.f32 0.01, %v8384_v43  ;;  %vm8387_vm10 = vcmp.ge.f32.partialorder %v8384_v43, 0.0 }
 0x8bf   : > { %v8298_v45 = vpop.f32.mrb[34].mxu1  ;;  %v8393_v32 = vsel %vm8387_vm10, %v8384_v43, %v8390_v16  ;;  %v11691_v16 = vld [vmem:[%s15369_s17 + $0x18] sm:$0xf]  ;;  %vm15474_vm10 = vcmask 400384  }
 0x8c0   : > { %v8382_v57 = vadd.f32 %v8380_v40, %v8298_v45  ;;  %v8300_v44 = vpop.f32.mrb[35].mxu1  ;;  %v14965_v26 = vmul.f32 %v8393_v32, %v14768_v15 }
 0x8c1   : > { %v8383_v52 = vadd.f32 %v8380_v40, %v8300_v44 }
 0x8c2   : > { %vm8385_vm0 = vcmp.ge.f32.partialorder %v8382_v57, 0.0  ;;  %v8388_v37 = vmul.f32 0.01, %v8382_v57 }
 0x8c3   : > { %vm8386_vm12 = vcmp.ge.f32.partialorder %v8383_v52, 0.0  ;;  %v8389_v24 = vmul.f32 0.01, %v8383_v52 }
 0x8c4   : > { %v8391_v25 = vsel %vm8385_vm0, %v8382_v57, %v8388_v37 }
 0x8c5   : > { %v14955_v33 = vmul.f32 %v8391_v25, %v14764_v29  ;;  %v8392_v59 = vsel %vm8386_vm12, %v8383_v52, %v8389_v24  ;;  %vm9901_vm12 = vcmask 31744  }
 0x8c6   : > { %v14958_v46 = vmul.f32 %v8392_v59, %v14766_v49  ;;  %v11694_v59 = vld [vmem:[%s15369_s17 + $0x1c] sm:$0xf] }
 0x8c7   : > { %8421 = vrot.lane.b32.xlu1 %v14955_v33, %s15468_s26 }
 0x8c8   : > { %8423 = vrot.lane.b32.xlu0 %v14958_v46, %s15468_s26 }
 0x8cb   : > { %8418 = vrot.lane.b32.xlu1 %v14965_v26, %s15469_s6 }
 0x8cc   : > { %8404 = vrot.lane.b32.xlu0 %v14955_v33, %s15470_s7 }
 0x8cf   : > { %8406 = vrot.lane.b32.xlu1 %v14958_v46, %s15470_s7 }
 0x8d0   : > { %8399 = vrot.lane.b32.xlu0 %v14965_v26, %s15471_s4 }
 0x8d3   : > { %8726 = vrot.lane.b32.xlu1 %v14955_v33, %s15472_s8 }
 0x8d4   : > { %8728 = vrot.lane.b32.xlu0 %v14958_v46, %s15472_s8 }
 0x8d7   : > { %8723 = vrot.lane.b32.xlu1 %v14965_v26, %s15473_s9 }
 0x8d8   : > { %8890 = vrot.lane.b32.xlu0 %v14955_v33, %s15444_s0 }
 0x8db   : > { %8892 = vrot.lane.b32.xlu1 %v14958_v46, %s15444_s0 }
 0x8dc   : > { %8887 = vrot.lane.b32.xlu0 %v14965_v26, %s15460_s22 }
 0x8df   : > { %8425 = vrot.lane.b32.xlu1 %v14965_v26, %s15468_s26 }
 0x8e0   : > { %8408 = vrot.lane.b32.xlu0 %v14965_v26, %s15470_s7 }
 0x8e3   : > { %8730 = vrot.lane.b32.xlu1 %v14965_v26, %s15472_s8 }
 0x8e4   : > { %9204 = vrot.lane.b32.xlu0 %v14965_v26, %s15447_s5 }
 0x8e7   : > { %9202 = vrot.lane.b32.xlu1 %v14958_v46, %s15447_s5 }
 0x8e8   : > { %9200 = vrot.lane.b32.xlu0 %v14955_v33, %s15447_s5 }
 0x8eb   : > { %8894 = vrot.lane.b32.xlu1 %v14965_v26, %s15444_s0 }
 0x8ec   : > { %9364 = vrot.lane.b32.xlu0 %v14955_v33, %s15461_s27 }
 0x8ef   : > { %9368 = vrot.lane.b32.xlu1 %v14965_v26, %s15461_s27 }
 0x8f0   : > { %9366 = vrot.lane.b32.xlu0 %v14958_v46, %s15461_s27 }
 0x8f3   : > { %9211 = vrot.lane.b32.xlu1 %v14955_v33, %s15462_s29 }
 0x8f4   : > { %9375 = vrot.lane.b32.xlu0 %v14955_v33, %s15463_s3 }
 0x8f7   : > { %9532 = vrot.lane.b32.xlu1 %v14965_v26, %s15464_s1 }
 0x8f8   : > { %9530 = vrot.lane.b32.xlu0 %v14958_v46, %s15464_s1 }
 0x8fb   : > { %9528 = vrot.lane.b32.xlu1 %v14955_v33, %s15464_s1 }
 0x8fc   : > { %9539 = vrot.lane.b32.xlu0 %v14955_v33, %s15465_s30 }
 0x8ff   : > { %9694 = vrot.lane.b32.xlu1 %v14958_v46, %s15466_s28 }
 0x900   : > { %9696 = vrot.lane.b32.xlu0 %v14965_v26, %s15466_s28 }
 0x903   : > { %9692 = vrot.lane.b32.xlu1 %v14955_v33, %s15466_s28 }
 0x904   : > { %9703 = vrot.lane.b32.xlu0 %v14955_v33, %s15467_s23 }
 0x907   : > { %9857 = vperm.xlu1 %13186, %v9854_v47  }
 0x939   : > { %v8422_v19 = vpop.permute.xlu1 %8421 }
 0x93a   : > { %v8424_v22 = vpop.permute.xlu0 %8423 }
 0x93b   : > { %v8427_v20 = vsel %vm4202_vm2, %v8422_v19, %v8424_v22 }
 0x93c   : > { %8436 = vmatprep.subr.mxu1 %v8427_v20 }
 0x93d   : > { %v8419_v48 = vpop.permute.xlu1 %8418 }
 0x93e   : > { %v8432_v50 = vsel %vm4202_vm2, %v8419_v48, %v8422_v19  ;;  %v8405_v53 = vpop.permute.xlu0 %8404  ;;  %v11697_v48 = vld [vmem:[%s15369_s17 + $0x20] sm:$0xf] }
 0x93f   : > { %8437 = vmatpush1.msra.mxu1 %v8432_v50 }
 0x940   : > { %11675 = vmatmul.mubr.msk.f32.vlgmr.msra.gmra.mrb[36].mxu1 %vm3893_vm15, %v11674_v8 }
 0x941   : > { %v8407_v55 = vpop.permute.xlu1 %8406  ;;  %8644 = vmatprep.mubr.f32.mxu1 %v13458_v38 }
 0x942   : > { %v8400_v58 = vpop.permute.xlu0 %8399  ;;  %v8410_v18 = vsel %vm3861_vm14, %v8405_v53, %v8407_v55 }
 0x943   : > { %v8415_v42 = vsel %vm3861_vm14, %v8400_v58, %v8405_v53  ;;  %8580 = vmatprep.subr.mxu1 %v8410_v18 }
 0x944   : > { %8581 = vmatpush1.msra.mxu1 %v8415_v42 }
 0x945   : > { %v8727_v62 = vpop.permute.xlu1 %8726 }
 0x946   : > { %v8729_v0 = vpop.permute.xlu0 %8728 }
 0x947   : > { %v8732_v63 = vsel %vm4546_vm3, %v8727_v62, %v8729_v0 }
 0x948   : > { %11677 = vmatmul.mubr.msk.f32.vlgmr.msra.gmra.mrb[36].mxu1 %vm3893_vm15, %v8397_v2  ;;  %8741 = vmatprep.subr.mxu1 %v8732_v63 }
 0x949   : > { %v8724_v1 = vpop.permute.xlu1 %8723  ;;  %8805 = vmatprep.mubr.f32.mxu1 %v13458_v38 }
 0x94a   : > { %v8737_v31 = vsel %vm4546_vm3, %v8724_v1, %v8727_v62  ;;  %v8891_v28 = vpop.permute.xlu0 %8890 }
 0x94b   : > { %8742 = vmatpush1.msra.mxu1 %v8737_v31 }
 0x94d   : > { %v8893_v5 = vpop.permute.xlu1 %8892 }
 0x94e   : > { %v8888_v7 = vpop.permute.xlu0 %8887  ;;  %v8896_v9 = vsel %vm1481_vm5, %v8891_v28, %v8893_v5 }
 0x94f   : > { %v8901_v41 = vsel %vm1481_vm5, %v8888_v7, %v8891_v28  ;;  %8905 = vmatprep.subr.mxu1 %v8896_v9 }
 0x950   : > { %11680 = vmatmul.mubr.msk.f32.vlgmr.msra.gmra.mrb[36].mxu1 %vm3893_vm15, %v11679_v3 }
 0x951   : > { %8906 = vmatpush1.msra.mxu1 %v8901_v41  ;;  %v8426_v10 = vpop.permute.xlu1 %8425  ;;  %8969 = vmatprep.mubr.f32.mxu1 %v13458_v38 }
 0x952   : > { %9054 = vmatprep.subr.mxu1 %v14958_v46  ;;  %v8428_v11 = vsel %vm4202_vm2, %v8424_v22, %v8426_v10  ;;  %v8409_v21 = vpop.permute.xlu0 %8408 }
 0x953   : > { %v8411_v6 = vsel %vm3861_vm14, %v8407_v55, %v8409_v21  ;;  %12421 = vmatpush3.msra.mxu0 %v8428_v11 }
 0x954   : > { %12423 = vmatmul.mubr.msk.f32.vlgmr.msra.gmra.mrb[36].mxu0 %vm3893_vm15, %v11674_v8  ;;  %12425 = vmatprep.subr.mxu0 %v13458_v38 }
 0x955   : > { %12426 = vmatpush3.msra.mxu0 %v8411_v6  ;;  %v8731_v36 = vpop.permute.xlu1 %8730  ;;  %12427 = vmatprep.mubr.msk.f32.mxu0 %vm13462_vm1, %v13458_v38 }
 0x956   : > { %v8733_v60 = vsel %vm4546_vm3, %v8729_v0, %v8731_v36  ;;  %v9205_v23 = vpop.permute.xlu0 %9204  ;;  %12430 = vmatprep.subr.mxu0 %v13458_v38 }
 0x958   : > { %12428 = vmatmul.mubr.msk.f32.vlgmr.msra.gmra.mrb[38].mxu0 %vm3893_vm15, %v8397_v2  ;;  %11683 = vmatmul.mubr.msk.f32.vlgmr.msra.gmra.mrb[36].mxu1 %vm3893_vm15, %v11682_v54 }
 0x959   : > { %12431 = vmatpush3.msra.mxu0 %v8733_v60  ;;  %9055 = vmatpush1.msra.mxu1 %v14955_v33  ;;  %v9203_v61 = vpop.permute.xlu1 %9202 }
 0x95a   : > { %v9201_v56 = vpop.permute.xlu0 %9200  ;;  %v9207_v13 = vsel %vm5525_vm4, %v9203_v61, %v9205_v23  ;;  %12432 = vmatprep.mubr.msk.f32.mxu0 %vm13462_vm1, %v13458_v38  ;;  %12435 = vmatprep.subr.mxu0 %v13458_v38 }
 0x95b   : > { %9218 = vmatprep.subr.mxu1 %v9207_v13  ;;  %9118 = vmatprep.mubr.f32.mxu1 %v13458_v38  ;;  %v9206_v30 = vsel %vm5525_vm4, %v9201_v56, %v9203_v61 }
 0x95c   : > { %12433 = vmatmul.mubr.msk.f32.vlgmr.msra.gmra.mrb[40].mxu0 %vm3893_vm15, %v11679_v3 }
 0x95d   : > { %v8895_v14 = vpop.permute.xlu1 %8894  ;;  %12437 = vmatprep.mubr.msk.f32.mxu0 %vm13462_vm1, %v13458_v38 }
 0x95e   : > { %v8897_v27 = vsel %vm1481_vm5, %v8893_v5, %v8895_v14  ;;  %v9365_v12 = vpop.permute.xlu0 %9364 }
 0x95f   : > { %12436 = vmatpush3.msra.mxu0 %v8897_v27 }
 0x960   : > { %11686 = vmatmul.mubr.msk.f32.vlgmr.msra.gmra.mrb[36].mxu1 %vm3893_vm15, %v11685_v17  ;;  %12440 = vmatprep.subr.mxu0 %v13458_v38 }
 0x961   : > { %9219 = vmatpush1.msra.mxu1 %v9206_v30  ;;  %12438 = vmatmul.mubr.msk.f32.vlgmr.msra.gmra.mrb[42].mxu0 %vm3893_vm15, %v11682_v54  ;;  %v9369_v34 = vpop.permute.xlu1 %9368 }
 0x962   : > { %12441 = vmatpush3.msra.mxu0 %v14965_v26  ;;  %v9367_v35 = vpop.permute.xlu0 %9366  ;;  %12442 = vmatprep.mubr.msk.f32.mxu0 %vm13462_vm1, %v13458_v38 }
 0x963   : > { %v9371_v4 = vsel %vm5870_vm6, %v9367_v35, %v9369_v34  ;;  %12445 = vmatprep.subr.mxu0 %v13458_v38  ;;  %9282 = vmatprep.mubr.f32.mxu1 %v13458_v38  ;;  %v9370_v57 = vsel %vm5870_vm6, %v9365_v12, %v9367_v35 }
 0x964   : > { %9382 = vmatprep.subr.mxu1 %v9371_v4 }
 0x965   : > { %12443 = vmatmul.mubr.msk.f32.vlgmr.msra.gmra.mrb[44].mxu0 %vm3893_vm15, %v11685_v17  ;;  %v9212_v51 = vpop.permute.xlu1 %9211 }
 0x966   : > { %v9214_v40 = vsel %vm5542_vm7, %v9205_v23, %v9212_v51  ;;  %v9376_v43 = vpop.permute.xlu0 %9375  ;;  %12447 = vmatprep.mubr.msk.f32.mxu0 %vm13462_vm1, %v13458_v38 }
 0x967   : > { %v9378_v45 = vsel %vm5887_vm8, %v9369_v34, %v9376_v43  ;;  %12446 = vmatpush3.msra.mxu0 %v9214_v40  ;;  %v11700_v43 = vld [vmem:[%s15371_s19 + $0x4] sm:$0xf] }
 0x968   : > { %11689 = vmatmul.mubr.msk.f32.vlgmr.msra.gmra.mrb[36].mxu1 %vm3893_vm15, %v11688_v39  ;;  %12450 = vmatprep.subr.mxu0 %v13458_v38 }
 0x969   : > { %9383 = vmatpush1.msra.mxu1 %v9370_v57  ;;  %12448 = vmatmul.mubr.msk.f32.vlgmr.msra.gmra.mrb[46].mxu0 %vm3893_vm15, %v11688_v39  ;;  %v9533_v44 = vpop.permute.xlu1 %9532 }
 0x96a   : > { %12451 = vmatpush3.msra.mxu0 %v9378_v45  ;;  %v9531_v52 = vpop.permute.xlu0 %9530  ;;  %12452 = vmatprep.mubr.msk.f32.mxu0 %vm13462_vm1, %v13458_v38 }
 0x96b   : > { %v9535_v37 = vsel %vm6215_vm9, %v9531_v52, %v9533_v44  ;;  %9446 = vmatprep.mubr.f32.mxu1 %v13458_v38  ;;  %12455 = vmatprep.subr.mxu0 %v13458_v38 }
 0x96c   : > { %9546 = vmatprep.subr.mxu1 %v9535_v37 }
 0x96d   : > { %12453 = vmatmul.mubr.msk.f32.vlgmr.msra.gmra.mrb[48].mxu0 %vm3893_vm15, %v11691_v16  ;;  %v9529_v24 = vpop.permute.xlu1 %9528 }
 0x96e   : > { %v9534_v25 = vsel %vm6215_vm9, %v9529_v24, %v9531_v52  ;;  %v9540_v33 = vpop.permute.xlu0 %9539  ;;  %12457 = vmatprep.mubr.msk.f32.mxu0 %vm13462_vm1, %v13458_v38 }
 0x96f   : > { %v9542_v32 = vsel %vm6232_vm11, %v9533_v44, %v9540_v33 }
 0x970   : > { %11692 = vmatmul.mubr.msk.f32.vlgmr.msra.gmra.mrb[36].mxu1 %vm3893_vm15, %v11691_v16  ;;  %12456 = vmatpush3.msra.mxu0 %v9542_v32 }
 0x971   : > { %9547 = vmatpush1.msra.mxu1 %v9534_v25  ;;  %12458 = vmatmul.mubr.msk.f32.vlgmr.msra.gmra.mrb[50].mxu0 %vm3893_vm15, %v11694_v59  ;;  %v9695_v46 = vpop.permute.xlu1 %9694  ;;  %v9869_v25 = vld [vmem:[%s15371_s19] sm:$0xf] }
 0x972   : > { %v9697_v26 = vpop.permute.xlu0 %9696  ;;  %9610 = vmatprep.mubr.f32.mxu1 %v13458_v38  ;;  %12460 = vmatprep.subr.mxu0 %v13458_v38 }
 0x973   : > { %v9699_v47 = vsel %vm15420_vm13, %v9695_v46, %v9697_v26  ;;  %12462 = vmatprep.mubr.msk.f32.mxu0 %vm13462_vm1, %v13458_v38 }
 0x974   : > { %9710 = vmatprep.subr.mxu1 %v9699_v47 }
 0x975   : > { %v9693_v19 = vpop.permute.xlu1 %9692 }
 0x976   : > { %v9698_v22 = vsel %vm15420_vm13, %v9693_v19, %v9695_v46  ;;  %v9704_v20 = vpop.permute.xlu0 %9703  ;;  %v11711_v19 = vld [vmem:[%s15371_s19 + $0x8] sm:$0xf] }
 0x977   : > { %v9706_v8 = vsel %vm15474_vm10, %v9697_v26, %v9704_v20 }
 0x978   : > { %11695 = vmatmul.mubr.msk.f32.vlgmr.msra.gmra.mrb[36].mxu1 %vm3893_vm15, %v11694_v59  ;;  %12461 = vmatpush3.msra.mxu0 %v9706_v8 }
 0x979   : > { %9711 = vmatpush1.msra.mxu1 %v9698_v22  ;;  %12463 = vmatmul.mubr.msk.f32.vlgmr.msra.gmra.mrb[52].mxu0 %vm3893_vm15, %v11697_v48 }
 0x97a   : > { %9774 = vmatprep.mubr.f32.mxu1 %v13458_v38  ;;  %12465 = vmatprep.subr.mxu0 %v13458_v38 }
 0x97b   : > { %12467 = vmatprep.mubr.msk.f32.mxu0 %vm13462_vm1, %v13458_v38 }
 0x980   : > { %11698 = vmatmul.mubr.msk.f32.vlgmr.msra.gmra.mrb[36].mxu1 %vm3893_vm15, %v11697_v48  ;;  %vm15475_vm15 = vcmask 1043456  }
 0x981   : > { %9976 = vmatprep.mubr.f32.mxu1 %v13458_v38  ;;  %vm15476_vm0 = vmmov %vm15475_vm15 }
 0x982   : > { %vm15477_vm10 = vmmov %vm15476_vm0 }
 0x983   : > { %vm15482_vm13 = vmmov %vm15476_vm0 }
 0x986   : > { %v9858_v61 = vpop.permute.xlu1 %9857 }
 0xa27   : > { %v8573_v50 = vpop.f32.mrb[36].mxu0 }
 0xa28   : > { %v12424_v53 = vpop.f32.mrb[37].mxu0 }
 0xa2b   : > { %v8717_v55 = vpop.f32.mrb[38].mxu0 }
 0xa2c   : > { %v8718_v58 = vadd.f32 %v8717_v55, %v8573_v50  ;;  %v12429_v18 = vpop.f32.mrb[39].mxu0 }
 0xa2d   : > { %v11717_v18 = vld [vmem:[%s15371_s19 + $0xc] sm:$0xf] }
 0xa2f   : > { %v8878_v42 = vpop.f32.mrb[40].mxu0 }
 0xa30   : > { %v8884_v62 = vadd.f32 %v8878_v42, %v8718_v58  ;;  %v12434_v2 = vpop.f32.mrb[41].mxu0 }
 0xa34   : > { %v9042_v0 = vpop.f32.mrb[42].mxu0 }
 0xa35   : > { %v9048_v63 = vadd.f32 %v9042_v0, %v8884_v62  ;;  %v12439_v1 = vpop.f32.mrb[43].mxu0 }
 0xa38   : > { %v9191_v31 = vpop.f32.mrb[44].mxu0 }
 0xa39   : > { %v9197_v28 = vadd.f32 %v9191_v31, %v9048_v63  ;;  %v12444_v5 = vpop.f32.mrb[45].mxu0  ;;  %v11723_v31 = vld [vmem:[%s15371_s19 + $0x10] sm:$0xf] }
 0xa3c   : > { %v9355_v3 = vpop.f32.mrb[46].mxu0 }
 0xa3d   : > { %v9361_v7 = vadd.f32 %v9355_v3, %v9197_v28  ;;  %v12449_v9 = vpop.f32.mrb[47].mxu0 }
 0xa40   : > { %v9519_v41 = vpop.f32.mrb[48].mxu0 }
 0xa41   : > { %v9525_v10 = vadd.f32 %v9519_v41, %v9361_v7  ;;  %v12454_v11 = vpop.f32.mrb[49].mxu0 }
 0xa42   : > { %v11729_v11 = vld [vmem:[%s15371_s19 + $0x14] sm:$0xf] }
 0xa44   : > { %v9683_v21 = vpop.f32.mrb[50].mxu0 }
 0xa45   : > { %v9689_v6 = vadd.f32 %v9683_v21, %v9525_v10  ;;  %v12459_v36 = vpop.f32.mrb[51].mxu0 }
 0xa4c   : > { %v9847_v54 = vpop.f32.mrb[52].mxu0 }
 0xa4d   : > { %v9853_v60 = vadd.f32 %v9847_v54, %v9689_v6  ;;  %v12464_v23 = vpop.f32.mrb[53].mxu0 }
 0xa4f   : > { %v9862_v13 = vadd.f32 %v9858_v61, %v9853_v60 }
 0xa51   : > { %v9865_v34 = vmax.f32 %v9862_v13, 0.0 }
 0xa53   : > { %v9776_v56 = vpop.f32.mrb[36].mxu1  ;;  %v15149_v51 = vmul.f32 %v9865_v34, %v14768_v15 }
 0xa54   : > { %v9860_v14 = vadd.f32 %v9858_v61, %v9776_v56  ;;  %v9778_v17 = vpop.f32.mrb[37].mxu1  ;;  %v11735_v56 = vld [vmem:[%s15371_s19 + $0x18] sm:$0xf] }
 0xa55   : > { %v9861_v27 = vadd.f32 %v9858_v61, %v9778_v17 }
 0xa56   : > { %v9863_v12 = vmax.f32 %v9860_v14, 0.0 }
 0xa57   : > { %v9864_v30 = vmax.f32 %v9861_v27, 0.0 }
 0xa58   : > { %v15139_v35 = vmul.f32 %v9863_v12, %v14764_v29  ;;  %v11373_v29 = vld [vmem:[%s15372_s20] sm:$0xf] }
 0xa59   : > { %v15142_v4 = vmul.f32 %v9864_v30, %v14766_v49  ;;  %v11741_v30 = vld [vmem:[%s15371_s19 + $0x1c] sm:$0xf] }
 0xa5a   : > { %9891 = vrot.lane.b32.xlu0 %v15139_v35, %s15468_s26 }
 0xa5b   : > { %9893 = vrot.lane.b32.xlu1 %v15142_v4, %s15468_s26 }
 0xa5e   : > { %9888 = vrot.lane.b32.xlu0 %v15149_v51, %s15469_s6 }
 0xa5f   : > { %9876 = vrot.lane.b32.xlu1 %v15139_v35, %s15470_s7 }
 0xa62   : > { %9878 = vrot.lane.b32.xlu0 %v15142_v4, %s15470_s7 }
 0xa63   : > { %9871 = vrot.lane.b32.xlu1 %v15149_v51, %s15471_s4 }
 0xa66   : > { %10209 = vrot.lane.b32.xlu0 %v15139_v35, %s15472_s8 }
 0xa67   : > { %10211 = vrot.lane.b32.xlu1 %v15142_v4, %s15472_s8 }
 0xa6a   : > { %10206 = vrot.lane.b32.xlu0 %v15149_v51, %s15473_s9 }
 0xa6b   : > { %10378 = vrot.lane.b32.xlu1 %v15139_v35, %s15444_s0 }
 0xa6e   : > { %10380 = vrot.lane.b32.xlu0 %v15142_v4, %s15444_s0 }
 0xa6f   : > { %10375 = vrot.lane.b32.xlu1 %v15149_v51, %s15460_s22 }
 0xa72   : > { %9895 = vrot.lane.b32.xlu0 %v15149_v51, %s15468_s26 }
 0xa73   : > { %9880 = vrot.lane.b32.xlu1 %v15149_v51, %s15470_s7 }
 0xa76   : > { %10699 = vrot.lane.b32.xlu0 %v15139_v35, %s15447_s5 }
 0xa77   : > { %10703 = vrot.lane.b32.xlu1 %v15149_v51, %s15447_s5 }
 0xa7a   : > { %10701 = vrot.lane.b32.xlu0 %v15142_v4, %s15447_s5 }
 0xa7b   : > { %10213 = vrot.lane.b32.xlu1 %v15149_v51, %s15472_s8  ;;  %s12902_s8 = smul.u32 12, %s15502_s25 }
 0xa7d   : > { %s696_s5 = scalar_lea.vmem %s15373_s21, %s12902_s8 }
 0xa7e   : > { %10382 = vrot.lane.b32.xlu0 %v15149_v51, %s15444_s0 }
 0xa7f   : > { %10868 = vrot.lane.b32.xlu1 %v15139_v35, %s15461_s27 }
 0xa82   : > { %10872 = vrot.lane.b32.xlu0 %v15149_v51, %s15461_s27 }
 0xa83   : > { %10870 = vrot.lane.b32.xlu1 %v15142_v4, %s15461_s27 }
 0xa86   : > { %10708 = vrot.lane.b32.xlu0 %v15139_v35, %s15462_s29 }
 0xa87   : > { %11037 = vrot.lane.b32.xlu1 %v15139_v35, %s15464_s1 }
 0xa8a   : > { %11041 = vrot.lane.b32.xlu0 %v15149_v51, %s15464_s1 }
 0xa8b   : > { %11039 = vrot.lane.b32.xlu1 %v15142_v4, %s15464_s1 }
 0xa8e   : > { %10877 = vrot.lane.b32.xlu0 %v15139_v35, %s15463_s3 }
 0xa8f   : > { %11046 = vrot.lane.b32.xlu1 %v15139_v35, %s15465_s30 }
 0xa92   : > { %11208 = vrot.lane.b32.xlu0 %v15142_v4, %s15466_s28 }
 0xa93   : > { %11210 = vrot.lane.b32.xlu1 %v15149_v51, %s15466_s28 }
 0xa96   : > { %11206 = vrot.lane.b32.xlu0 %v15139_v35, %s15466_s28 }
 0xa97   : > { %11215 = vrot.lane.b32.xlu1 %v15139_v35, %s15467_s23 }
 0xa9a   : > { %11376 = vperm.xlu0 %13185, %v11373_v29  }
 0xacc   : > { %v9892_v49 = vpop.permute.xlu0 %9891 }
 0xacd   : > { %v9894_v15 = vpop.permute.xlu1 %9893 }
 0xace   : > { %v9897_v39 = vsel %vm4202_vm2, %v9892_v49, %v9894_v15 }
 0xacf   : > { %11701 = vmatprep.subr.msk.mxu1 %vm15475_vm15, %v9897_v39  ;;  %vm15478_vm15 = vmmov %vm15476_vm0 }
 0xad0   : > { %v9889_v40 = vpop.permute.xlu0 %9888 }
 0xad1   : > { %v9900_v45 = vsel %vm4202_vm2, %v9889_v40, %v9892_v49  ;;  %v9877_v57 = vpop.permute.xlu1 %9876  ;;  %v11747_v49 = vld [vmem:[%s15371_s19 + $0x20] sm:$0xf] }
 0xad2   : > { %11702 = vmatpush1.msk.msra.mxu1 %vm15476_vm0, %v9900_v45 }
 0xad3   : > { %11703 = vmatmul.mubr.msk.f32.vlgmr.msra.gmra.mrb[38].mxu1 %vm9901_vm12, %v11700_v43 }
 0xad4   : > { %v9879_v44 = vpop.permute.xlu0 %9878  ;;  %10127 = vmatprep.mubr.f32.mxu1 %v13458_v38 }
 0xad5   : > { %v9882_v52 = vsel %vm3861_vm14, %v9877_v57, %v9879_v44  ;;  %v9872_v16 = vpop.permute.xlu1 %9871 }
 0xad6   : > { %v9885_v37 = vsel %vm3861_vm14, %v9872_v16, %v9877_v57  ;;  %11706 = vmatprep.subr.msk.mxu1 %vm15477_vm10, %v9882_v52  ;;  %vm15479_vm10 = vmmov %vm15476_vm0 }
 0xad7   : > { %11707 = vmatpush1.msk.msra.mxu1 %vm15478_vm15, %v9885_v37  ;;  %vm15480_vm15 = vmmov %vm15476_vm0 }
 0xad8   : > { %v10210_v24 = vpop.permute.xlu0 %10209 }
 0xad9   : > { %v10212_v33 = vpop.permute.xlu1 %10211 }
 0xada   : > { %v10215_v59 = vsel %vm4546_vm3, %v10210_v24, %v10212_v33 }
 0xadb   : > { %11708 = vmatmul.mubr.msk.f32.vlgmr.msra.gmra.mrb[38].mxu1 %vm9901_vm12, %v9869_v25  ;;  %11712 = vmatprep.subr.msk.mxu1 %vm15476_vm0, %v10215_v59 }
 0xadc   : > { %v10207_v32 = vpop.permute.xlu0 %10206  ;;  %10293 = vmatprep.mubr.f32.mxu1 %v13458_v38 }
 0xadd   : > { %v10218_v46 = vsel %vm4546_vm3, %v10207_v32, %v10210_v24  ;;  %v10379_v26 = vpop.permute.xlu1 %10378 }
 0xade   : > { %11713 = vmatpush1.msk.msra.mxu1 %vm15479_vm10, %v10218_v46  ;;  %vm15481_vm10 = vmmov %vm15476_vm0 }
 0xae0   : > { %v10381_v47 = vpop.permute.xlu0 %10380 }
 0xae1   : > { %v10384_v22 = vsel %vm1481_vm5, %v10379_v26, %v10381_v47  ;;  %v10376_v20 = vpop.permute.xlu1 %10375 }
 0xae2   : > { %v10387_v48 = vsel %vm1481_vm5, %v10376_v20, %v10379_v26  ;;  %11718 = vmatprep.subr.msk.mxu1 %vm15480_vm15, %v10384_v22  ;;  %vm15483_vm15 = vmmov %vm15476_vm0 }
 0xae3   : > { %11714 = vmatmul.mubr.msk.f32.vlgmr.msra.gmra.mrb[38].mxu1 %vm9901_vm12, %v11711_v19 }
 0xae4   : > { %11719 = vmatpush1.msk.msra.mxu1 %vm15476_vm0, %v10387_v48  ;;  %v9896_v8 = vpop.permute.xlu0 %9895  ;;  %10462 = vmatprep.mubr.f32.mxu1 %v13458_v38 }
 0xae5   : > { %11724 = vmatprep.subr.msk.mxu1 %vm15481_vm10, %v15142_v4  ;;  %v9898_v50 = vsel %vm4202_vm2, %v9894_v15, %v9896_v8  ;;  %v9881_v53 = vpop.permute.xlu1 %9880  ;;  %vm15485_vm2 = vmmov %vm15476_vm0 }
 0xae6   : > { %v9883_v55 = vsel %vm3861_vm14, %v9879_v44, %v9881_v53  ;;  %12466 = vmatpush3.msk.msra.mxu0 %vm15482_vm13, %v9898_v50  ;;  %vm15484_vm14 = vmmov %vm15476_vm0 }
 0xae7   : > { %12470 = vmatprep.subr.mxu0 %v13458_v38  ;;  %12468 = vmatmul.mubr.msk.f32.vlgmr.msra.gmra.mrb[54].mxu0 %vm9901_vm12, %v11700_v43  ;;  %vm15486_vm13 = vmmov %vm15476_vm0 }
 0xae8   : > { %12471 = vmatpush3.msk.msra.mxu0 %vm15483_vm15, %v9883_v55  ;;  %v10700_v58 = vpop.permute.xlu0 %10699  ;;  %12472 = vmatprep.mubr.msk.f32.mxu0 %vm13462_vm1, %v13458_v38  ;;  %vm15488_vm10 = vmmov %vm15476_vm0 }
 0xae9   : > { %v10704_v42 = vpop.permute.xlu1 %10703  ;;  %12475 = vmatprep.subr.mxu0 %v13458_v38  ;;  %vm15491_vm15 = vmmov %vm15476_vm0 }
 0xaeb   : > { %11720 = vmatmul.mubr.msk.f32.vlgmr.msra.gmra.mrb[38].mxu1 %vm9901_vm12, %v11717_v18  ;;  %12473 = vmatmul.mubr.msk.f32.vlgmr.msra.gmra.mrb[56].mxu0 %vm9901_vm12, %v9869_v25 }
 0xaec   : > { %11725 = vmatpush1.msk.msra.mxu1 %vm15484_vm14, %v15139_v35  ;;  %v10702_v62 = vpop.permute.xlu0 %10701  ;;  %12477 = vmatprep.mubr.msk.f32.mxu0 %vm13462_vm1, %v13458_v38  ;;  %vm15494_vm14 = vmmov %vm15476_vm0 }
 0xaed   : > { %v10706_v2 = vsel %vm5525_vm4, %v10702_v62, %v10704_v42  ;;  %v10214_v0 = vpop.permute.xlu1 %10213  ;;  %10617 = vmatprep.mubr.f32.mxu1 %v13458_v38  ;;  %v10705_v3 = vsel %vm5525_vm4, %v10700_v58, %v10702_v62  ;;  %vm15490_vm4 = vmmov %vm15476_vm0 }
 0xaee   : > { %v10216_v63 = vsel %vm4546_vm3, %v10212_v33, %v10214_v0  ;;  %11730 = vmatprep.subr.msk.mxu1 %vm15485_vm2, %v10706_v2  ;;  %vm15487_vm3 = vmmov %vm15476_vm0 }
 0xaef   : > { %12476 = vmatpush3.msk.msra.mxu0 %vm15486_vm13, %v10216_v63  ;;  %vm15499_vm13 = vcmask 400384  }
 0xaf0   : > { %12478 = vmatmul.mubr.msk.f32.vlgmr.msra.gmra.mrb[58].mxu0 %vm9901_vm12, %v11711_v19  ;;  %v10383_v1 = vpop.permute.xlu0 %10382  ;;  %12480 = vmatprep.subr.mxu0 %v13458_v38 }
 0xaf1   : > { %v10385_v28 = vsel %vm1481_vm5, %v10381_v47, %v10383_v1  ;;  %v10869_v5 = vpop.permute.xlu1 %10868  ;;  %12482 = vmatprep.mubr.msk.f32.mxu0 %vm13462_vm1, %v13458_v38  ;;  %vm15489_vm5 = vmmov %vm15476_vm0 }
 0xaf2   : > { %12481 = vmatpush3.msk.msra.mxu0 %vm15487_vm3, %v10385_v28  ;;  %vm15500_vm3 = vmmov %vm15476_vm0 }
 0xaf3   : > { %11726 = vmatmul.mubr.msk.f32.vlgmr.msra.gmra.mrb[38].mxu1 %vm9901_vm12, %v11723_v31  ;;  %12485 = vmatprep.subr.mxu0 %v13458_v38 }
 0xaf4   : > { %11731 = vmatpush1.msk.msra.mxu1 %vm15476_vm0, %v10705_v3  ;;  %12483 = vmatmul.mubr.msk.f32.vlgmr.msra.gmra.mrb[60].mxu0 %vm9901_vm12, %v11717_v18  ;;  %v10873_v7 = vpop.permute.xlu0 %10872 }
 0xaf5   : > { %12486 = vmatpush3.msk.msra.mxu0 %vm15488_vm10, %v15149_v51  ;;  %v10871_v9 = vpop.permute.xlu1 %10870  ;;  %12487 = vmatprep.mubr.msk.f32.mxu0 %vm13462_vm1, %v13458_v38 }
 0xaf6   : > { %v10875_v41 = vsel %vm5870_vm6, %v10871_v9, %v10873_v7  ;;  %12490 = vmatprep.subr.mxu0 %v13458_v38  ;;  %10786 = vmatprep.mubr.f32.mxu1 %v13458_v38  ;;  %v10874_v36 = vsel %vm5870_vm6, %v10869_v5, %v10871_v9  ;;  %vm15493_vm6 = vmmov %vm15476_vm0 }
 0xaf7   : > { %11736 = vmatprep.subr.msk.mxu1 %vm15489_vm5, %v10875_v41 }
 0xaf8   : > { %v10709_v10 = vpop.permute.xlu0 %10708  ;;  %12488 = vmatmul.mubr.msk.f32.vlgmr.msra.gmra.mrb[62].mxu0 %vm9901_vm12, %v11723_v31 }
 0xaf9   : > { %v10711_v21 = vsel %vm5542_vm7, %v10704_v42, %v10709_v10  ;;  %v11038_v6 = vpop.permute.xlu1 %11037  ;;  %12492 = vmatprep.mubr.msk.f32.mxu0 %vm13462_vm1, %v13458_v38  ;;  %vm15492_vm7 = vmmov %vm15476_vm0 }
 0xafa   : > { %12491 = vmatpush3.msk.msra.mxu0 %vm15490_vm4, %v10711_v21 }
 0xafb   : > { %11732 = vmatmul.mubr.msk.f32.vlgmr.msra.gmra.mrb[38].mxu1 %vm9901_vm12, %v11729_v11  ;;  %12495 = vmatprep.subr.mxu0 %v13458_v38 }
 0xafc   : > { %11737 = vmatpush1.msk.msra.mxu1 %vm15491_vm15, %v10874_v36  ;;  %v11042_v54 = vpop.permute.xlu0 %11041  ;;  %12493 = vmatmul.mubr.msk.f32.vlgmr.msra.gmra.mrb[64].mxu0 %vm9901_vm12, %v11729_v11 }
 0xafd   : > { %v11040_v60 = vpop.permute.xlu1 %11039  ;;  %10955 = vmatprep.mubr.f32.mxu1 %v13458_v38  ;;  %12497 = vmatprep.mubr.msk.f32.mxu0 %vm13462_vm1, %v13458_v38 }
 0xafe   : > { %v11044_v23 = vsel %vm6215_vm9, %v11040_v60, %v11042_v54  ;;  %v11043_v27 = vsel %vm6215_vm9, %v11038_v6, %v11040_v60  ;;  %vm15496_vm9 = vcmask 891904  }
 0xaff   : > { %11742 = vmatprep.subr.msk.mxu1 %vm15492_vm7, %v11044_v23  ;;  %vm15498_vm2 = vmmov %vm15496_vm9 }
 0xb00   : > { %v10878_v61 = vpop.permute.xlu0 %10877 }
 0xb01   : > { %v10880_v13 = vsel %vm5887_vm8, %v10873_v7, %v10878_v61  ;;  %v11047_v14 = vpop.permute.xlu1 %11046  ;;  %vm15495_vm8 = vmmov %vm15476_vm0 }
 0xb02   : > { %v11049_v17 = vsel %vm6232_vm11, %v11042_v54, %v11047_v14  ;;  %12496 = vmatpush3.msk.msra.mxu0 %vm15493_vm6, %v10880_v13  ;;  %vm15497_vm11 = vmmov %vm15476_vm0 }
 0xb03   : > { %11738 = vmatmul.mubr.msk.f32.vlgmr.msra.gmra.mrb[38].mxu1 %vm9901_vm12, %v11735_v56  ;;  %12498 = vmatmul.mubr.msk.f32.vlgmr.msra.gmra.mrb[66].mxu0 %vm9901_vm12, %v11735_v56 }
 0xb04   : > { %11743 = vmatpush1.msk.msra.mxu1 %vm15494_vm14, %v11043_v27  ;;  %12500 = vmatprep.subr.mxu0 %v13458_v38  ;;  %v11209_v12 = vpop.permute.xlu0 %11208 }
 0xb05   : > { %12501 = vmatpush3.msk.msra.mxu0 %vm15495_vm8, %v11049_v17  ;;  %v11211_v34 = vpop.permute.xlu1 %11210  ;;  %12502 = vmatprep.mubr.msk.f32.mxu0 %vm13462_vm1, %v13458_v38 }
 0xb06   : > { %v11213_v35 = vsel %vm15496_vm9, %v11209_v12, %v11211_v34  ;;  %11124 = vmatprep.mubr.f32.mxu1 %v13458_v38  ;;  %12505 = vmatprep.subr.mxu0 %v13458_v38 }
 0xb07   : > { %12503 = vmatmul.mubr.msk.f32.vlgmr.msra.gmra.mrb[68].mxu0 %vm9901_vm12, %v11741_v30  ;;  %11748 = vmatprep.subr.msk.mxu1 %vm15497_vm11, %v11213_v35 }
 0xb08   : > { %v11207_v4 = vpop.permute.xlu0 %11206  ;;  %12507 = vmatprep.mubr.msk.f32.mxu0 %vm13462_vm1, %v13458_v38  ;;  %vm11390_vm1 = vcmask 551936  }
 0xb09   : > { %v11212_v51 = vsel %vm15498_vm2, %v11207_v4, %v11209_v12  ;;  %v11216_v29 = vpop.permute.xlu1 %11215 }
 0xb0a   : > { %v11218_v15 = vsel %vm15499_vm13, %v11211_v34, %v11216_v29 }
 0xb0b   : > { %11744 = vmatmul.mubr.msk.f32.vlgmr.msra.gmra.mrb[38].mxu1 %vm9901_vm12, %v11741_v30  ;;  %12506 = vmatpush3.msk.msra.mxu0 %vm15500_vm3, %v11218_v15 }
 0xb0c   : > { %11749 = vmatpush1.msk.msra.mxu1 %vm15476_vm0, %v11212_v51  ;;  %12508 = vmatmul.mubr.msk.f32.vlgmr.msra.gmra.mrb[70].mxu0 %vm9901_vm12, %v11747_v49 }
 0xb0d   : > { %11293 = vmatprep.mubr.f32.mxu1 %v13458_v38 }
 0xb13   : > { %11750 = vmatmul.mubr.msk.f32.vlgmr.msra.gmra.mrb[38].mxu1 %vm9901_vm12, %v11747_v49 }
 0xb19   : > { %v11377_v58 = vpop.permute.xlu0 %11376 }
 0xbba   : > { %v10049_v39 = vpop.f32.mrb[54].mxu0 }
 0xbbb   : > { %v12469_v40 = vpop.f32.mrb[55].mxu0 }
 0xbbe   : > { %v10200_v43 = vpop.f32.mrb[56].mxu0 }
 0xbbf   : > { %v10201_v45 = vadd.f32 %v10200_v43, %v10049_v39  ;;  %v12474_v57 = vpop.f32.mrb[57].mxu0 }
 0xbc3   : > { %v10366_v44 = vpop.f32.mrb[58].mxu0 }
 0xbc4   : > { %v10372_v52 = vadd.f32 %v10366_v44, %v10201_v45  ;;  %v12479_v16 = vpop.f32.mrb[59].mxu0 }
 0xbc7   : > { %v10535_v37 = vpop.f32.mrb[60].mxu0 }
 0xbc8   : > { %v10541_v24 = vadd.f32 %v10535_v37, %v10372_v52  ;;  %v12484_v25 = vpop.f32.mrb[61].mxu0 }
 0xbcb   : > { %v10690_v33 = vpop.f32.mrb[62].mxu0 }
 0xbcc   : > { %v10696_v59 = vadd.f32 %v10690_v33, %v10541_v24  ;;  %v12489_v32 = vpop.f32.mrb[63].mxu0 }
 0xbcf   : > { %v10859_v46 = vpop.f32.mrb[64].mxu0 }
 0xbd0   : > { %v10865_v26 = vadd.f32 %v10859_v46, %v10696_v59  ;;  %v12494_v47 = vpop.f32.mrb[65].mxu0 }
 0xbd6   : > { %v11028_v38 = vpop.f32.mrb[66].mxu0 }
 0xbd7   : > { %v11034_v19 = vadd.f32 %v11028_v38, %v10865_v26  ;;  %v12499_v22 = vpop.f32.mrb[67].mxu0 }
 0xbda   : > { %v11197_v20 = vpop.f32.mrb[68].mxu0 }
 0xbdb   : > { %v11203_v48 = vadd.f32 %v11197_v20, %v11034_v19  ;;  %v12504_v8 = vpop.f32.mrb[69].mxu0 }
 0xbdf   : > { %v11366_v50 = vpop.f32.mrb[70].mxu0 }
 0xbe0   : > { %v11372_v53 = vadd.f32 %v11366_v50, %v11203_v48  ;;  %v12509_v55 = vpop.f32.mrb[71].mxu0 }
 0xbe2   : > { %v11381_v18 = vadd.f32 %v11377_v58, %v11372_v53 }
 0xbe4   : > { %13427 = vtanh.f32 %v11381_v18 }
 0xbe6   : > { %v11295_v42 = vpop.f32.mrb[38].mxu1 }
 0xbe7   : > { %v11379_v62 = vadd.f32 %v11377_v58, %v11295_v42  ;;  %v11297_v2 = vpop.f32.mrb[39].mxu1 }
 0xbe8   : > { %v11380_v0 = vadd.f32 %v11377_v58, %v11297_v2 }
 0xbe9   : > { %13429 = vtanh.f32 %v11379_v62 }
 0xbea   : > { %13431 = vtanh.f32 %v11380_v0 }
 0xbee   : > { %v13428_v63 = vpop.eup %13427 }
 0xbef   : > { %11391 = vst.msk [vmem:[%s696_s5 + $0x8] sm:$0xf] %vm11390_vm1, %v13428_v63 }
 0xbf3   : > { %v13430_v1 = vpop.eup %13429 }
 0xbf4   : > { %v13432_v31 = vpop.eup %13431 }
 0xbf5   : > { %v11387_v28 = vcombine.low %v13430_v1, %v13432_v31 }
 0xbf7   : > { %11389 = vst [vmem:[%s696_s5] sm:$0xff] %v11387_v28 }
 0xbf8 PF: > { %s31_s2 = sadd.s32 1, %s13439_s2  }
 0xbf9   : > { %p28_p4 = scmp.ge.s32.totalorder %s31_s2, 4  }
 0xbfb   :  { %30 = sbr.rel (!%p28_p4) target bundleno = 15 (0xf), region = 204 }

</bundles_post_ra>
